<compile_context>
chip_gen: v6e
topology: v6e:2x2x1
jax: 0.10.0
libtpu: 0.0.40
codegen_flags: <defaults>
</compile_context>

<pallas_src>
import jax
import jax.numpy as jnp
from jax.experimental import pallas as pl
from jax.experimental.pallas import tpu as pltpu

D = 2                                   # input/output dim of the predictor
HIDDEN = [512, 512, 512, 512, 256]      # hidden widths from the PyTorch module
IN_DIM = D + 1                          # x (2) concatenated with t (1)


def _silu(x):
    # SiLU / swish: x * sigmoid(x).  exp() goes to the EUP; the approximate
    # reciprocal lowers to the EUP vrcp slot instead of a VPU divide.
    return x * pl.reciprocal(1.0 + jnp.exp(-x), approx=True)


def noise_predictor_kernel(inp_ref,
                           w1, b1, w2, b2, w3, b3, w4, b4, w5, b5, w6, b6,
                           out_ref):
    def layer(h, w_ref, b_ref):
        w = w_ref[...]
        # bf16 (or f32) operands, f32 accumulation on the MXU; bias add in f32.
        acc = jnp.dot(h.astype(w.dtype), w, preferred_element_type=jnp.float32)
        return acc + b_ref[...]

    h = inp_ref[...]                                                # (TB, 3)
    h = _silu(layer(h, w1, b1))
    h = _silu(layer(h, w2, b2))
    h = _silu(layer(h, w3, b3))
    h = _silu(layer(h, w4, b4))
    h = _silu(layer(h, w5, b5))
    y = layer(h, w6, b6)
    out_ref[...] = y.astype(out_ref.dtype)                          # (TB, 2)


def init_params(key):
    """Deterministic init matching the PyTorch layer shapes.

    Weights are stored as (in_dim, out_dim) so the kernel can do h @ W.
    Biases are stored as (1, out_dim) so they stay 2D for the TPU layout.
    """
    dims = [IN_DIM] + HIDDEN + [D]
    params = []
    for i in range(len(dims) - 1):
        key, kw, kb = jax.random.split(key, 3)
        fan_in = dims[i]
        bound = 1.0 / jnp.sqrt(fan_in)
        w = jax.random.uniform(kw, (dims[i], dims[i + 1]), jnp.float32,
                               -bound, bound)
        b = jax.random.uniform(kb, (1, dims[i + 1]), jnp.float32,
                               -bound, bound)
        params += [w, b]
    return params


def _round_up(n, m):
    return ((n + m - 1) // m) * m


def noise_predictor(x, t, params, *, batch_tile=256,
                    compute_dtype=jnp.bfloat16):
    """Forward pass: concat(x, t) -> 5x (Linear + SiLU) -> Linear."""
    if t.ndim == 1:
        t = t[:, None]
    inp = jnp.concatenate([x, t], axis=1).astype(jnp.float32)       # (B, 3)
    B = inp.shape[0]

    # ---- batch tiling -----------------------------------------------------
    # Split the batch into cdiv(B, batch_tile) near-equal tiles (rounded up to
    # 8 sublanes) so odd batch sizes don't pad up to a whole extra tile.
    n_tiles = max(1, pl.cdiv(B, batch_tile))
    # If the whole batch fits in one tile but is >= 256 rows, split into two
    # parallel grid steps so both v7x TensorCores get full-height MXU work.
    if n_tiles == 1 and B >= 256:
        n_tiles = 2
    tile = _round_up(pl.cdiv(B, n_tiles), 8)
    padded_b = tile * n_tiles
    if padded_b != B:
        inp = jnp.pad(inp, ((0, padded_b - B), (0, 0)))
    grid = (n_tiles,)

    # Matmul operands in bf16 (halves weight DMA bytes, cuts f32 multi-pass
    # MXU matmuls); biases stay f32 so bias-add / SiLU stay in f32 vregs.
    ws = [w.astype(compute_dtype) for w in params[0::2]]
    bs = [b.astype(jnp.float32) for b in params[1::2]]
    kernel_params = []
    for w, b in zip(ws, bs):
        kernel_params += [w, b]

    # Full-array specs; the constant index_map means each weight/bias is
    # DMA'd into VMEM only once even when the grid has several steps.
    param_specs = [pl.BlockSpec(p.shape, lambda i: (0, 0))
                   for p in kernel_params]

    out = pl.pallas_call(
        noise_predictor_kernel,
        out_shape=jax.ShapeDtypeStruct((padded_b, D), jnp.float32),
        grid_spec=pltpu.PrefetchScalarGridSpec(
            num_scalar_prefetch=0,
            grid=grid,
            in_specs=[pl.BlockSpec((tile, IN_DIM), lambda i: (i, 0))]
                     + param_specs,
            out_specs=pl.BlockSpec((tile, D), lambda i: (i, 0)),
        ),
        compiler_params=pltpu.CompilerParams(
            dimension_semantics=("parallel",),
            # Headroom for large batch tiles; still < v7x's 64 MiB VMEM.
            vmem_limit_bytes=40 * 1024 * 1024,
        ),
    )(inp, *kernel_params)
    return out[:B]


def noise_predictor_ref(x, t, params, compute_dtype=jnp.bfloat16):
    """Pure-JAX reference (same operand dtypes as the kernel, exact sigmoid)."""
    if t.ndim == 1:
        t = t[:, None]
    h = jnp.concatenate([x, t], axis=1).astype(jnp.float32)
    ws = params[0::2]
    bs = params[1::2]
    for i, (w, b) in enumerate(zip(ws, bs)):
        h = jnp.dot(h.astype(compute_dtype), w.astype(compute_dtype),
                    preferred_element_type=jnp.float32) + b.astype(jnp.float32)
        if i < len(ws) - 1:
            h = jax.nn.silu(h)
    return h


if __name__ == "__main__":
    key = jax.random.PRNGKey(0)
    kp, kx, kt = jax.random.split(key, 3)

    params = init_params(kp)

    B = 64
    x = jax.random.normal(kx, (B, D), jnp.float32)          # noisy samples x_t
    t = jax.random.uniform(kt, (B,), jnp.float32)           # timesteps

    out = jax.block_until_ready(noise_predictor(x, t, params))

    ref = noise_predictor_ref(x, t, params, compute_dtype=jnp.bfloat16)
    assert out.shape == (B, D)
    # bf16 matmul operands + approximate EUP reciprocal in SiLU -> relaxed tol.
    assert jnp.allclose(out, ref, atol=2e-2, rtol=2e-2), "mismatch vs reference"

    print("KERNEL_OK")
</pallas_src>

<mosaic_0001>
module attributes {stable_mosaic.version = 11 : i64} {
  func.func @noise_predictor_kernel(%arg0: i32, %arg1: memref<64x3xf32, #tpu.memory_space<vmem>>, %arg2: memref<3x512xbf16, #tpu.memory_space<vmem>>, %arg3: memref<1x512xf32, #tpu.memory_space<vmem>>, %arg4: memref<512x512xbf16, #tpu.memory_space<vmem>>, %arg5: memref<1x512xf32, #tpu.memory_space<vmem>>, %arg6: memref<512x512xbf16, #tpu.memory_space<vmem>>, %arg7: memref<1x512xf32, #tpu.memory_space<vmem>>, %arg8: memref<512x512xbf16, #tpu.memory_space<vmem>>, %arg9: memref<1x512xf32, #tpu.memory_space<vmem>>, %arg10: memref<512x256xbf16, #tpu.memory_space<vmem>>, %arg11: memref<1x256xf32, #tpu.memory_space<vmem>>, %arg12: memref<256x2xbf16, #tpu.memory_space<vmem>>, %arg13: memref<1x2xf32, #tpu.memory_space<vmem>>, %arg14: memref<64x2xf32, #tpu.memory_space<vmem>>) attributes {dimension_semantics = [#tpu.dimension_semantics<parallel>], iteration_bounds = array<i64: 1>, scalar_prefetch = 0 : i64, scratch_operands = 0 : i64, tpu.core_type = #tpu.core_type<tc>, window_params = [{transform_indices = @transform_0, window_bounds = array<i64: 64, 3>}, {pipeline_mode = #tpu.pipeline_mode<synchronous>, transform_indices = @transform_1, window_bounds = array<i64: 3, 512>}, {pipeline_mode = #tpu.pipeline_mode<synchronous>, transform_indices = @transform_2, window_bounds = array<i64: 1, 512>}, {pipeline_mode = #tpu.pipeline_mode<synchronous>, transform_indices = @transform_3, window_bounds = array<i64: 512, 512>}, {pipeline_mode = #tpu.pipeline_mode<synchronous>, transform_indices = @transform_4, window_bounds = array<i64: 1, 512>}, {pipeline_mode = #tpu.pipeline_mode<synchronous>, transform_indices = @transform_5, window_bounds = array<i64: 512, 512>}, {pipeline_mode = #tpu.pipeline_mode<synchronous>, transform_indices = @transform_6, window_bounds = array<i64: 1, 512>}, {pipeline_mode = #tpu.pipeline_mode<synchronous>, transform_indices = @transform_7, window_bounds = array<i64: 512, 512>}, {pipeline_mode = #tpu.pipeline_mode<synchronous>, transform_indices = @transform_8, window_bounds = array<i64: 1, 512>}, {pipeline_mode = #tpu.pipeline_mode<synchronous>, transform_indices = @transform_9, window_bounds = array<i64: 512, 256>}, {pipeline_mode = #tpu.pipeline_mode<synchronous>, transform_indices = @transform_10, window_bounds = array<i64: 1, 256>}, {pipeline_mode = #tpu.pipeline_mode<synchronous>, transform_indices = @transform_11, window_bounds = array<i64: 256, 2>}, {pipeline_mode = #tpu.pipeline_mode<synchronous>, transform_indices = @transform_12, window_bounds = array<i64: 1, 2>}, {transform_indices = @transform_13, window_bounds = array<i64: 64, 2>}]} {
    %c0 = arith.constant 0 : index
    %c0_0 = arith.constant 0 : index
    %0 = vector.load %arg1[%c0, %c0_0] : memref<64x3xf32, #tpu.memory_space<vmem>>, vector<64x3xf32>
    %c0_1 = arith.constant 0 : index
    %c0_2 = arith.constant 0 : index
    %1 = vector.load %arg2[%c0_1, %c0_2] : memref<3x512xbf16, #tpu.memory_space<vmem>>, vector<3x512xbf16>
    %2 = arith.truncf %0 : vector<64x3xf32> to vector<64x3xbf16>
    %cst = arith.constant dense<0.000000e+00> : vector<64x512xf32>
    %3 = tpu.matmul %2, %1, %cst {dimension_numbers = #tpu.dot_dimension_numbers<[1], [0], [0], [1], [0, 0, 1, 1], [], []>} : vector<64x3xbf16>, vector<3x512xbf16>, vector<64x512xf32> -> vector<64x512xf32>
    %c0_3 = arith.constant 0 : index
    %c0_4 = arith.constant 0 : index
    %4 = vector.load %arg3[%c0_3, %c0_4] : memref<1x512xf32, #tpu.memory_space<vmem>>, vector<1x512xf32>
    %5 = vector.broadcast %4 : vector<1x512xf32> to vector<64x512xf32>
    %6 = arith.addf %3, %5 : vector<64x512xf32>
    %cst_5 = arith.constant 0.000000e+00 : f32
    %7 = vector.broadcast %cst_5 : f32 to vector<64x512xf32>
    %8 = arith.subf %7, %6 : vector<64x512xf32>
    %9 = math.exp %8 : vector<64x512xf32>
    %cst_6 = arith.constant 1.000000e+00 : f32
    %10 = vector.broadcast %cst_6 : f32 to vector<64x512xf32>
    %11 = arith.addf %10, %9 : vector<64x512xf32>
    %12 = tpu.reciprocal %11 {approx = true} : vector<64x512xf32> -> vector<64x512xf32>
    %13 = arith.mulf %6, %12 : vector<64x512xf32>
    %c0_7 = arith.constant 0 : index
    %c0_8 = arith.constant 0 : index
    %14 = vector.load %arg4[%c0_7, %c0_8] : memref<512x512xbf16, #tpu.memory_space<vmem>>, vector<512x512xbf16>
    %15 = arith.truncf %13 : vector<64x512xf32> to vector<64x512xbf16>
    %cst_9 = arith.constant dense<0.000000e+00> : vector<64x512xf32>
    %16 = tpu.matmul %15, %14, %cst_9 {dimension_numbers = #tpu.dot_dimension_numbers<[1], [0], [0], [1], [0, 0, 1, 1], [], []>} : vector<64x512xbf16>, vector<512x512xbf16>, vector<64x512xf32> -> vector<64x512xf32>
    %c0_10 = arith.constant 0 : index
    %c0_11 = arith.constant 0 : index
    %17 = vector.load %arg5[%c0_10, %c0_11] : memref<1x512xf32, #tpu.memory_space<vmem>>, vector<1x512xf32>
    %18 = vector.broadcast %17 : vector<1x512xf32> to vector<64x512xf32>
    %19 = arith.addf %16, %18 : vector<64x512xf32>
    %cst_12 = arith.constant 0.000000e+00 : f32
    %20 = vector.broadcast %cst_12 : f32 to vector<64x512xf32>
    %21 = arith.subf %20, %19 : vector<64x512xf32>
    %22 = math.exp %21 : vector<64x512xf32>
    %cst_13 = arith.constant 1.000000e+00 : f32
    %23 = vector.broadcast %cst_13 : f32 to vector<64x512xf32>
    %24 = arith.addf %23, %22 : vector<64x512xf32>
    %25 = tpu.reciprocal %24 {approx = true} : vector<64x512xf32> -> vector<64x512xf32>
    %26 = arith.mulf %19, %25 : vector<64x512xf32>
    %c0_14 = arith.constant 0 : index
    %c0_15 = arith.constant 0 : index
    %27 = vector.load %arg6[%c0_14, %c0_15] : memref<512x512xbf16, #tpu.memory_space<vmem>>, vector<512x512xbf16>
    %28 = arith.truncf %26 : vector<64x512xf32> to vector<64x512xbf16>
    %cst_16 = arith.constant dense<0.000000e+00> : vector<64x512xf32>
    %29 = tpu.matmul %28, %27, %cst_16 {dimension_numbers = #tpu.dot_dimension_numbers<[1], [0], [0], [1], [0, 0, 1, 1], [], []>} : vector<64x512xbf16>, vector<512x512xbf16>, vector<64x512xf32> -> vector<64x512xf32>
    %c0_17 = arith.constant 0 : index
    %c0_18 = arith.constant 0 : index
    %30 = vector.load %arg7[%c0_17, %c0_18] : memref<1x512xf32, #tpu.memory_space<vmem>>, vector<1x512xf32>
    %31 = vector.broadcast %30 : vector<1x512xf32> to vector<64x512xf32>
    %32 = arith.addf %29, %31 : vector<64x512xf32>
    %cst_19 = arith.constant 0.000000e+00 : f32
    %33 = vector.broadcast %cst_19 : f32 to vector<64x512xf32>
    %34 = arith.subf %33, %32 : vector<64x512xf32>
    %35 = math.exp %34 : vector<64x512xf32>
    %cst_20 = arith.constant 1.000000e+00 : f32
    %36 = vector.broadcast %cst_20 : f32 to vector<64x512xf32>
    %37 = arith.addf %36, %35 : vector<64x512xf32>
    %38 = tpu.reciprocal %37 {approx = true} : vector<64x512xf32> -> vector<64x512xf32>
    %39 = arith.mulf %32, %38 : vector<64x512xf32>
    %c0_21 = arith.constant 0 : index
    %c0_22 = arith.constant 0 : index
    %40 = vector.load %arg8[%c0_21, %c0_22] : memref<512x512xbf16, #tpu.memory_space<vmem>>, vector<512x512xbf16>
    %41 = arith.truncf %39 : vector<64x512xf32> to vector<64x512xbf16>
    %cst_23 = arith.constant dense<0.000000e+00> : vector<64x512xf32>
    %42 = tpu.matmul %41, %40, %cst_23 {dimension_numbers = #tpu.dot_dimension_numbers<[1], [0], [0], [1], [0, 0, 1, 1], [], []>} : vector<64x512xbf16>, vector<512x512xbf16>, vector<64x512xf32> -> vector<64x512xf32>
    %c0_24 = arith.constant 0 : index
    %c0_25 = arith.constant 0 : index
    %43 = vector.load %arg9[%c0_24, %c0_25] : memref<1x512xf32, #tpu.memory_space<vmem>>, vector<1x512xf32>
    %44 = vector.broadcast %43 : vector<1x512xf32> to vector<64x512xf32>
    %45 = arith.addf %42, %44 : vector<64x512xf32>
    %cst_26 = arith.constant 0.000000e+00 : f32
    %46 = vector.broadcast %cst_26 : f32 to vector<64x512xf32>
    %47 = arith.subf %46, %45 : vector<64x512xf32>
    %48 = math.exp %47 : vector<64x512xf32>
    %cst_27 = arith.constant 1.000000e+00 : f32
    %49 = vector.broadcast %cst_27 : f32 to vector<64x512xf32>
    %50 = arith.addf %49, %48 : vector<64x512xf32>
    %51 = tpu.reciprocal %50 {approx = true} : vector<64x512xf32> -> vector<64x512xf32>
    %52 = arith.mulf %45, %51 : vector<64x512xf32>
    %c0_28 = arith.constant 0 : index
    %c0_29 = arith.constant 0 : index
    %53 = vector.load %arg10[%c0_28, %c0_29] : memref<512x256xbf16, #tpu.memory_space<vmem>>, vector<512x256xbf16>
    %54 = arith.truncf %52 : vector<64x512xf32> to vector<64x512xbf16>
    %cst_30 = arith.constant dense<0.000000e+00> : vector<64x256xf32>
    %55 = tpu.matmul %54, %53, %cst_30 {dimension_numbers = #tpu.dot_dimension_numbers<[1], [0], [0], [1], [0, 0, 1, 1], [], []>} : vector<64x512xbf16>, vector<512x256xbf16>, vector<64x256xf32> -> vector<64x256xf32>
    %c0_31 = arith.constant 0 : index
    %c0_32 = arith.constant 0 : index
    %56 = vector.load %arg11[%c0_31, %c0_32] : memref<1x256xf32, #tpu.memory_space<vmem>>, vector<1x256xf32>
    %57 = vector.broadcast %56 : vector<1x256xf32> to vector<64x256xf32>
    %58 = arith.addf %55, %57 : vector<64x256xf32>
    %cst_33 = arith.constant 0.000000e+00 : f32
    %59 = vector.broadcast %cst_33 : f32 to vector<64x256xf32>
    %60 = arith.subf %59, %58 : vector<64x256xf32>
    %61 = math.exp %60 : vector<64x256xf32>
    %cst_34 = arith.constant 1.000000e+00 : f32
    %62 = vector.broadcast %cst_34 : f32 to vector<64x256xf32>
    %63 = arith.addf %62, %61 : vector<64x256xf32>
    %64 = tpu.reciprocal %63 {approx = true} : vector<64x256xf32> -> vector<64x256xf32>
    %65 = arith.mulf %58, %64 : vector<64x256xf32>
    %c0_35 = arith.constant 0 : index
    %c0_36 = arith.constant 0 : index
    %66 = vector.load %arg12[%c0_35, %c0_36] : memref<256x2xbf16, #tpu.memory_space<vmem>>, vector<256x2xbf16>
    %67 = arith.truncf %65 : vector<64x256xf32> to vector<64x256xbf16>
    %cst_37 = arith.constant dense<0.000000e+00> : vector<64x2xf32>
    %68 = tpu.matmul %67, %66, %cst_37 {dimension_numbers = #tpu.dot_dimension_numbers<[1], [0], [0], [1], [0, 0, 1, 1], [], []>} : vector<64x256xbf16>, vector<256x2xbf16>, vector<64x2xf32> -> vector<64x2xf32>
    %c0_38 = arith.constant 0 : index
    %c0_39 = arith.constant 0 : index
    %69 = vector.load %arg13[%c0_38, %c0_39] : memref<1x2xf32, #tpu.memory_space<vmem>>, vector<1x2xf32>
    %70 = vector.broadcast %69 : vector<1x2xf32> to vector<64x2xf32>
    %71 = arith.addf %68, %70 : vector<64x2xf32>
    %c0_40 = arith.constant 0 : index
    %c0_41 = arith.constant 0 : index
    %72 = vector.load %arg14[%c0_40, %c0_41] : memref<64x2xf32, #tpu.memory_space<vmem>>, vector<64x2xf32>
    tpu.vector_store %arg14[%c0_40, %c0_41], %71 {strides = array<i32>} : memref<64x2xf32, #tpu.memory_space<vmem>>, vector<64x2xf32>,
    return
  }
  func.func @transform_0(%arg0: i32) -> (i32, i32) {
    %c0_i32 = arith.constant 0 : i32
    %c0_i32_0 = arith.constant 0 : i32
    return %arg0, %c0_i32 : i32, i32
  }
  func.func @transform_1(%arg0: i32) -> (i32, i32) {
    %c0_i32 = arith.constant 0 : i32
    %c0_i32_0 = arith.constant 0 : i32
    %c0_i32_1 = arith.constant 0 : i32
    return %c0_i32, %c0_i32_0 : i32, i32
  }
  func.func @transform_2(%arg0: i32) -> (i32, i32) {
    %c0_i32 = arith.constant 0 : i32
    %c0_i32_0 = arith.constant 0 : i32
    %c0_i32_1 = arith.constant 0 : i32
    return %c0_i32, %c0_i32_0 : i32, i32
  }
  func.func @transform_3(%arg0: i32) -> (i32, i32) {
    %c0_i32 = arith.constant 0 : i32
    %c0_i32_0 = arith.constant 0 : i32
    %c0_i32_1 = arith.constant 0 : i32
    return %c0_i32, %c0_i32_0 : i32, i32
  }
  func.func @transform_4(%arg0: i32) -> (i32, i32) {
    %c0_i32 = arith.constant 0 : i32
    %c0_i32_0 = arith.constant 0 : i32
    %c0_i32_1 = arith.constant 0 : i32
    return %c0_i32, %c0_i32_0 : i32, i32
  }
  func.func @transform_5(%arg0: i32) -> (i32, i32) {
    %c0_i32 = arith.constant 0 : i32
    %c0_i32_0 = arith.constant 0 : i32
    %c0_i32_1 = arith.constant 0 : i32
    return %c0_i32, %c0_i32_0 : i32, i32
  }
  func.func @transform_6(%arg0: i32) -> (i32, i32) {
    %c0_i32 = arith.constant 0 : i32
    %c0_i32_0 = arith.constant 0 : i32
    %c0_i32_1 = arith.constant 0 : i32
    return %c0_i32, %c0_i32_0 : i32, i32
  }
  func.func @transform_7(%arg0: i32) -> (i32, i32) {
    %c0_i32 = arith.constant 0 : i32
    %c0_i32_0 = arith.constant 0 : i32
    %c0_i32_1 = arith.constant 0 : i32
    return %c0_i32, %c0_i32_0 : i32, i32
  }
  func.func @transform_8(%arg0: i32) -> (i32, i32) {
    %c0_i32 = arith.constant 0 : i32
    %c0_i32_0 = arith.constant 0 : i32
    %c0_i32_1 = arith.constant 0 : i32
    return %c0_i32, %c0_i32_0 : i32, i32
  }
  func.func @transform_9(%arg0: i32) -> (i32, i32) {
    %c0_i32 = arith.constant 0 : i32
    %c0_i32_0 = arith.constant 0 : i32
    %c0_i32_1 = arith.constant 0 : i32
    return %c0_i32, %c0_i32_0 : i32, i32
  }
  func.func @transform_10(%arg0: i32) -> (i32, i32) {
    %c0_i32 = arith.constant 0 : i32
    %c0_i32_0 = arith.constant 0 : i32
    %c0_i32_1 = arith.constant 0 : i32
    return %c0_i32, %c0_i32_0 : i32, i32
  }
  func.func @transform_11(%arg0: i32) -> (i32, i32) {
    %c0_i32 = arith.constant 0 : i32
    %c0_i32_0 = arith.constant 0 : i32
    %c0_i32_1 = arith.constant 0 : i32
    return %c0_i32, %c0_i32_0 : i32, i32
  }
  func.func @transform_12(%arg0: i32) -> (i32, i32) {
    %c0_i32 = arith.constant 0 : i32
    %c0_i32_0 = arith.constant 0 : i32
    %c0_i32_1 = arith.constant 0 : i32
    return %c0_i32, %c0_i32_0 : i32, i32
  }
  func.func @transform_13(%arg0: i32) -> (i32, i32) {
    %c0_i32 = arith.constant 0 : i32
    %c0_i32_0 = arith.constant 0 : i32
    return %arg0, %c0_i32 : i32, i32
  }
}

</mosaic_0001>

<bundles_post_ra>
// kernel: tpu_custom_call.1
= control target key start
LH: loop header
LB: loop body
LE: loop exit
PB: predicated region body
PF: predicated region fallthrough
CT: control target
= control target key end

     0   :  { %18 = vsyncpa [#allocation3], 0  ;;  %s8449_s0 = inlined_call_operand.vmem [shape: f32[64,3], index: 0, kind: input, shape index: {}]   ;;  %s8450_s1 = inlined_call_operand.vmem [shape: bf16[3,512], index: 1, kind: input, shape index: {}]   ;;  %s8451_s2 = inlined_call_operand.vmem [shape: f32[1,512], index: 2, kind: input, shape index: {}]   ;;  %s8452_s3 = inlined_call_operand.hbm [shape: bf16[512,512], index: 3, kind: input, shape index: {}]   ;;  %s8453_s4 = inlined_call_operand.vmem [shape: f32[1,512], index: 4, kind: input, shape index: {}]   ;;  %s8454_s5 = inlined_call_operand.hbm [shape: bf16[512,512], index: 5, kind: input, shape index: {}]   ;;  %s8455_s6 = inlined_call_operand.vmem [shape: f32[1,512], index: 6, kind: input, shape index: {}]   ;;  %s8456_s7 = inlined_call_operand.hbm [shape: bf16[512,512], index: 7, kind: input, shape index: {}]   ;;  %s8457_s8 = inlined_call_operand.vmem [shape: f32[1,512], index: 8, kind: input, shape index: {}]   ;;  %s8458_s9 = inlined_call_operand.hbm [shape: bf16[512,256], index: 9, kind: input, shape index: {}]   ;;  %s8459_s10 = inlined_call_operand.vmem [shape: f32[1,256], index: 10, kind: input, shape index: {}]   ;;  %s8460_s11 = inlined_call_operand.vmem [shape: bf16[256,2], index: 11, kind: input, shape index: {}]   ;;  %s8461_s12 = inlined_call_operand.vmem [shape: f32[1,2], index: 12, kind: input, shape index: {}]   ;;  %s8462_s13 = inlined_call_operand.vmem [shape: f32[64,2], index: 13, kind: output, shape index: {}]  }
   0x1   :  { %19 = vsyncpa [#allocation5], 0 }
   0x2   :  { %20 = vsyncpa [#allocation8], 0  ;;  %s7159_s25 = smov [#allocation4]   ;;  %s7160_s27 = smov [#allocation2]  }
   0x3   :  { %s46_s26 = sshll.u32 %s7159_s25, 4  ;;  %s32_s28 = sshll.u32 %s7160_s27, 4  ;;  %s47_s26 = int_to_ptr.vmem [resolvable:$true] %s46_s26  ;;  %s33_s28 = int_to_ptr.vmem [resolvable:$true] %s32_s28 }
   0x4   :  { %s7081_s29 = scalar_lea.vmem %s47_s26, 16384  ;;  %p7086_p1 = scmp.lt.s32.totalorder %s47_s26, %s47_s26 }
   0x5   :  { %p7082_p0 = scmp.ne.s32.totalorder %s47_s26, %s7081_s29  ;;  %p7087_p2 = scmp.lt.s32.totalorder %s7081_s29, %s7081_s29 }
   0x7   :  { %p7088_p3 = por %p7087_p2, %p7086_p1 }
   0x9   :  { %p7089_p4 = pnand %p7088_p3, %p7082_p0 }
   0xb   :  { %7092 = shalt.err (!%p7089_p4)
}
   0xc   :  { %s7161_s30 = smov 256   ;;  %s7162_s14 = smov 16  }
   0xd   :  { %52 = dma.hbm_to_vmem [thread:$0]  %s8454_s5, 16384, %s47_s26, [#allocation5], %s7161_s30, %s7161_s30, %s7162_s14  }
   0xe   :  { %s7101_s17 = scalar_lea.vmem %s33_s28, 16384  ;;  %p7106_p6 = scmp.lt.s32.totalorder %s33_s28, %s33_s28 }
   0xf   :  { %p7102_p5 = scmp.ne.s32.totalorder %s33_s28, %s7101_s17  ;;  %p7107_p7 = scmp.lt.s32.totalorder %s7101_s17, %s7101_s17 }
  0x11   :  { %p7108_p8 = por %p7107_p7, %p7106_p6 }
  0x13   :  { %p7109_p9 = pnand %p7108_p8, %p7102_p5 }
  0x15   :  { %7112 = shalt.err (!%p7109_p9)
}
  0x16   :  { %38 = dma.hbm_to_vmem [thread:$0]  %s8452_s3, 16384, %s33_s28, [#allocation3], %s7161_s30, %s7161_s30, %s7162_s14  }
  0x17   :  { %s7163_s20 = smov [#allocation6]   ;;  %s7164_s22 = smov [#allocation7]  }
  0x18   :  { %s60_s21 = sshll.u32 %s7163_s20, 4  ;;  %s74_s23 = sshll.u32 %s7164_s22, 4  ;;  %s61_s21 = int_to_ptr.vmem [resolvable:$true] %s60_s21  ;;  %s75_s23 = int_to_ptr.vmem [resolvable:$true] %s74_s23 }
  0x19   :  { %s7121_s24 = scalar_lea.vmem %s61_s21, 16384  ;;  %p7126_p11 = scmp.lt.s32.totalorder %s61_s21, %s61_s21 }
  0x1a   :  { %p7122_p10 = scmp.ne.s32.totalorder %s61_s21, %s7121_s24  ;;  %p7127_p12 = scmp.lt.s32.totalorder %s7121_s24, %s7121_s24 }
  0x1c   :  { %p7128_p13 = por %p7127_p12, %p7126_p11 }
  0x1e   :  { %p7129_p0 = pnand %p7128_p13, %p7122_p10 }
  0x20   :  { %7132 = shalt.err (!%p7129_p0)
}
  0x21   :  { %66 = dma.hbm_to_vmem [thread:$0]  %s8456_s7, 16384, %s61_s21, [#allocation5], %s7161_s30, %s7161_s30, %s7162_s14  }
  0x22   :  { %s7141_s26 = scalar_lea.vmem %s75_s23, 8192  ;;  %p7146_p2 = scmp.lt.s32.totalorder %s75_s23, %s75_s23 }
  0x23   :  { %p7142_p1 = scmp.ne.s32.totalorder %s75_s23, %s7141_s26  ;;  %p7147_p3 = scmp.lt.s32.totalorder %s7141_s26, %s7141_s26 }
  0x25   :  { %p7148_p4 = por %p7147_p3, %p7146_p2 }
  0x27   :  { %p7149_p5 = pnand %p7148_p4, %p7142_p1 }
  0x29   :  { %7152 = shalt.err (!%p7149_p5)
}
  0x2a   :  { %s7165_s3 = smov 128   ;;  %s7166_s27 = smov 8  }
  0x2b   :  { %80 = dma.hbm_to_vmem [thread:$0]  %s8458_s9, 8192, %s75_s23, [#allocation8], %s7165_s3, %s7165_s3, %s7166_s27  }
  0x2c   :  { %7153 = dma.done.wait [#allocation3], 16384  }
  0x2d   :  { %7154 = vsyncadd [#allocation3], 4294950912 }
  0x2e   :  { %7155 = dma.done.wait [#allocation5], 32768  }
  0x2f   :  { %7156 = vsyncadd [#allocation5], 4294934528 }
  0x30   :  { %7157 = dma.done.wait [#allocation8], 8192  }
  0x31   :  { %7158 = vsyncadd [#allocation8], 4294959104  ;;  %v115_v0 = vlaneseq  ;;  %v7167_v1 = vmov 1983009808   ;;  %vm166_vm0 = vcmask 1040384   ;;  %v7168_v4 = vmov 0  }
  0x32   :  { %v138_v2 = vunpack.c.l.s4 %v7167_v1  ;;  %214 = vmatprep.mubr.bf16.mxu0 %v7168_v4  ;;  %287 = vmatprep.mubr.bf16.mxu1 %v7168_v4  ;;  %vm167_vm1 = vcmask 1041408   ;;  %v7169_v7 = vmov 65535   ;;  %v108_v9 = vld [vmem:[%s8450_s1] sm:$0xff]  ;;  %v101_v17 = vld [vmem:[%s8449_s0 + $0x8] sm:$0xff]  ;;  %vm153_vm2 = vcmask 23552   ;;  %v102_v27 = vld [vmem:[%s8449_s0 + $0x10] sm:$0xff] }
  0x33   :  { %v7252_v3 = vshrl.u32 %v115_v0, 7  ;;  %v168_v8 = vsel %vm166_vm0, 4294967295, %v7169_v7  ;;  %v136_v12 = vcombine.high %v108_v9, %v108_v9  ;;  %v100_v15 = vld [vmem:[%s8449_s0] sm:$0xff]  ;;  %v103_v28 = vld [vmem:[%s8449_s0 + $0x18] sm:$0xff]  ;;  %v105_v41 = vld [vmem:[%s8449_s0 + $0x28] sm:$0xff]  ;;  %vm5252_vm3 = vcmask 15360  }
  0x34   :  { %v139_v5 = vunpack.c.0.s8 %v138_v2  ;;  %v169_v11 = vsel %vm167_vm1, %v168_v8, 0  ;;  %v5811_v20 = vld [vmem:[#allocation2 + $0xe4] ss:$16 sps:$4 sm:$0xff]   ;;  %v109_v23 = vpack.c.bf16 %v101_v17, %v100_v15  ;;  %v5809_v25 = vld [vmem:[#allocation2 + $0xe0] ss:$16 sps:$4 sm:$0xff]   ;;  %v110_v36 = vpack.c.bf16 %v103_v28, %v102_v27  ;;  %v107_v48 = vld [vmem:[%s8449_s0 + $0x38] sm:$0xff] }
  0x35   :  { %v5814_v24 = vld [vmem:[#allocation2 + $0x2e4] ss:$16 sps:$4 sm:$0xff]   ;;  %v5812_v29 = vld [vmem:[#allocation2 + $0x2e0] ss:$16 sps:$4 sm:$0xff]  }
  0x36   :  { %v142_v6 = vsub.s32 %v139_v5, %v7252_v3  ;;  %v5817_v26 = vld [vmem:[#allocation2 + $0xc4] ss:$16 sps:$4 sm:$0xff]   ;;  %v5815_v31 = vld [vmem:[#allocation2 + $0xc0] ss:$16 sps:$4 sm:$0xff]  }
  0x37   :  { %v5820_v30 = vld [vmem:[#allocation2 + $0x2c4] ss:$16 sps:$4 sm:$0xff]   ;;  %v5818_v32 = vld [vmem:[#allocation2 + $0x2c0] ss:$16 sps:$4 sm:$0xff]  }
  0x38   :  { %v143_v10 = vrot.slane %v108_v9, %v142_v6  ;;  %v150_v14 = vrot.slane %v136_v12, %v142_v6  ;;  %v5823_v33 = vld [vmem:[#allocation2 + $0xa4] ss:$16 sps:$4 sm:$0xff]   ;;  %v5821_v34 = vld [vmem:[#allocation2 + $0xa0] ss:$16 sps:$4 sm:$0xff]  }
  0x39   :  { %v5826_v35 = vld [vmem:[#allocation2 + $0x2a4] ss:$16 sps:$4 sm:$0xff]   ;;  %v5824_v38 = vld [vmem:[#allocation2 + $0x2a0] ss:$16 sps:$4 sm:$0xff]  }
  0x3a   :  { %v151_v13 = vcombine.high %v143_v10, %v143_v10  ;;  %v171_v16 = vand.u32 %v169_v11, %v143_v10  ;;  %v152_v19 = vcombine.high %v150_v14, %v150_v14  ;;  %v177_v21 = vand.u32 %v169_v11, %v150_v14  ;;  %v5829_v37 = vld [vmem:[#allocation2 + $0x84] ss:$16 sps:$4 sm:$0xff]   ;;  %v5827_v42 = vld [vmem:[#allocation2 + $0x80] ss:$16 sps:$4 sm:$0xff]  }
  0x3b   :  { %v5832_v39 = vld [vmem:[#allocation2 + $0x284] ss:$16 sps:$4 sm:$0xff]   ;;  %v5830_v44 = vld [vmem:[#allocation2 + $0x280] ss:$16 sps:$4 sm:$0xff]  }
  0x3c   :  { %v174_v18 = vand.u32 %v169_v11, %v151_v13  ;;  %v180_v22 = vand.u32 %v169_v11, %v152_v19  ;;  %v104_v40 = vld [vmem:[%s8449_s0 + $0x20] sm:$0xff]  ;;  %v106_v47 = vld [vmem:[%s8449_s0 + $0x30] sm:$0xff] }
  0x3d   :  { %v5835_v43 = vld [vmem:[#allocation2 + $0x64] ss:$16 sps:$4 sm:$0xff]   ;;  %v5833_v45 = vld [vmem:[#allocation2 + $0x60] ss:$16 sps:$4 sm:$0xff]   ;;  %v111_v46 = vpack.c.bf16 %v105_v41, %v104_v40  ;;  %v112_v49 = vpack.c.bf16 %v107_v48, %v106_v47 }
  0x3e   :  { %196 = vmatprep.subr.bf16.mxu0 %v174_v18  ;;  %269 = vmatprep.subr.bf16.mxu1 %v180_v22  ;;  %v5838_v50 = vld [vmem:[#allocation2 + $0x264] ss:$16 sps:$4 sm:$0xff]   ;;  %v5836_v51 = vld [vmem:[#allocation2 + $0x260] ss:$16 sps:$4 sm:$0xff]  }
  0x3f   :  { %197 = vmatpush1.bf16.msra.mxu0 %v171_v16  ;;  %270 = vmatpush1.bf16.msra.mxu1 %v177_v21  ;;  %v5841_v52 = vld [vmem:[#allocation2 + $0x44] ss:$16 sps:$4 sm:$0xff]   ;;  %v5839_v53 = vld [vmem:[#allocation2 + $0x40] ss:$16 sps:$4 sm:$0xff]  }
  0x40   :  { %1326 = vmatprep.subr.bf16.mxu0 %v5811_v20  ;;  %1399 = vmatprep.subr.bf16.mxu1 %v5814_v24  ;;  %v5844_v54 = vld [vmem:[#allocation2 + $0x244] ss:$16 sps:$4 sm:$0xff]   ;;  %v5842_v55 = vld [vmem:[#allocation2 + $0x240] ss:$16 sps:$4 sm:$0xff]  }
  0x41   :  { %v5847_v56 = vld [vmem:[#allocation2 + $0x24] ss:$16 sps:$4 sm:$0xff]   ;;  %v5845_v57 = vld [vmem:[#allocation2 + $0x20] ss:$16 sps:$4 sm:$0xff]  }
  0x42   :  { %5268 = vmatmul.mubr.msk.bf16.vlgmr.msra.gmra.mxu0 %vm153_vm2, %v109_v23  ;;  %5272 = vmatmul.mubr.msk.bf16.vlgmr.msra.gmra.mxu1 %vm153_vm2, %v109_v23  ;;  %v5850_v58 = vld [vmem:[#allocation2 + $0x224] ss:$16 sps:$4 sm:$0xff]   ;;  %v5848_v59 = vld [vmem:[#allocation2 + $0x220] ss:$16 sps:$4 sm:$0xff]  }
  0x43   :  { %224 = vmatprep.mubr.bf16.mxu0 %v7168_v4  ;;  %1327 = vmatpush1.bf16.msra.mxu0 %v5809_v25  ;;  %v5853_v60 = vld [vmem:[#allocation2 + $0x4] ss:$16 sps:$4 sm:$0xff]   ;;  %v5851_v61 = vld [vmem:[#allocation2] ss:$16 sps:$4 sm:$0xff]  }
  0x44   :  { %1328 = vmatprep.subr.bf16.mxu0 %v5817_v26  ;;  %297 = vmatprep.mubr.bf16.mxu1 %v7168_v4  ;;  %v5856_v62 = vld [vmem:[#allocation2 + $0x204] ss:$16 sps:$4 sm:$0xff]   ;;  %v5854_v63 = vld [vmem:[#allocation2 + $0x200] ss:$16 sps:$4 sm:$0xff]  }
  0x45   :  { %1400 = vmatpush1.bf16.msra.mxu1 %v5812_v29  ;;  %v5859_v0 = vld [vmem:[#allocation2 + $0x1e4] ss:$16 sps:$4 sm:$0xff]   ;;  %v5857_v1 = vld [vmem:[#allocation2 + $0x1e0] ss:$16 sps:$4 sm:$0xff]  }
  0x46   :  { %1401 = vmatprep.subr.bf16.mxu1 %v5820_v30  ;;  %v5862_v2 = vld [vmem:[#allocation2 + $0x3e4] ss:$16 sps:$4 sm:$0xff]   ;;  %v5863_v6 = vld [vmem:[#allocation2 + $0x1c0] ss:$16 sps:$4 sm:$0xff]  }
  0x47   :  { %1329 = vmatpush1.bf16.msra.mxu0 %v5815_v31  ;;  %v5865_v5 = vld [vmem:[#allocation2 + $0x1c4] ss:$16 sps:$4 sm:$0xff]   ;;  %v5866_v8 = vld [vmem:[#allocation2 + $0x3c0] ss:$16 sps:$4 sm:$0xff]  }
  0x48   :  { %1330 = vmatprep.subr.bf16.mxu0 %v5823_v33  ;;  %v5868_v7 = vld [vmem:[#allocation2 + $0x3c4] ss:$16 sps:$4 sm:$0xff]   ;;  %v5869_v10 = vld [vmem:[#allocation2 + $0x1a0] ss:$16 sps:$4 sm:$0xff]   ;;  %v5907_v33 = vld [vmem:[#allocation2 + $0xec] ss:$16 sps:$4 sm:$0xff]  }
  0x49   :  { %1402 = vmatpush1.bf16.msra.mxu1 %v5818_v32  ;;  %v5871_v9 = vld [vmem:[#allocation2 + $0x1a4] ss:$16 sps:$4 sm:$0xff]   ;;  %v5872_v12 = vld [vmem:[#allocation2 + $0x3a0] ss:$16 sps:$4 sm:$0xff]  }
  0x4a   :  { %5269 = vmatmul.mubr.msk.bf16.gmra.mxu0 %vm153_vm2, %v110_v36  ;;  %1403 = vmatprep.subr.bf16.mxu1 %v5826_v35  ;;  %v5874_v11 = vld [vmem:[#allocation2 + $0x3a4] ss:$16 sps:$4 sm:$0xff]   ;;  %v5875_v14 = vld [vmem:[#allocation2 + $0x180] ss:$16 sps:$4 sm:$0xff]   ;;  %v7299_v35 = vsub.s32 0, %v7252_v3 }
  0x4b   :  { %234 = vmatprep.mubr.bf16.mxu0 %v7168_v4  ;;  %1331 = vmatpush1.bf16.msra.mxu0 %v5821_v34  ;;  %v5877_v13 = vld [vmem:[#allocation2 + $0x184] ss:$16 sps:$4 sm:$0xff]   ;;  %v5878_v16 = vld [vmem:[#allocation2 + $0x380] ss:$16 sps:$4 sm:$0xff]   ;;  %v5910_v34 = vld [vmem:[#allocation2 + $0x2ec] ss:$16 sps:$4 sm:$0xff]  }
  0x4c   :  { %5273 = vmatmul.mubr.msk.bf16.gmra.mxu1 %vm153_vm2, %v110_v36  ;;  %1332 = vmatprep.subr.bf16.mxu0 %v5829_v37  ;;  %v5880_v15 = vld [vmem:[#allocation2 + $0x384] ss:$16 sps:$4 sm:$0xff]   ;;  %v5881_v18 = vld [vmem:[#allocation2 + $0x160] ss:$16 sps:$4 sm:$0xff]   ;;  %v7302_v36 = vsub.s32 1, %v7252_v3  ;;  %v7305_v37 = vsub.s32 2, %v7252_v3 }
  0x4d   :  { %307 = vmatprep.mubr.bf16.mxu1 %v7168_v4  ;;  %1404 = vmatpush1.bf16.msra.mxu1 %v5824_v38  ;;  %v5883_v17 = vld [vmem:[#allocation2 + $0x164] ss:$16 sps:$4 sm:$0xff]   ;;  %v5884_v20 = vld [vmem:[#allocation2 + $0x360] ss:$16 sps:$4 sm:$0xff]   ;;  %v7308_v38 = vsub.s32 3, %v7252_v3 }
  0x4e   :  { %1405 = vmatprep.subr.bf16.mxu1 %v5832_v39  ;;  %v5886_v19 = vld [vmem:[#allocation2 + $0x364] ss:$16 sps:$4 sm:$0xff]   ;;  %v5887_v22 = vld [vmem:[#allocation2 + $0x140] ss:$16 sps:$4 sm:$0xff]  }
  0x4f   :  { %1333 = vmatpush1.bf16.msra.mxu0 %v5827_v42  ;;  %v5889_v21 = vld [vmem:[#allocation2 + $0x144] ss:$16 sps:$4 sm:$0xff]   ;;  %v5890_v24 = vld [vmem:[#allocation2 + $0x340] ss:$16 sps:$4 sm:$0xff]   ;;  %8465 = vst [vmem:[#allocation12_spill] sm:$0xff] %v7308_v38 }
  0x50   :  { %1334 = vmatprep.subr.bf16.mxu0 %v5835_v43  ;;  %v5892_v23 = vld [vmem:[#allocation2 + $0x344] ss:$16 sps:$4 sm:$0xff]   ;;  %v5893_v26 = vld [vmem:[#allocation2 + $0x120] ss:$16 sps:$4 sm:$0xff]  }
  0x51   :  { %1406 = vmatpush1.bf16.msra.mxu1 %v5830_v44  ;;  %v5895_v25 = vld [vmem:[#allocation2 + $0x124] ss:$16 sps:$4 sm:$0xff]   ;;  %v5896_v28 = vld [vmem:[#allocation2 + $0x320] ss:$16 sps:$4 sm:$0xff]  }
  0x52   :  { %5270 = vmatmul.mubr.msk.bf16.gmra.mxu0 %vm153_vm2, %v111_v46  ;;  %1407 = vmatprep.subr.bf16.mxu1 %v5838_v50  ;;  %v5898_v27 = vld [vmem:[#allocation2 + $0x324] ss:$16 sps:$4 sm:$0xff]   ;;  %v5899_v30 = vld [vmem:[#allocation2 + $0x100] ss:$16 sps:$4 sm:$0xff]  }
  0x53   :  { %244 = vmatprep.mubr.bf16.mxu0 %v7168_v4  ;;  %1335 = vmatpush1.bf16.msra.mxu0 %v5833_v45  ;;  %v5901_v29 = vld [vmem:[#allocation2 + $0x104] ss:$16 sps:$4 sm:$0xff]   ;;  %v5902_v32 = vld [vmem:[#allocation2 + $0x300] ss:$16 sps:$4 sm:$0xff]  }
  0x54   :  { %5274 = vmatmul.mubr.msk.bf16.gmra.mxu1 %vm153_vm2, %v111_v46  ;;  %1336 = vmatprep.subr.bf16.mxu0 %v5841_v52  ;;  %v5904_v31 = vld [vmem:[#allocation2 + $0x304] ss:$16 sps:$4 sm:$0xff]   ;;  %v113_v39 = vld [vmem:[%s8451_s2] sm:$0xf] }
  0x55   :  { %317 = vmatprep.mubr.bf16.mxu1 %v7168_v4  ;;  %1408 = vmatpush1.bf16.msra.mxu1 %v5836_v51  ;;  %v5860_v4 = vld [vmem:[#allocation2 + $0x3e0] ss:$16 sps:$4 sm:$0xff]   ;;  %v7314_v40 = vrot.slane %v113_v39, %v7299_v35  ;;  %v7317_v41 = vrot.slane %v113_v39, %v7302_v36  ;;  %v7320_v42 = vrot.slane %v113_v39, %v7305_v37 }
  0x56   :  { %1409 = vmatprep.subr.bf16.mxu1 %v5844_v54  ;;  %v7326_v46 = vrot.slane %v113_v39, %v7308_v38 }
  0x57   :  { %1337 = vmatpush1.bf16.msra.mxu0 %v5839_v53 }
  0x58   :  { %1338 = vmatprep.subr.bf16.mxu0 %v5847_v56 }
  0x59   :  { %1410 = vmatpush1.bf16.msra.mxu1 %v5842_v55 }
  0x5a   :  { %5271 = vmatmul.mubr.msk.bf16.gmra.mxu0 %vm153_vm2, %v112_v49  ;;  %1411 = vmatprep.subr.bf16.mxu1 %v5850_v58 }
  0x5b   :  { %1339 = vmatpush1.bf16.msra.mxu0 %v5845_v57 }
  0x5c   :  { %5275 = vmatmul.mubr.msk.bf16.gmra.mxu1 %vm153_vm2, %v112_v49  ;;  %1340 = vmatprep.subr.bf16.mxu0 %v5853_v60 }
  0x5d   :  { %1412 = vmatpush1.bf16.msra.mxu1 %v5848_v59 }
  0x5e   :  { %1413 = vmatprep.subr.bf16.mxu1 %v5856_v62 }
  0x5f   :  { %1341 = vmatpush1.bf16.msra.mxu0 %v5851_v61 }
  0x60   :  { %1342 = vmatprep.subr.bf16.mxu0 %v5859_v0 }
  0x61   :  { %1414 = vmatpush1.bf16.msra.mxu1 %v5854_v63 }
  0x62   :  { %1415 = vmatprep.subr.bf16.mxu1 %v5862_v2 }
  0x63   :  { %1343 = vmatpush2.bf16.msra.mxu0 %v5857_v1 }
  0x64   :  { %1344 = vmatprep.subr.bf16.mxu0 %v5865_v5 }
  0x65   :  { %1416 = vmatpush2.bf16.msra.mxu1 %v5860_v4 }
  0x66   :  { %1417 = vmatprep.subr.bf16.mxu1 %v5868_v7 }
  0x67   :  { %1345 = vmatpush2.bf16.msra.mxu0 %v5863_v6 }
  0x68   :  { %1346 = vmatprep.subr.bf16.mxu0 %v5871_v9 }
  0x69   :  { %1418 = vmatpush2.bf16.msra.mxu1 %v5866_v8 }
  0x6a   :  { %1419 = vmatprep.subr.bf16.mxu1 %v5874_v11 }
  0x6b   :  { %1347 = vmatpush2.bf16.msra.mxu0 %v5869_v10 }
  0x6c   :  { %1348 = vmatprep.subr.bf16.mxu0 %v5877_v13 }
  0x6d   :  { %1420 = vmatpush2.bf16.msra.mxu1 %v5872_v12 }
  0x6e   :  { %1421 = vmatprep.subr.bf16.mxu1 %v5880_v15 }
  0x6f   :  { %1349 = vmatpush2.bf16.msra.mxu0 %v5875_v14 }
  0x70   :  { %1350 = vmatprep.subr.bf16.mxu0 %v5883_v17 }
  0x71   :  { %1422 = vmatpush2.bf16.msra.mxu1 %v5878_v16 }
  0x72   :  { %1423 = vmatprep.subr.bf16.mxu1 %v5886_v19 }
  0x73   :  { %1351 = vmatpush2.bf16.msra.mxu0 %v5881_v18 }
  0x74   :  { %1352 = vmatprep.subr.bf16.mxu0 %v5889_v21 }
  0x75   :  { %1424 = vmatpush2.bf16.msra.mxu1 %v5884_v20 }
  0x76   :  { %1425 = vmatprep.subr.bf16.mxu1 %v5892_v23 }
  0x77   :  { %1353 = vmatpush2.bf16.msra.mxu0 %v5887_v22 }
  0x78   :  { %1354 = vmatprep.subr.bf16.mxu0 %v5895_v25 }
  0x79   :  { %1426 = vmatpush2.bf16.msra.mxu1 %v5890_v24 }
  0x7a   :  { %1427 = vmatprep.subr.bf16.mxu1 %v5898_v27 }
  0x7b   :  { %1355 = vmatpush2.bf16.msra.mxu0 %v5893_v26 }
  0x7c   :  { %1356 = vmatprep.subr.bf16.mxu0 %v5901_v29 }
  0x7d   :  { %1428 = vmatpush2.bf16.msra.mxu1 %v5896_v28 }
  0x7e   :  { %1429 = vmatprep.subr.bf16.mxu1 %v5904_v31 }
  0x7f   :  { %1357 = vmatpush2.bf16.msra.mxu0 %v5899_v30 }
  0x80   :  { %1472 = vmatprep.subr.bf16.mxu0 %v5907_v33 }
  0x81   :  { %1430 = vmatpush2.bf16.msra.mxu1 %v5902_v32 }
  0x82   :  { %1545 = vmatprep.subr.bf16.mxu1 %v5910_v34 }
 0x102   :  { %v216_v43 = vpop.f32.mrf.mxu0  ;;  %v289_v3 = vpop.f32.mrf.mxu1 }
 0x103   :  { %v7323_v44 = vadd.f32 %v216_v43, %v7314_v40  ;;  %v7333_v49 = vadd.f32 %v289_v3, %v7320_v42 }
 0x104   :  { %v218_v45 = vpop.f32.mrf.mxu0  ;;  %v291_v51 = vpop.f32.mrf.mxu1 }
 0x105   :  { %v328_v47 = vsub.f32 0.0, %v7323_v44  ;;  %v7330_v48 = vadd.f32 %v218_v45, %v7317_v41  ;;  %v330_v54 = vsub.f32 0.0, %v7333_v49  ;;  %v7341_v56 = vadd.f32 %v291_v51, %v7326_v46 }
 0x106   :  { %v220_v50 = vpop.f32.mrf.mxu0  ;;  %v293_v58 = vpop.f32.mrf.mxu1 }
 0x107   :  { %v360_v52 = vmul.f32 1.442695, %v328_v47  ;;  %v329_v53 = vsub.f32 0.0, %v7330_v48  ;;  %v7338_v55 = vadd.f32 %v220_v50, %v7314_v40  ;;  %v364_v60 = vmul.f32 1.442695, %v330_v54 }
 0x108   :  { %v222_v57 = vpop.f32.mrf.mxu0  ;;  %v331_v62 = vsub.f32 0.0, %v7341_v56  ;;  %v7349_v0 = vadd.f32 %v293_v58, %v7320_v42  ;;  %v295_v2 = vpop.f32.mrf.mxu1 }
 0x109   :  { %6497 = vpow2.f32 %v360_v52  ;;  %v362_v59 = vmul.f32 1.442695, %v329_v53  ;;  %v332_v61 = vsub.f32 0.0, %v7338_v55  ;;  %v7346_v63 = vadd.f32 %v222_v57, %v7317_v41 }
 0x10a   :  { %v226_v1 = vpop.f32.mrf.mxu0  ;;  %v7355_v6 = vadd.f32 %v295_v2, %v7326_v46  ;;  %v366_v7 = vmul.f32 1.442695, %v331_v62  ;;  %v334_v9 = vsub.f32 0.0, %v7349_v0 }
 0x10b   :  { %6499 = vpow2.f32 %v362_v59  ;;  %v368_v4 = vmul.f32 1.442695, %v332_v61  ;;  %v7352_v5 = vadd.f32 %v226_v1, %v7314_v40  ;;  %v333_v8 = vsub.f32 0.0, %v7346_v63 }
 0x10c   :  { %6501 = vpow2.f32 %v364_v60  ;;  %v228_v10 = vpop.f32.mrf.mxu0  ;;  %v299_v11 = vpop.f32.mrf.mxu1  ;;  %v335_v13 = vsub.f32 0.0, %v7355_v6  ;;  %v372_v16 = vmul.f32 1.442695, %v334_v9 }
 0x10d   :  { %6503 = vpow2.f32 %v368_v4  ;;  %v336_v12 = vsub.f32 0.0, %v7352_v5  ;;  %v7362_v14 = vadd.f32 %v228_v10, %v7317_v41  ;;  %v370_v15 = vmul.f32 1.442695, %v333_v8 }
 0x10e   :  { %6505 = vpow2.f32 %v366_v7  ;;  %v7365_v17 = vadd.f32 %v299_v11, %v7320_v42  ;;  %v230_v18 = vpop.f32.mrf.mxu0  ;;  %v301_v19 = vpop.f32.mrf.mxu1  ;;  %v374_v21 = vmul.f32 1.442695, %v335_v13 }
 0x10f   :  { %v376_v20 = vmul.f32 1.442695, %v336_v12  ;;  %v337_v22 = vsub.f32 0.0, %v7362_v14  ;;  %v7369_v23 = vadd.f32 %v230_v18, %v7314_v40  ;;  %6507 = vpow2.f32 %v370_v15 }
 0x110   :  { %v338_v24 = vsub.f32 0.0, %v7365_v17  ;;  %v7373_v25 = vadd.f32 %v301_v19, %v7326_v46  ;;  %v232_v26 = vpop.f32.mrf.mxu0  ;;  %v303_v27 = vpop.f32.mrf.mxu1  ;;  %6509 = vpow2.f32 %v372_v16 }
 0x111   :  { %v378_v28 = vmul.f32 1.442695, %v337_v22  ;;  %v340_v29 = vsub.f32 0.0, %v7369_v23  ;;  %v7377_v30 = vadd.f32 %v232_v26, %v7317_v41  ;;  %6511 = vpow2.f32 %v376_v20 }
 0x112   :  { %v380_v31 = vmul.f32 1.442695, %v338_v24  ;;  %v339_v32 = vsub.f32 0.0, %v7373_v25  ;;  %v7381_v33 = vadd.f32 %v303_v27, %v7320_v42  ;;  %v236_v34 = vpop.f32.mrf.mxu0  ;;  %v305_v39 = vpop.f32.mrf.mxu1  ;;  %6513 = vpow2.f32 %v374_v21 }
 0x113   :  { %v384_v43 = vmul.f32 1.442695, %v340_v29  ;;  %v341_v45 = vsub.f32 0.0, %v7377_v30  ;;  %6515 = vpow2.f32 %v378_v28  ;;  %v7386_v54 = vadd.f32 %v236_v34, %v7314_v40 }
 0x114   :  { %v382_v3 = vmul.f32 1.442695, %v339_v32  ;;  %v342_v47 = vsub.f32 0.0, %v7381_v33  ;;  %v238_v50 = vpop.f32.mrf.mxu0  ;;  %v309_v51 = vpop.f32.mrf.mxu1  ;;  %6517 = vpow2.f32 %v380_v31  ;;  %v7389_v62 = vadd.f32 %v305_v39, %v7326_v46 }
 0x115   :  { %v386_v52 = vmul.f32 1.442695, %v341_v45  ;;  %6519 = vpow2.f32 %v384_v43  ;;  %v344_v10 = vsub.f32 0.0, %v7386_v54  ;;  %v7394_v16 = vadd.f32 %v238_v50, %v7317_v41 }
 0x116   :  { %v6498_v53 = vpop.eup %6497  ;;  %v240_v57 = vpop.f32.mrf.mxu0  ;;  %6521 = vpow2.f32 %v382_v3  ;;  %v388_v60 = vmul.f32 1.442695, %v342_v47  ;;  %v343_v15 = vsub.f32 0.0, %v7389_v62  ;;  %v7397_v26 = vadd.f32 %v309_v51, %v7320_v42 }
 0x117   :  { %v311_v58 = vpop.f32.mrf.mxu1  ;;  %v424_v59 = vadd.f32 1.0, %v6498_v53  ;;  %6523 = vpow2.f32 %v386_v52  ;;  %v392_v24 = vmul.f32 1.442695, %v344_v10  ;;  %v7400_v29 = vadd.f32 %v240_v57, %v7314_v40 }
 0x118   :  { %v6500_v61 = vpop.eup %6499  ;;  %v242_v1 = vpop.f32.mrf.mxu0  ;;  %v390_v34 = vmul.f32 1.442695, %v343_v15  ;;  %v345_v39 = vsub.f32 0.0, %v7394_v16  ;;  %v7404_v47 = vadd.f32 %v311_v58, %v7326_v46  ;;  %v346_v57 = vsub.f32 0.0, %v7397_v26 }
 0x119   :  { %v6502_v2 = vpop.eup %6501  ;;  %v425_v4 = vadd.f32 1.0, %v6500_v61  ;;  %v313_v7 = vpop.f32.mrf.mxu1  ;;  %6525 = vrcp.f32 %v424_v59  ;;  %v7407_v50 = vadd.f32 %v242_v1, %v7317_v41 }
 0x11a   :  { %v6504_v8 = vpop.eup %6503  ;;  %v426_v9 = vadd.f32 1.0, %v6502_v2  ;;  %6527 = vpow2.f32 %v388_v60  ;;  %v246_v18 = vpop.f32.mrf.mxu0  ;;  %v7411_v59 = vadd.f32 %v313_v7, %v7320_v42  ;;  %v348_v2 = vsub.f32 0.0, %v7400_v29 }
 0x11b   :  { %v6506_v11 = vpop.eup %6505  ;;  %v428_v12 = vadd.f32 1.0, %v6504_v8  ;;  %6529 = vrcp.f32 %v425_v4  ;;  %v315_v20 = vpop.f32.mrf.mxu1  ;;  %v7415_v58 = vadd.f32 %v246_v18, %v7314_v40 }
 0x11c   :  { %v427_v13 = vadd.f32 1.0, %v6506_v11  ;;  %v6508_v19 = vpop.eup %6507  ;;  %v248_v43 = vpop.f32.mrf.mxu0  ;;  %v7418_v8 = vadd.f32 %v315_v20, %v7326_v46  ;;  %v347_v11 = vsub.f32 0.0, %v7404_v47  ;;  %v350_v20 = vsub.f32 0.0, %v7411_v59 }
 0x11d   :  { %6531 = vrcp.f32 %v428_v12  ;;  %v6510_v21 = vpop.eup %6509  ;;  %v429_v22 = vadd.f32 1.0, %v6508_v19  ;;  %v319_v51 = vpop.f32.mrf.mxu1  ;;  %v349_v12 = vsub.f32 0.0, %v7407_v50 }
 0x11e   :  { %6533 = vrcp.f32 %v426_v9  ;;  %v6512_v27 = vpop.eup %6511  ;;  %v430_v28 = vadd.f32 1.0, %v6510_v21  ;;  %v7421_v9 = vadd.f32 %v248_v43, %v7317_v41  ;;  %v250_v10 = vpop.f32.mrf.mxu0 }
 0x11f   :  { %6535 = vrcp.f32 %v427_v13  ;;  %v6514_v31 = vpop.eup %6513  ;;  %v432_v32 = vadd.f32 1.0, %v6512_v27  ;;  %v7426_v13 = vadd.f32 %v319_v51, %v7320_v42  ;;  %v321_v15 = vpop.f32.mrf.mxu1 }
 0x120   :  { %6537 = vrcp.f32 %v429_v22  ;;  %v6516_v45 = vpop.eup %6515  ;;  %v431_v3 = vadd.f32 1.0, %v6514_v31  ;;  %v394_v22 = vmul.f32 1.442695, %v345_v39  ;;  %v351_v31 = vsub.f32 0.0, %v7418_v8  ;;  %v252_v43 = vpop.f32.mrf.mxu0 }
 0x121   :  { %6539 = vrcp.f32 %v430_v28  ;;  %v6518_v52 = vpop.eup %6517  ;;  %v433_v53 = vadd.f32 1.0, %v6516_v45  ;;  %v352_v28 = vsub.f32 0.0, %v7415_v58  ;;  %v354_v51 = vsub.f32 0.0, %v7426_v13 }
 0x122   :  { %6541 = vpow2.f32 %v392_v24  ;;  %v6520_v60 = vpop.eup %6519  ;;  %v434_v61 = vadd.f32 1.0, %v6518_v52  ;;  %v396_v24 = vmul.f32 1.442695, %v346_v57  ;;  %v7434_v52 = vadd.f32 %v250_v10, %v7314_v40 }
 0x123   :  { %6543 = vrcp.f32 %v431_v3  ;;  %v6522_v4 = vpop.eup %6521  ;;  %v436_v1 = vadd.f32 1.0, %v6520_v60  ;;  %v400_v3 = vmul.f32 1.442695, %v348_v2  ;;  %v398_v57 = vmul.f32 1.442695, %v347_v11 }
 0x124   :  { %6545 = vrcp.f32 %v432_v32  ;;  %v6524_v7 = vpop.eup %6523  ;;  %v435_v18 = vadd.f32 1.0, %v6522_v4  ;;  %v353_v32 = vsub.f32 0.0, %v7421_v9  ;;  %v402_v60 = vmul.f32 1.442695, %v349_v12 }
 0x125   :  { %6547 = vrcp.f32 %v433_v53  ;;  %v437_v19 = vadd.f32 1.0, %v6524_v7  ;;  %v323_v53 = vpop.f32.mrf.mxu1  ;;  %v7437_v7 = vadd.f32 %v321_v15, %v7326_v46  ;;  %v406_v40 = vmul.f32 1.442695, %v351_v31 }
 0x126   :  { %6549 = vrcp.f32 %v436_v1  ;;  %v6526_v21 = vpop.eup %6525  ;;  %v410_v10 = vmul.f32 1.442695, %v353_v32  ;;  %v412_v11 = vmul.f32 1.442695, %v354_v51  ;;  %v356_v12 = vsub.f32 0.0, %v7434_v52 }
 0x127   :  { %6551 = vrcp.f32 %v434_v61  ;;  %v6528_v27 = vpop.eup %6527  ;;  %v404_v61 = vmul.f32 1.442695, %v350_v20  ;;  %v325_v20 = vpop.f32.mrf.mxu1 }
 0x128   :  { %6553 = vrcp.f32 %v437_v19  ;;  %v6530_v45 = vpop.eup %6529  ;;  %v438_v1 = vadd.f32 1.0, %v6528_v27  ;;  %v408_v19 = vmul.f32 1.442695, %v352_v28  ;;  %v488_v28 = vmul.f32 %v6526_v21, %v7323_v44 }
 0x129   :  { %6555 = vpow2.f32 %v390_v34  ;;  %v7440_v34 = vadd.f32 %v252_v43, %v7317_v41  ;;  %v489_v15 = vmul.f32 %v6530_v45, %v7330_v48  ;;  %v7447_v41 = vadd.f32 %v323_v53, %v7320_v42 }
 0x12a   :  { %v6532_v39 = vpop.eup %6531  ;;  %6557 = vrcp.f32 %v435_v18  ;;  %v7454_v48 = vadd.f32 %v325_v20, %v7326_v46 }
 0x12b   :  { %v6534_v4 = vpop.eup %6533  ;;  %6559 = vpow2.f32 %v394_v22  ;;  %v492_v18 = vmul.f32 %v6532_v39, %v7338_v55  ;;  %v355_v55 = vsub.f32 0.0, %v7437_v7  ;;  %v357_v31 = vsub.f32 0.0, %v7440_v34 }
 0x12c   :  { %v6536_v2 = vpop.eup %6535  ;;  %6561 = vpow2.f32 %v396_v24  ;;  %v490_v53 = vmul.f32 %v6534_v4, %v7333_v49  ;;  %v358_v46 = vsub.f32 0.0, %v7447_v41  ;;  %v5911_v4 = vld [vmem:[#allocation2 + $0xc8] ss:$16 sps:$4 sm:$0xff]  }
 0x12d   :  { %v6538_v38 = vpop.eup %6537  ;;  %6563 = vpow2.f32 %v400_v3  ;;  %v7458_v45 = vpack.c.bf16 %v492_v18, %v488_v28  ;;  %v491_v44 = vmul.f32 %v6536_v2, %v7341_v56  ;;  %v5913_v3 = vld [vmem:[#allocation2 + $0xcc] ss:$16 sps:$4 sm:$0xff]   ;;  %v5908_v56 = vld [vmem:[#allocation2 + $0x2e8] ss:$16 sps:$4 sm:$0xff]   ;;  %v418_v49 = vmul.f32 1.442695, %v357_v31 }
 0x12e   :  { %v6540_v22 = vpop.eup %6539  ;;  %v493_v27 = vmul.f32 %v6538_v38, %v7346_v63  ;;  %6565 = vpow2.f32 %v398_v57  ;;  %v5905_v63 = vld [vmem:[#allocation2 + $0xe8] ss:$16 sps:$4 sm:$0xff]   ;;  %v414_v57 = vmul.f32 1.442695, %v355_v55  ;;  %v5919_v18 = vld [vmem:[#allocation2 + $0xac] ss:$16 sps:$4 sm:$0xff]  }
 0x12f   :  { %v6542_v24 = vpop.eup %6541  ;;  %6567 = vrcp.f32 %v438_v1  ;;  %v494_v43 = vmul.f32 %v6540_v22, %v7349_v0  ;;  %v416_v0 = vmul.f32 1.442695, %v356_v12  ;;  %v5916_v1 = vld [vmem:[#allocation2 + $0x2cc] ss:$16 sps:$4 sm:$0xff]   ;;  %v5914_v28 = vld [vmem:[#allocation2 + $0x2c8] ss:$16 sps:$4 sm:$0xff]  }
 0x130   :  { %v6544_v32 = vpop.eup %6543  ;;  %6569 = vpow2.f32 %v402_v60  ;;  %v7456_v38 = vpack.c.bf16 %v493_v27, %v489_v15  ;;  %v5922_v31 = vld [vmem:[#allocation2 + $0x2ac] ss:$16 sps:$4 sm:$0xff]  }
 0x131   :  { %v6546_v42 = vpop.eup %6545  ;;  %v495_v21 = vmul.f32 %v6544_v32, %v7355_v6  ;;  %6571 = vpow2.f32 %v404_v61  ;;  %v7470_v61 = vpack.c.bf16 %v494_v43, %v490_v53 }
 0x132   :  { %v6548_v51 = vpop.eup %6547  ;;  %6573 = vpow2.f32 %v408_v19  ;;  %1358 = vmatprep.mubr.bf16.mxu0 %v7456_v38 }
 0x133   :  { %v6550_v39 = vpop.eup %6549  ;;  %6575 = vpow2.f32 %v406_v40  ;;  %1359 = vmatmul.mubr.bf16.vlgmr.msra.gmra.mxu0 %v7458_v45  ;;  %v7466_v60 = vpack.c.bf16 %v495_v21, %v491_v44  ;;  %v359_v40 = vsub.f32 0.0, %v7454_v48  ;;  %v497_v20 = vmul.f32 %v6548_v51, %v7362_v14 }
 0x134   :  { %v7468_v6 = vpop.eup %6551  ;;  %6577 = vpow2.f32 %v410_v10  ;;  %1473 = vmatpush1.bf16.msra.mxu0 %v5905_v63  ;;  %v500_v19 = vmul.f32 %v6550_v39, %v7369_v23  ;;  %v420_v10 = vmul.f32 1.442695, %v358_v46  ;;  %v496_v23 = vmul.f32 %v6546_v42, %v7352_v5  ;;  %v5925_v5 = vld [vmem:[#allocation2 + $0x8c] ss:$16 sps:$4 sm:$0xff]  }
 0x135   :  { %v6554_v2 = vpop.eup %6553  ;;  %6579 = vpow2.f32 %v412_v11  ;;  %1431 = vmatprep.mubr.bf16.mxu1 %v7466_v60  ;;  %1474 = vmatprep.subr.bf16.mxu0 %v5913_v3  ;;  %v440_v11 = vadd.f32 1.0, %v6542_v24  ;;  %v422_v21 = vmul.f32 1.442695, %v359_v40  ;;  %v5920_v3 = vld [vmem:[#allocation2 + $0x2a8] ss:$16 sps:$4 sm:$0xff]  }
 0x136   :  { %v6556_v12 = vpop.eup %6555  ;;  %v501_v22 = vmul.f32 %v6554_v2, %v7377_v30  ;;  %6581 = vpow2.f32 %v416_v0  ;;  %1432 = vmatmul.mubr.bf16.vlgmr.msra.gmra.mxu1 %v7470_v61  ;;  %v5917_v30 = vld [vmem:[#allocation2 + $0xa8] ss:$16 sps:$4 sm:$0xff]   ;;  %v7483_v63 = vpack.c.bf16 %v500_v19, %v496_v23  ;;  %v5928_v46 = vld [vmem:[#allocation2 + $0x28c] ss:$16 sps:$4 sm:$0xff]  }
 0x137   :  { %v7478_v15 = vpop.eup %6557  ;;  %v439_v27 = vadd.f32 1.0, %v6556_v12  ;;  %6583 = vpow2.f32 %v414_v57  ;;  %1546 = vmatpush1.bf16.msra.mxu1 %v5908_v56  ;;  %v5923_v0 = vld [vmem:[#allocation2 + $0x88] ss:$16 sps:$4 sm:$0xff]   ;;  %v5931_v57 = vld [vmem:[#allocation2 + $0x6c] ss:$16 sps:$4 sm:$0xff]  }
 0x138   :  { %v6560_v55 = vpop.eup %6559  ;;  %6585 = vpow2.f32 %v418_v49  ;;  %1475 = vmatpush1.bf16.msra.mxu0 %v5911_v4  ;;  %1547 = vmatprep.subr.bf16.mxu1 %v5916_v1  ;;  %v7481_v14 = vpack.c.bf16 %v501_v22, %v497_v20  ;;  %v5926_v19 = vld [vmem:[#allocation2 + $0x288] ss:$16 sps:$4 sm:$0xff]   ;;  %v5934_v12 = vld [vmem:[#allocation2 + $0x26c] ss:$16 sps:$4 sm:$0xff]  }
 0x139   :  { %v6562_v32 = vpop.eup %6561  ;;  %6587 = vrcp.f32 %v439_v27  ;;  %v441_v43 = vadd.f32 1.0, %v6560_v55  ;;  %1476 = vmatprep.subr.bf16.mxu0 %v5919_v18  ;;  %v5929_v18 = vld [vmem:[#allocation2 + $0x68] ss:$16 sps:$4 sm:$0xff]  }
 0x13a   :  { %v6564_v24 = vpop.eup %6563  ;;  %6589 = vpow2.f32 %v420_v10  ;;  %1368 = vmatprep.mubr.bf16.mxu0 %v7481_v14  ;;  %v442_v49 = vadd.f32 1.0, %v6562_v32  ;;  %v5937_v10 = vld [vmem:[#allocation2 + $0x4c] ss:$16 sps:$4 sm:$0xff]   ;;  %v5932_v55 = vld [vmem:[#allocation2 + $0x268] ss:$16 sps:$4 sm:$0xff]  }
 0x13b   :  { %v6566_v42 = vpop.eup %6565  ;;  %6591 = vrcp.f32 %v440_v11  ;;  %v444_v44 = vadd.f32 1.0, %v6564_v24  ;;  %1548 = vmatpush1.bf16.msra.mxu1 %v5914_v28  ;;  %1369 = vmatmul.mubr.bf16.gmra.mxu0 %v7483_v63  ;;  %v5935_v32 = vld [vmem:[#allocation2 + $0x48] ss:$16 sps:$4 sm:$0xff]   ;;  %v5943_v24 = vld [vmem:[#allocation2 + $0x2c] ss:$16 sps:$4 sm:$0xff]  }
 0x13c   :  { %v6568_v51 = vpop.eup %6567  ;;  %6593 = vrcp.f32 %v441_v43  ;;  %v443_v53 = vadd.f32 1.0, %v6566_v42  ;;  %1477 = vmatpush1.bf16.msra.mxu0 %v5917_v30  ;;  %1549 = vmatprep.subr.bf16.mxu1 %v5922_v31  ;;  %v5940_v43 = vld [vmem:[#allocation2 + $0x24c] ss:$16 sps:$4 sm:$0xff]  }
 0x13d   :  { %v6570_v39 = vpop.eup %6569  ;;  %6595 = vrcp.f32 %v444_v44  ;;  %1478 = vmatprep.subr.bf16.mxu0 %v5925_v5  ;;  %v502_v44 = vmul.f32 %v6568_v51, %v7381_v33  ;;  %v5941_v33 = vld [vmem:[#allocation2 + $0x28] ss:$16 sps:$4 sm:$0xff]  }
 0x13e   :  { %v6572_v56 = vpop.eup %6571  ;;  %6597 = vrcp.f32 %v443_v53  ;;  %v445_v4 = vadd.f32 1.0, %v6570_v39  ;;  %v499_v53 = vmul.f32 %v7478_v15, %v7373_v25  ;;  %v5946_v25 = vld [vmem:[#allocation2 + $0x22c] ss:$16 sps:$4 sm:$0xff]  }
 0x13f   :  { %v6574_v1 = vpop.eup %6573  ;;  %v446_v2 = vadd.f32 1.0, %v6572_v56  ;;  %6599 = vpow2.f32 %v422_v21  ;;  %1550 = vmatpush1.bf16.msra.mxu1 %v5920_v3  ;;  %v5949_v15 = vld [vmem:[#allocation2 + $0xc] ss:$16 sps:$4 sm:$0xff]  }
 0x140   :  { %v6576_v40 = vpop.eup %6575  ;;  %6601 = vrcp.f32 %v445_v4  ;;  %1479 = vmatpush1.bf16.msra.mxu0 %v5923_v0  ;;  %1551 = vmatprep.subr.bf16.mxu1 %v5928_v46  ;;  %v448_v28 = vadd.f32 1.0, %v6574_v1  ;;  %v5938_v46 = vld [vmem:[#allocation2 + $0x248] ss:$16 sps:$4 sm:$0xff]  }
 0x141   :  { %v6578_v20 = vpop.eup %6577  ;;  %6603 = vrcp.f32 %v446_v2  ;;  %v447_v22 = vadd.f32 1.0, %v6576_v40  ;;  %1480 = vmatprep.subr.bf16.mxu0 %v5931_v57  ;;  %v498_v57 = vmul.f32 %v7468_v6, %v7365_v17  ;;  %v5944_v17 = vld [vmem:[#allocation2 + $0x228] ss:$16 sps:$4 sm:$0xff]  }
 0x142   :  { %v6580_v23 = vpop.eup %6579  ;;  %6605 = vrcp.f32 %v442_v49  ;;  %v449_v11 = vadd.f32 1.0, %v6578_v20  ;;  %v5947_v40 = vld [vmem:[#allocation2 + $0x8] ss:$16 sps:$4 sm:$0xff]  }
 0x143   :  { %v6582_v27 = vpop.eup %6581  ;;  %6607 = vrcp.f32 %v447_v22  ;;  %1552 = vmatpush1.bf16.msra.mxu1 %v5926_v19  ;;  %v450_v1 = vadd.f32 1.0, %v6580_v23  ;;  %v7495_v2 = vpack.c.bf16 %v502_v44, %v498_v57 }
 0x144   :  { %v6584_v30 = vpop.eup %6583  ;;  %v452_v31 = vadd.f32 1.0, %v6582_v27  ;;  %1481 = vmatpush1.bf16.msra.mxu0 %v5929_v18  ;;  %1553 = vmatprep.subr.bf16.mxu1 %v5934_v12  ;;  %6609 = vrcp.f32 %v449_v11  ;;  %v5952_v18 = vld [vmem:[#allocation2 + $0x20c] ss:$16 sps:$4 sm:$0xff]  }
 0x145   :  { %v6586_v5 = vpop.eup %6585  ;;  %1482 = vmatprep.subr.bf16.mxu0 %v5937_v10  ;;  %v451_v49 = vadd.f32 1.0, %v6584_v30  ;;  %v5955_v10 = vld [vmem:[#allocation2 + $0x1ec] ss:$16 sps:$4 sm:$0xff]   ;;  %v5950_v30 = vld [vmem:[#allocation2 + $0x208] ss:$16 sps:$4 sm:$0xff]  }
 0x146   :  { %v6588_v42 = vpop.eup %6587  ;;  %6611 = vrcp.f32 %v452_v31  ;;  %v453_v21 = vadd.f32 1.0, %v6586_v5  ;;  %v5958_v5 = vld [vmem:[#allocation2 + $0x3ec] ss:$16 sps:$4 sm:$0xff]  }
 0x147   :  { %v6590_v3 = vpop.eup %6589  ;;  %v503_v0 = vmul.f32 %v6588_v42, %v7389_v62  ;;  %6613 = vrcp.f32 %v448_v28  ;;  %1554 = vmatpush1.bf16.msra.mxu1 %v5932_v55 }
 0x148   :  { %v6592_v39 = vpop.eup %6591  ;;  %6615 = vrcp.f32 %v453_v21  ;;  %v454_v56 = vadd.f32 1.0, %v6590_v3  ;;  %1483 = vmatpush1.bf16.msra.mxu0 %v5935_v32  ;;  %1555 = vmatprep.subr.bf16.mxu1 %v5940_v43  ;;  %v5953_v43 = vld [vmem:[#allocation2 + $0x1e8] ss:$16 sps:$4 sm:$0xff]  }
 0x149   :  { %v6594_v51 = vpop.eup %6593  ;;  %v7493_v4 = vpack.c.bf16 %v503_v0, %v499_v53  ;;  %1484 = vmatprep.subr.bf16.mxu0 %v5943_v24  ;;  %v504_v55 = vmul.f32 %v6592_v39, %v7386_v54  ;;  %v5961_v54 = vld [vmem:[#allocation2 + $0x1cc] ss:$16 sps:$4 sm:$0xff]   ;;  %v5956_v3 = vld [vmem:[#allocation2 + $0x3e8] ss:$16 sps:$4 sm:$0xff]  }
 0x14a   :  { %v6596_v62 = vpop.eup %6595  ;;  %6617 = vrcp.f32 %v454_v56  ;;  %v505_v11 = vmul.f32 %v6594_v51, %v7394_v16  ;;  %v5964_v0 = vld [vmem:[#allocation2 + $0x3cc] ss:$16 sps:$4 sm:$0xff]   ;;  %v5962_v51 = vld [vmem:[#allocation2 + $0x3c8] ss:$16 sps:$4 sm:$0xff]  }
 0x14b   :  { %v6598_v19 = vpop.eup %6597  ;;  %1441 = vmatprep.mubr.bf16.mxu1 %v7493_v4  ;;  %1556 = vmatpush1.bf16.msra.mxu1 %v5938_v46  ;;  %v508_v20 = vmul.f32 %v6596_v62, %v7400_v29  ;;  %6619 = vrcp.f32 %v451_v49  ;;  %v5970_v62 = vld [vmem:[#allocation2 + $0x3ac] ss:$16 sps:$4 sm:$0xff]  }
 0x14c   :  { %v6600_v6 = vpop.eup %6599  ;;  %1442 = vmatmul.mubr.bf16.gmra.mxu1 %v7495_v2  ;;  %1485 = vmatpush1.bf16.msra.mxu0 %v5941_v33  ;;  %6621 = vrcp.f32 %v450_v1  ;;  %v507_v16 = vmul.f32 %v6598_v19, %v7404_v47  ;;  %v5973_v1 = vld [vmem:[#allocation2 + $0x18c] ss:$16 sps:$4 sm:$0xff]  }
 0x14d   :  { %v6602_v12 = vpop.eup %6601  ;;  %v455_v22 = vadd.f32 1.0, %v6600_v6  ;;  %1557 = vmatprep.subr.bf16.mxu1 %v5946_v25  ;;  %1486 = vmatprep.subr.bf16.mxu0 %v5949_v15  ;;  %v7508_v24 = vpack.c.bf16 %v508_v20, %v504_v55  ;;  %v5965_v25 = vld [vmem:[#allocation2 + $0x1a8] ss:$16 sps:$4 sm:$0xff]   ;;  %v5979_v20 = vld [vmem:[#allocation2 + $0x16c] ss:$16 sps:$4 sm:$0xff]  }
 0x14e   :  { %v6604_v23 = vpop.eup %6603  ;;  %v509_v27 = vmul.f32 %v6602_v12, %v7407_v50  ;;  %v5971_v6 = vld [vmem:[#allocation2 + $0x188] ss:$16 sps:$4 sm:$0xff]  }
 0x14f   :  { %v6606_v28 = vpop.eup %6605  ;;  %6623 = vrcp.f32 %v455_v22  ;;  %1558 = vmatpush1.bf16.msra.mxu1 %v5944_v17  ;;  %v510_v29 = vmul.f32 %v6604_v23, %v7411_v59  ;;  %v5974_v23 = vld [vmem:[#allocation2 + $0x388] ss:$16 sps:$4 sm:$0xff]  }
 0x150   :  { %v6608_v31 = vpop.eup %6607  ;;  %v7504_v32 = vpack.c.bf16 %v509_v27, %v505_v11  ;;  %1487 = vmatpush1.bf16.msra.mxu0 %v5947_v40  ;;  %1559 = vmatprep.subr.bf16.mxu1 %v5952_v18  ;;  %v506_v44 = vmul.f32 %v6606_v28, %v7397_v26  ;;  %v5967_v26 = vld [vmem:[#allocation2 + $0x1ac] ss:$16 sps:$4 sm:$0xff]   ;;  %v5986_v55 = vld [vmem:[#allocation2 + $0x348] ss:$16 sps:$4 sm:$0xff]  }
 0x151   :  { %v511_v50 = vmul.f32 %v6608_v31, %v7418_v8  ;;  %1488 = vmatprep.subr.bf16.mxu0 %v5955_v10  ;;  %v6610_v42 = vpop.eup %6609  ;;  %v5959_v8 = vld [vmem:[#allocation2 + $0x1c8] ss:$16 sps:$4 sm:$0xff]   ;;  %v5976_v40 = vld [vmem:[#allocation2 + $0x38c] ss:$16 sps:$4 sm:$0xff]  }
 0x152   :  { %1378 = vmatprep.mubr.bf16.mxu0 %v7504_v32  ;;  %v7515_v47 = vpack.c.bf16 %v510_v29, %v506_v44  ;;  %v513_v57 = vmul.f32 %v6610_v42, %v7421_v9  ;;  %v5988_v27 = vld [vmem:[#allocation2 + $0x34c] ss:$16 sps:$4 sm:$0xff]   ;;  %v6006_v42 = vld [vmem:[#allocation4 + $0xc4] ss:$16 sps:$4 sm:$0xff]   ;;  %v6004_v44 = vld [vmem:[#allocation4 + $0xc0] ss:$16 sps:$4 sm:$0xff]  }
 0x153   :  { %v6612_v59 = vpop.eup %6611  ;;  %1379 = vmatmul.mubr.bf16.gmra.mxu0 %v7508_v24  ;;  %v7513_v21 = vpack.c.bf16 %v511_v50, %v507_v16  ;;  %1560 = vmatpush1.bf16.msra.mxu1 %v5950_v30  ;;  %v5991_v28 = vld [vmem:[#allocation2 + $0x12c] ss:$16 sps:$4 sm:$0xff]   ;;  %v5989_v30 = vld [vmem:[#allocation2 + $0x128] ss:$16 sps:$4 sm:$0xff]   ;;  %v6003_v16 = vld [vmem:[#allocation4 + $0xe4] ss:$16 sps:$4 sm:$0xff]  }
 0x154   :  { %v6614_v53 = vpop.eup %6613  ;;  %1489 = vmatpush2.bf16.msra.mxu0 %v5953_v43  ;;  %1561 = vmatprep.subr.bf16.mxu1 %v5958_v5  ;;  %v516_v39 = vmul.f32 %v6612_v59, %v7434_v52  ;;  %v5994_v31 = vld [vmem:[#allocation2 + $0x32c] ss:$16 sps:$4 sm:$0xff]   ;;  %v5992_v43 = vld [vmem:[#allocation2 + $0x328] ss:$16 sps:$4 sm:$0xff]   ;;  %v6009_v59 = vld [vmem:[#allocation4 + $0xa4] ss:$16 sps:$4 sm:$0xff]  }
 0x155   :  { %v6616_v46 = vpop.eup %6615  ;;  %1451 = vmatprep.mubr.bf16.mxu1 %v7513_v21  ;;  %1490 = vmatprep.subr.bf16.mxu0 %v5961_v54  ;;  %v512_v33 = vmul.f32 %v6614_v53, %v7415_v58  ;;  %v5968_v58 = vld [vmem:[#allocation2 + $0x3a8] ss:$16 sps:$4 sm:$0xff]   ;;  %v5997_v29 = vld [vmem:[#allocation2 + $0x10c] ss:$16 sps:$4 sm:$0xff]   ;;  %v6001_v54 = vld [vmem:[#allocation4 + $0xe0] ss:$16 sps:$4 sm:$0xff]  }
 0x156   :  { %v517_v56 = vmul.f32 %v6616_v46, %v7440_v34  ;;  %1452 = vmatmul.mubr.bf16.gmra.mxu1 %v7515_v47  ;;  %v6000_v5 = vld [vmem:[#allocation2 + $0x30c] ss:$16 sps:$4 sm:$0xff]   ;;  %v5998_v50 = vld [vmem:[#allocation2 + $0x308] ss:$16 sps:$4 sm:$0xff]   ;;  %v6012_v53 = vld [vmem:[#allocation4 + $0x84] ss:$16 sps:$4 sm:$0xff]  }
 0x157   :  { %1562 = vmatpush2.bf16.msra.mxu1 %v5956_v3  ;;  %v6618_v52 = vpop.eup %6617  ;;  %v7525_v15 = vpack.c.bf16 %v516_v39, %v512_v33  ;;  %v6007_v3 = vld [vmem:[#allocation4 + $0xa0] ss:$16 sps:$4 sm:$0xff]   ;;  %v6033_v39 = vld [vmem:[#allocation4 + $0x1a4] ss:$16 sps:$4 sm:$0xff]  }
 0x158   :  { %v7523_v49 = vpack.c.bf16 %v517_v56, %v513_v57  ;;  %1491 = vmatpush2.bf16.msra.mxu0 %v5959_v8  ;;  %1563 = vmatprep.subr.bf16.mxu1 %v5964_v0  ;;  %v6620_v9 = vpop.eup %6619  ;;  %v518_v17 = vmul.f32 %v6618_v52, %v7447_v41  ;;  %v5977_v41 = vld [vmem:[#allocation2 + $0x168] ss:$16 sps:$4 sm:$0xff]   ;;  %v6027_v8 = vld [vmem:[#allocation4 + $0x1e4] ss:$16 sps:$4 sm:$0xff]   ;;  %v6028_v46 = vld [vmem:[#allocation4 + $0x1c0] ss:$16 sps:$4 sm:$0xff]  }
 0x159   :  { %1492 = vmatprep.subr.bf16.mxu0 %v5967_v26  ;;  %v6622_v34 = vpop.eup %6621  ;;  %v515_v18 = vmul.f32 %v6620_v9, %v7437_v7  ;;  %v5985_v7 = vld [vmem:[#allocation2 + $0x14c] ss:$16 sps:$4 sm:$0xff]   ;;  %v6030_v0 = vld [vmem:[#allocation4 + $0x1c4] ss:$16 sps:$4 sm:$0xff]   ;;  %v6031_v26 = vld [vmem:[#allocation4 + $0x1a0] ss:$16 sps:$4 sm:$0xff]  }
 0x15a   :  { %1388 = vmatprep.mubr.bf16.mxu0 %v7523_v49  ;;  %v514_v22 = vmul.f32 %v6622_v34, %v7426_v13  ;;  %v5980_v13 = vld [vmem:[#allocation2 + $0x368] ss:$16 sps:$4 sm:$0xff]   ;;  %v6036_v57 = vld [vmem:[#allocation4 + $0x184] ss:$16 sps:$4 sm:$0xff]   ;;  %v6034_v56 = vld [vmem:[#allocation4 + $0x180] ss:$16 sps:$4 sm:$0xff]  }
 0x15b   :  { %1389 = vmatmul.mubr.bf16.gmra.mxu0 %v7525_v15  ;;  %1564 = vmatpush2.bf16.msra.mxu1 %v5962_v51  ;;  %v6039_v33 = vld [vmem:[#allocation4 + $0x164] ss:$16 sps:$4 sm:$0xff]   ;;  %v6037_v51 = vld [vmem:[#allocation4 + $0x160] ss:$16 sps:$4 sm:$0xff]  }
 0x15c   :  { %v6624_v19 = vpop.eup %6623  ;;  %1504 = vmatprep.mubr.bf16.mxu0 %v7456_v38  ;;  %1493 = vmatpush2.bf16.msra.mxu0 %v5965_v25  ;;  %v7536_v11 = vpack.c.bf16 %v518_v17, %v514_v22  ;;  %v5982_v38 = vld [vmem:[#allocation2 + $0x36c] ss:$16 sps:$4 sm:$0xff]   ;;  %v6040_v25 = vld [vmem:[#allocation4 + $0x140] ss:$16 sps:$4 sm:$0xff]   ;;  %v6045_v52 = vld [vmem:[#allocation4 + $0x124] ss:$16 sps:$4 sm:$0xff]  }
 0x15d   :  { %v519_v12 = vmul.f32 %v6624_v19, %v7454_v48  ;;  %1565 = vmatprep.subr.bf16.mxu1 %v5970_v62  ;;  %1494 = vmatprep.subr.bf16.mxu0 %v5973_v1  ;;  %v5983_v48 = vld [vmem:[#allocation2 + $0x148] ss:$16 sps:$4 sm:$0xff]   ;;  %v6048_v62 = vld [vmem:[#allocation4 + $0x104] ss:$16 sps:$4 sm:$0xff]   ;;  %v6046_v1 = vld [vmem:[#allocation4 + $0x100] ss:$16 sps:$4 sm:$0xff]  }
 0x15e   :  { %v6051_v9 = vld [vmem:[#allocation4 + $0x2e4] ss:$16 sps:$4 sm:$0xff]   ;;  %v6049_v34 = vld [vmem:[#allocation4 + $0x2e0] ss:$16 sps:$4 sm:$0xff]  }
 0x15f   :  { %v7534_v10 = vpack.c.bf16 %v519_v12, %v515_v18  ;;  %1566 = vmatpush2.bf16.msra.mxu1 %v5968_v58  ;;  %v6054_v58 = vld [vmem:[#allocation4 + $0xec] ss:$16 sps:$4 sm:$0xff]   ;;  %v6057_v19 = vld [vmem:[#allocation4 + $0x2c4] ss:$16 sps:$4 sm:$0xff]   ;;  %v6055_v17 = vld [vmem:[#allocation4 + $0x2c0] ss:$16 sps:$4 sm:$0xff]  }
 0x160   :  { %1495 = vmatpush2.bf16.msra.mxu0 %v5971_v6  ;;  %1567 = vmatprep.subr.bf16.mxu1 %v5976_v40  ;;  %v6063_v6 = vld [vmem:[#allocation4 + $0x2a4] ss:$16 sps:$4 sm:$0xff]   ;;  %v6061_v40 = vld [vmem:[#allocation4 + $0x2a0] ss:$16 sps:$4 sm:$0xff]  }
 0x161   :  { %1461 = vmatprep.mubr.bf16.mxu1 %v7534_v10  ;;  %1496 = vmatprep.subr.bf16.mxu0 %v5979_v20  ;;  %v6069_v18 = vld [vmem:[#allocation4 + $0x284] ss:$16 sps:$4 sm:$0xff]   ;;  %v6067_v12 = vld [vmem:[#allocation4 + $0x280] ss:$16 sps:$4 sm:$0xff]  }
 0x162   :  { %1462 = vmatmul.mubr.bf16.gmra.mxu1 %v7536_v11  ;;  %v6075_v20 = vld [vmem:[#allocation4 + $0x264] ss:$16 sps:$4 sm:$0xff]   ;;  %v6073_v22 = vld [vmem:[#allocation4 + $0x260] ss:$16 sps:$4 sm:$0xff]  }
 0x163   :  { %1577 = vmatprep.mubr.bf16.mxu1 %v7466_v60  ;;  %1568 = vmatpush2.bf16.msra.mxu1 %v5974_v23  ;;  %v5995_v60 = vld [vmem:[#allocation2 + $0x108] ss:$16 sps:$4 sm:$0xff]   ;;  %v6079_v23 = vld [vmem:[#allocation4 + $0x240] ss:$16 sps:$4 sm:$0xff]  }
 0x164   :  { %1497 = vmatpush2.bf16.msra.mxu0 %v5977_v41  ;;  %1569 = vmatprep.subr.bf16.mxu1 %v5982_v38  ;;  %v6085_v41 = vld [vmem:[#allocation4 + $0x220] ss:$16 sps:$4 sm:$0xff]   ;;  %v6093_v38 = vld [vmem:[#allocation4 + $0x204] ss:$16 sps:$4 sm:$0xff]  }
 0x165   :  { %1498 = vmatprep.subr.bf16.mxu0 %v5985_v7  ;;  %v6091_v7 = vld [vmem:[#allocation4 + $0x200] ss:$16 sps:$4 sm:$0xff]  }
 0x167   :  { %1570 = vmatpush2.bf16.msra.mxu1 %v5980_v13  ;;  %v6099_v13 = vld [vmem:[#allocation4 + $0x3e4] ss:$16 sps:$4 sm:$0xff]  }
 0x168   :  { %1499 = vmatpush2.bf16.msra.mxu0 %v5983_v48  ;;  %1571 = vmatprep.subr.bf16.mxu1 %v5988_v27  ;;  %v6097_v48 = vld [vmem:[#allocation4 + $0x3e0] ss:$16 sps:$4 sm:$0xff]   ;;  %v6105_v27 = vld [vmem:[#allocation4 + $0x3c4] ss:$16 sps:$4 sm:$0xff]  }
 0x169   :  { %1500 = vmatprep.subr.bf16.mxu0 %v5991_v28  ;;  %v6103_v28 = vld [vmem:[#allocation4 + $0x3c0] ss:$16 sps:$4 sm:$0xff]  }
 0x16b   :  { %1572 = vmatpush2.bf16.msra.mxu1 %v5986_v55  ;;  %v6111_v55 = vld [vmem:[#allocation4 + $0x3a4] ss:$16 sps:$4 sm:$0xff]  }
 0x16c   :  { %1501 = vmatpush2.bf16.msra.mxu0 %v5989_v30  ;;  %1573 = vmatprep.subr.bf16.mxu1 %v5994_v31  ;;  %v6109_v30 = vld [vmem:[#allocation4 + $0x3a0] ss:$16 sps:$4 sm:$0xff]   ;;  %v6117_v31 = vld [vmem:[#allocation4 + $0x384] ss:$16 sps:$4 sm:$0xff]  }
 0x16d   :  { %1502 = vmatprep.subr.bf16.mxu0 %v5997_v29  ;;  %v6115_v29 = vld [vmem:[#allocation4 + $0x380] ss:$16 sps:$4 sm:$0xff]  }
 0x16f   :  { %1574 = vmatpush2.bf16.msra.mxu1 %v5992_v43  ;;  %v6123_v43 = vld [vmem:[#allocation4 + $0x364] ss:$16 sps:$4 sm:$0xff]  }
 0x170   :  { %1503 = vmatpush2.bf16.msra.mxu0 %v5995_v60  ;;  %1575 = vmatprep.subr.bf16.mxu1 %v6000_v5  ;;  %v6121_v60 = vld [vmem:[#allocation4 + $0x360] ss:$16 sps:$4 sm:$0xff]   ;;  %v6129_v5 = vld [vmem:[#allocation4 + $0x344] ss:$16 sps:$4 sm:$0xff]  }
 0x171   :  { %2616 = vmatprep.subr.bf16.mxu0 %v6003_v16  ;;  %v6127_v16 = vld [vmem:[#allocation4 + $0x340] ss:$16 sps:$4 sm:$0xff]  }
 0x173   :  { %1576 = vmatpush2.bf16.msra.mxu1 %v5998_v50  ;;  %1505 = vmatmul.mubr.bf16.vlgmr.msra.gmra.mxu0 %v7458_v45  ;;  %v6010_v45 = vld [vmem:[#allocation4 + $0x80] ss:$16 sps:$4 sm:$0xff]  }
 0x174   :  { %1514 = vmatprep.mubr.bf16.mxu0 %v7481_v14  ;;  %2617 = vmatpush1.bf16.msra.mxu0 %v6001_v54  ;;  %v6015_v14 = vld [vmem:[#allocation4 + $0x64] ss:$16 sps:$4 sm:$0xff]   ;;  %v7558_v50 = vld [vmem:[%s8453_s4] sm:$0xf] }
 0x175   :  { %2618 = vmatprep.subr.bf16.mxu0 %v6006_v42  ;;  %2689 = vmatprep.subr.bf16.mxu1 %v6051_v9  ;;  %v6135_v54 = vld [vmem:[#allocation4 + $0x324] ss:$16 sps:$4 sm:$0xff]   ;;  %v7562_v42 = vrot.slane %v7558_v50, %v7299_v35 }
 0x176   :  { %1578 = vmatmul.mubr.bf16.vlgmr.msra.gmra.mxu1 %v7470_v61  ;;  %v6013_v61 = vld [vmem:[#allocation4 + $0x60] ss:$16 sps:$4 sm:$0xff]  }
 0x177   :  { %1587 = vmatprep.mubr.bf16.mxu1 %v7493_v4  ;;  %v6016_v4 = vld [vmem:[#allocation4 + $0x40] ss:$16 sps:$4 sm:$0xff]   ;;  %2690 = vmatpush1.bf16.msra.mxu1 %v6049_v34 }
 0x178   :  { %2619 = vmatpush1.bf16.msra.mxu0 %v6004_v44  ;;  %2691 = vmatprep.subr.bf16.mxu1 %v6057_v19  ;;  %v6133_v44 = vld [vmem:[#allocation4 + $0x320] ss:$16 sps:$4 sm:$0xff]  }
 0x179   :  { %2620 = vmatprep.subr.bf16.mxu0 %v6009_v59  ;;  %v7566_v59 = vrot.slane %v7558_v50, %v7302_v36 }
 0x17b   :  { %1515 = vmatmul.mubr.bf16.gmra.mxu0 %v7483_v63  ;;  %v6018_v63 = vld [vmem:[#allocation4 + $0x44] ss:$16 sps:$4 sm:$0xff]   ;;  %2692 = vmatpush1.bf16.msra.mxu1 %v6055_v17 }
 0x17c   :  { %1524 = vmatprep.mubr.bf16.mxu0 %v7504_v32  ;;  %2621 = vmatpush1.bf16.msra.mxu0 %v6007_v3  ;;  %v6019_v32 = vld [vmem:[#allocation4 + $0x20] ss:$16 sps:$4 sm:$0xff]  }
 0x17d   :  { %2622 = vmatprep.subr.bf16.mxu0 %v6012_v53  ;;  %2693 = vmatprep.subr.bf16.mxu1 %v6063_v6  ;;  %v6141_v53 = vld [vmem:[#allocation4 + $0x304] ss:$16 sps:$4 sm:$0xff]  }
 0x17e   :  { %1588 = vmatmul.mubr.bf16.gmra.mxu1 %v7495_v2  ;;  %v6021_v2 = vld [vmem:[#allocation4 + $0x24] ss:$16 sps:$4 sm:$0xff]  }
 0x17f   :  { %1597 = vmatprep.mubr.bf16.mxu1 %v7513_v21  ;;  %v6022_v21 = vld [vmem:[#allocation4] ss:$16 sps:$4 sm:$0xff]   ;;  %2694 = vmatpush1.bf16.msra.mxu1 %v6061_v40 }
 0x180   :  { %2623 = vmatpush1.bf16.msra.mxu0 %v6010_v45  ;;  %2695 = vmatprep.subr.bf16.mxu1 %v6069_v18 }
 0x181   :  { %2624 = vmatprep.subr.bf16.mxu0 %v6015_v14  ;;  %v6139_v14 = vld [vmem:[#allocation4 + $0x300] ss:$16 sps:$4 sm:$0xff]  }
 0x183   :  { %1525 = vmatmul.mubr.bf16.gmra.mxu0 %v7508_v24  ;;  %v6024_v24 = vld [vmem:[#allocation4 + $0x4] ss:$16 sps:$4 sm:$0xff]   ;;  %2696 = vmatpush1.bf16.msra.mxu1 %v6067_v12 }
 0x184   :  { %1534 = vmatprep.mubr.bf16.mxu0 %v7523_v49  ;;  %2625 = vmatpush1.bf16.msra.mxu0 %v6013_v61  ;;  %v6042_v49 = vld [vmem:[#allocation4 + $0x144] ss:$16 sps:$4 sm:$0xff]  }
 0x185   :  { %2626 = vmatprep.subr.bf16.mxu0 %v6018_v63  ;;  %2697 = vmatprep.subr.bf16.mxu1 %v6075_v20 }
 0x186   :  { %1598 = vmatmul.mubr.bf16.gmra.mxu1 %v7515_v47  ;;  %v6025_v47 = vld [vmem:[#allocation4 + $0x1e0] ss:$16 sps:$4 sm:$0xff]  }
 0x187   :  { %1607 = vmatprep.mubr.bf16.mxu1 %v7534_v10  ;;  %2698 = vmatpush1.bf16.msra.mxu1 %v6073_v22  ;;  %v6081_v10 = vld [vmem:[#allocation4 + $0x244] ss:$16 sps:$4 sm:$0xff]  }
 0x188   :  { %2627 = vmatpush1.bf16.msra.mxu0 %v6016_v4  ;;  %2699 = vmatprep.subr.bf16.mxu1 %v6081_v10 }
 0x189   :  { %2628 = vmatprep.subr.bf16.mxu0 %v6021_v2 }
 0x18b   :  { %1535 = vmatmul.mubr.bf16.gmra.mxu0 %v7525_v15  ;;  %v6043_v15 = vld [vmem:[#allocation4 + $0x120] ss:$16 sps:$4 sm:$0xff]   ;;  %2700 = vmatpush1.bf16.msra.mxu1 %v6079_v23 }
 0x18c   :  { %2629 = vmatpush1.bf16.msra.mxu0 %v6019_v32 }
 0x18d   :  { %2630 = vmatprep.subr.bf16.mxu0 %v6024_v24  ;;  %v6147_v24 = vld [vmem:[#allocation4 + $0x2ec] ss:$16 sps:$4 sm:$0xff]  }
 0x18e   :  { %1608 = vmatmul.mubr.bf16.gmra.mxu1 %v7536_v11  ;;  %v6087_v11 = vld [vmem:[#allocation4 + $0x224] ss:$16 sps:$4 sm:$0xff]  }
 0x18f   :  { %2701 = vmatprep.subr.bf16.mxu1 %v6087_v11 }
 0x190   :  { %2631 = vmatpush1.bf16.msra.mxu0 %v6022_v21  ;;  %2702 = vmatpush1.bf16.msra.mxu1 %v6085_v41 }
 0x191   :  { %2632 = vmatprep.subr.bf16.mxu0 %v6027_v8  ;;  %2703 = vmatprep.subr.bf16.mxu1 %v6093_v38 }
 0x194   :  { %2633 = vmatpush2.bf16.msra.mxu0 %v6025_v47  ;;  %2704 = vmatpush1.bf16.msra.mxu1 %v6091_v7 }
 0x195   :  { %2634 = vmatprep.subr.bf16.mxu0 %v6030_v0  ;;  %2705 = vmatprep.subr.bf16.mxu1 %v6099_v13 }
 0x198   :  { %2635 = vmatpush2.bf16.msra.mxu0 %v6028_v46  ;;  %2706 = vmatpush2.bf16.msra.mxu1 %v6097_v48 }
 0x199   :  { %2636 = vmatprep.subr.bf16.mxu0 %v6033_v39  ;;  %2707 = vmatprep.subr.bf16.mxu1 %v6105_v27 }
 0x19c   :  { %2637 = vmatpush2.bf16.msra.mxu0 %v6031_v26  ;;  %2708 = vmatpush2.bf16.msra.mxu1 %v6103_v28 }
 0x19d   :  { %2638 = vmatprep.subr.bf16.mxu0 %v6036_v57  ;;  %2709 = vmatprep.subr.bf16.mxu1 %v6111_v55 }
 0x1a0   :  { %2639 = vmatpush2.bf16.msra.mxu0 %v6034_v56  ;;  %2710 = vmatpush2.bf16.msra.mxu1 %v6109_v30 }
 0x1a1   :  { %2640 = vmatprep.subr.bf16.mxu0 %v6039_v33  ;;  %2711 = vmatprep.subr.bf16.mxu1 %v6117_v31 }
 0x1a4   :  { %2641 = vmatpush2.bf16.msra.mxu0 %v6037_v51  ;;  %2712 = vmatpush2.bf16.msra.mxu1 %v6115_v29 }
 0x1a5   :  { %2642 = vmatprep.subr.bf16.mxu0 %v6042_v49  ;;  %2713 = vmatprep.subr.bf16.mxu1 %v6123_v43 }
 0x1a8   :  { %2643 = vmatpush2.bf16.msra.mxu0 %v6040_v25  ;;  %2714 = vmatpush2.bf16.msra.mxu1 %v6121_v60 }
 0x1a9   :  { %2644 = vmatprep.subr.bf16.mxu0 %v6045_v52  ;;  %2715 = vmatprep.subr.bf16.mxu1 %v6129_v5 }
 0x1ac   :  { %2645 = vmatpush2.bf16.msra.mxu0 %v6043_v15  ;;  %2716 = vmatpush2.bf16.msra.mxu1 %v6127_v16 }
 0x1ad   :  { %2646 = vmatprep.subr.bf16.mxu0 %v6048_v62  ;;  %2717 = vmatprep.subr.bf16.mxu1 %v6135_v54 }
 0x1b0   :  { %2647 = vmatpush2.bf16.msra.mxu0 %v6046_v1  ;;  %2718 = vmatpush2.bf16.msra.mxu1 %v6133_v44 }
 0x1b1   :  { %2762 = vmatprep.subr.bf16.mxu0 %v6054_v58  ;;  %2719 = vmatprep.subr.bf16.mxu1 %v6141_v53 }
 0x1b4   :  { %2720 = vmatpush2.bf16.msra.mxu1 %v6139_v14 }
 0x1b5   :  { %2835 = vmatprep.subr.bf16.mxu1 %v6147_v24 }
 0x1f3   :  { %v1360_v3 = vpop.f32.mrf.mxu0 }
 0x1f4   :  { %v1361_v45 = vadd.f32 %v1360_v3, %v7562_v42 }
 0x1f5   :  { %v1362_v61 = vpop.f32.mrf.mxu0 }
 0x1f6   :  { %v1363_v63 = vadd.f32 %v1362_v61, %v7566_v59  ;;  %v1433_v4 = vpop.f32.mrf.mxu1 }
 0x1f7   :  { %v7570_v2 = vadd.f32 %v1433_v4, %v1361_v45  ;;  %v1364_v32 = vpop.f32.mrf.mxu0 }
 0x1f8   :  { %v1365_v21 = vadd.f32 %v1364_v32, %v7562_v42  ;;  %v1435_v8 = vpop.f32.mrf.mxu1 }
 0x1f9   :  { %v1618_v47 = vsub.f32 0.0, %v7570_v2  ;;  %v7574_v0 = vadd.f32 %v1435_v8, %v1363_v63  ;;  %v1366_v46 = vpop.f32.mrf.mxu0 }
 0x1fa   :  { %v1367_v39 = vadd.f32 %v1366_v46, %v7566_v59  ;;  %v1437_v26 = vpop.f32.mrf.mxu1 }
 0x1fb   :  { %v1650_v57 = vmul.f32 1.442695, %v1618_v47  ;;  %v1619_v56 = vsub.f32 0.0, %v7574_v0  ;;  %v7578_v33 = vadd.f32 %v1437_v26, %v1365_v21  ;;  %v1370_v1 = vpop.f32.mrf.mxu0 }
 0x1fc   :  { %v1439_v51 = vpop.f32.mrf.mxu1  ;;  %v1371_v19 = vadd.f32 %v1370_v1, %v7562_v42 }
 0x1fd   :  { %v1652_v49 = vmul.f32 1.442695, %v1619_v56  ;;  %v1622_v25 = vsub.f32 0.0, %v7578_v33  ;;  %v7581_v52 = vadd.f32 %v1439_v51, %v1367_v39  ;;  %6625 = vpow2.f32 %v1650_v57  ;;  %v1372_v34 = vpop.f32.mrf.mxu0 }
 0x1fe   :  { %v1373_v6 = vadd.f32 %v1372_v34, %v7566_v59 }
 0x1ff   :  { %6627 = vpow2.f32 %v1652_v49  ;;  %v1658_v15 = vmul.f32 1.442695, %v1622_v25  ;;  %v1623_v62 = vsub.f32 0.0, %v7581_v52  ;;  %v1374_v58 = vpop.f32.mrf.mxu0 }
 0x200   :  { %v1375_v11 = vadd.f32 %v1374_v58, %v7562_v42 }
 0x201   :  { %6629 = vpow2.f32 %v1658_v15  ;;  %v1660_v9 = vmul.f32 1.442695, %v1623_v62  ;;  %v1376_v12 = vpop.f32.mrf.mxu0 }
 0x202   :  { %v1377_v48 = vadd.f32 %v1376_v12, %v7566_v59 }
 0x203   :  { %6631 = vpow2.f32 %v1660_v9 }
 0x20a   :  { %v6626_v17 = vpop.eup %6625 }
 0x20b   :  { %v1714_v23 = vadd.f32 1.0, %v6626_v17 }
 0x20c   :  { %v6628_v40 = vpop.eup %6627  ;;  %v1443_v18 = vpop.f32.mrf.mxu1 }
 0x20d   :  { %v1715_v20 = vadd.f32 1.0, %v6628_v40  ;;  %v7586_v22 = vadd.f32 %v1443_v18, %v1371_v19 }
 0x20e   :  { %v6630_v10 = vpop.eup %6629  ;;  %v1445_v41 = vpop.f32.mrf.mxu1 }
 0x20f   :  { %v1718_v38 = vadd.f32 1.0, %v6630_v10  ;;  %v1626_v7 = vsub.f32 0.0, %v7586_v22  ;;  %v7590_v13 = vadd.f32 %v1445_v41, %v1373_v6  ;;  %6633 = vrcp.f32 %v1715_v20 }
 0x210   :  { %v6632_v27 = vpop.eup %6631  ;;  %v1447_v28 = vpop.f32.mrf.mxu1 }
 0x211   :  { %6635 = vrcp.f32 %v1718_v38  ;;  %v1719_v55 = vadd.f32 1.0, %v6632_v27  ;;  %v1666_v30 = vmul.f32 1.442695, %v1626_v7  ;;  %v1627_v31 = vsub.f32 0.0, %v7590_v13 }
 0x212   :  { %6637 = vrcp.f32 %v1714_v23  ;;  %v7594_v29 = vadd.f32 %v1447_v28, %v1375_v11  ;;  %v1449_v43 = vpop.f32.mrf.mxu1 }
 0x213   :  { %6639 = vrcp.f32 %v1719_v55  ;;  %v1668_v60 = vmul.f32 1.442695, %v1627_v31  ;;  %v1380_v5 = vpop.f32.mrf.mxu0  ;;  %v7596_v16 = vadd.f32 %v1449_v43, %v1377_v48 }
 0x214   :  { %6641 = vpow2.f32 %v1666_v30  ;;  %v1630_v54 = vsub.f32 0.0, %v7594_v29  ;;  %v1381_v44 = vadd.f32 %v1380_v5, %v7562_v42  ;;  %v6060_v5 = vld [vmem:[#allocation4 + $0xcc] ss:$16 sps:$4 sm:$0xff]  }
 0x215   :  { %6643 = vpow2.f32 %v1668_v60  ;;  %v1631_v3 = vsub.f32 0.0, %v7596_v16  ;;  %v1382_v53 = vpop.f32.mrf.mxu0 }
 0x216   :  { %v1674_v45 = vmul.f32 1.442695, %v1630_v54  ;;  %v1383_v14 = vadd.f32 %v1382_v53, %v7566_v59  ;;  %v1453_v61 = vpop.f32.mrf.mxu1 }
 0x217   :  { %v1676_v63 = vmul.f32 1.442695, %v1631_v3  ;;  %v7602_v4 = vadd.f32 %v1453_v61, %v1381_v44  ;;  %v1384_v32 = vpop.f32.mrf.mxu0 }
 0x218   :  { %6645 = vpow2.f32 %v1674_v45  ;;  %v1385_v24 = vadd.f32 %v1384_v32, %v7562_v42  ;;  %v1455_v21 = vpop.f32.mrf.mxu1 }
 0x219   :  { %6647 = vpow2.f32 %v1676_v63  ;;  %v1634_v8 = vsub.f32 0.0, %v7602_v4  ;;  %v7606_v47 = vadd.f32 %v1455_v21, %v1383_v14  ;;  %v1386_v46 = vpop.f32.mrf.mxu0 }
 0x21a   :  { %v1387_v39 = vadd.f32 %v1386_v46, %v7566_v59  ;;  %v1457_v26 = vpop.f32.mrf.mxu1 }
 0x21b   :  { %v1682_v57 = vmul.f32 1.442695, %v1634_v8  ;;  %v1635_v56 = vsub.f32 0.0, %v7606_v47  ;;  %v7610_v51 = vadd.f32 %v1457_v26, %v1385_v24  ;;  %v1390_v49 = vpop.f32.mrf.mxu0  ;;  %v6058_v24 = vld [vmem:[#allocation4 + $0xc8] ss:$16 sps:$4 sm:$0xff]  }
 0x21c   :  { %v1459_v25 = vpop.f32.mrf.mxu1  ;;  %v6634_v15 = vpop.eup %6633  ;;  %v1391_v6 = vadd.f32 %v1390_v49, %v7562_v42 }
 0x21d   :  { %v1684_v62 = vmul.f32 1.442695, %v1635_v56  ;;  %v1638_v1 = vsub.f32 0.0, %v7610_v51  ;;  %v1392_v9 = vpop.f32.mrf.mxu0  ;;  %v7613_v58 = vadd.f32 %v1459_v25, %v1387_v39  ;;  %6649 = vpow2.f32 %v1682_v57  ;;  %v6064_v56 = vld [vmem:[#allocation4 + $0xa8] ss:$16 sps:$4 sm:$0xff]  }
 0x21e   :  { %v6636_v34 = vpop.eup %6635  ;;  %v1779_v23 = vmul.f32 %v6634_v15, %v7574_v0  ;;  %v1393_v41 = vadd.f32 %v1392_v9, %v7566_v59  ;;  %v6052_v0 = vld [vmem:[#allocation4 + $0xe8] ss:$16 sps:$4 sm:$0xff]   ;;  %v6072_v25 = vld [vmem:[#allocation4 + $0x8c] ss:$16 sps:$4 sm:$0xff]  }
 0x21f   :  { %v6638_v19 = vpop.eup %6637  ;;  %v1690_v17 = vmul.f32 1.442695, %v1638_v1  ;;  %v1394_v40 = vpop.f32.mrf.mxu0  ;;  %v1782_v12 = vmul.f32 %v6636_v34, %v7578_v33  ;;  %6651 = vpow2.f32 %v1684_v62  ;;  %v1639_v20 = vsub.f32 0.0, %v7613_v58 }
 0x220   :  { %v6640_v18 = vpop.eup %6639  ;;  %v1778_v7 = vmul.f32 %v6638_v19, %v7570_v2  ;;  %v1395_v31 = vadd.f32 %v1394_v40, %v7562_v42  ;;  %v6070_v19 = vld [vmem:[#allocation4 + $0x88] ss:$16 sps:$4 sm:$0xff]   ;;  %v6078_v40 = vld [vmem:[#allocation4 + $0x6c] ss:$16 sps:$4 sm:$0xff]  }
 0x221   :  { %v6642_v10 = vpop.eup %6641  ;;  %v1783_v11 = vmul.f32 %v6640_v18, %v7581_v52  ;;  %6653 = vpow2.f32 %v1690_v17  ;;  %v1692_v27 = vmul.f32 1.442695, %v1639_v20  ;;  %v1396_v55 = vpop.f32.mrf.mxu0  ;;  %v8466_v20 = vld [vmem:[#allocation12_spill] sm:$0xff] }
 0x222   :  { %v6644_v38 = vpop.eup %6643  ;;  %v1722_v48 = vadd.f32 1.0, %v6642_v10  ;;  %v1463_v28 = vpop.f32.mrf.mxu1  ;;  %v7627_v60 = vpack.c.bf16 %v1782_v12, %v1778_v7  ;;  %v1397_v3 = vadd.f32 %v1396_v55, %v7566_v59  ;;  %v6066_v59 = vld [vmem:[#allocation4 + $0xac] ss:$16 sps:$4 sm:$0xff]   ;;  %v7648_v10 = vrot.slane %v7558_v50, %v8466_v20 }
 0x223   :  { %v1723_v30 = vadd.f32 1.0, %v6644_v38  ;;  %v7622_v33 = vadd.f32 %v1463_v28, %v1391_v6  ;;  %v7625_v43 = vpack.c.bf16 %v1783_v11, %v1779_v23  ;;  %v7644_v6 = vrot.slane %v7558_v50, %v7305_v37 }
 0x224   :  { %6655 = vrcp.f32 %v1722_v48  ;;  %v1465_v52 = vpop.f32.mrf.mxu1  ;;  %v6084_v48 = vld [vmem:[#allocation4 + $0x4c] ss:$16 sps:$4 sm:$0xff]  }
 0x225   :  { %v6646_v54 = vpop.eup %6645  ;;  %6657 = vrcp.f32 %v1723_v30  ;;  %v1642_v2 = vsub.f32 0.0, %v7622_v33  ;;  %v7630_v44 = vadd.f32 %v1465_v52, %v1393_v41  ;;  %2648 = vmatprep.mubr.bf16.mxu0 %v7625_v43  ;;  %v6076_v41 = vld [vmem:[#allocation4 + $0x68] ss:$16 sps:$4 sm:$0xff]  }
 0x226   :  { %v6648_v53 = vpop.eup %6647  ;;  %v1726_v42 = vadd.f32 1.0, %v6646_v54  ;;  %6659 = vpow2.f32 %v1692_v27  ;;  %v1467_v45 = vpop.f32.mrf.mxu1  ;;  %2649 = vmatmul.mubr.bf16.vlgmr.msra.gmra.mxu0 %v7627_v60 }
 0x227   :  { %v1727_v14 = vadd.f32 1.0, %v6648_v53  ;;  %v1698_v61 = vmul.f32 1.442695, %v1642_v2  ;;  %v1643_v63 = vsub.f32 0.0, %v7630_v44  ;;  %v7636_v32 = vadd.f32 %v1467_v45, %v1395_v31  ;;  %2763 = vmatpush1.bf16.msra.mxu0 %v6052_v0 }
 0x228   :  { %6661 = vrcp.f32 %v1726_v42  ;;  %v1469_v21 = vpop.f32.mrf.mxu1  ;;  %2764 = vmatprep.subr.bf16.mxu0 %v6060_v5 }
 0x229   :  { %6663 = vrcp.f32 %v1727_v14  ;;  %v1700_v8 = vmul.f32 1.442695, %v1643_v63  ;;  %v1646_v46 = vsub.f32 0.0, %v7636_v32  ;;  %v7639_v39 = vadd.f32 %v1469_v21, %v1397_v3  ;;  %v6082_v3 = vld [vmem:[#allocation4 + $0x48] ss:$16 sps:$4 sm:$0xff]  }
 0x22a   :  { %6665 = vpow2.f32 %v1698_v61  ;;  %v6650_v49 = vpop.eup %6649  ;;  %v6090_v61 = vld [vmem:[#allocation4 + $0x2c] ss:$16 sps:$4 sm:$0xff]  }
 0x22b   :  { %6667 = vpow2.f32 %v1700_v8  ;;  %v1706_v26 = vmul.f32 1.442695, %v1646_v46  ;;  %v1647_v57 = vsub.f32 0.0, %v7639_v39  ;;  %2765 = vmatpush1.bf16.msra.mxu0 %v6058_v24  ;;  %v1730_v9 = vadd.f32 1.0, %v6650_v49  ;;  %v6088_v49 = vld [vmem:[#allocation4 + $0x28] ss:$16 sps:$4 sm:$0xff]  }
 0x22c   :  { %2766 = vmatprep.subr.bf16.mxu0 %v6066_v59  ;;  %v6652_v15 = vpop.eup %6651 }
 0x22d   :  { %v1708_v62 = vmul.f32 1.442695, %v1647_v57  ;;  %6669 = vpow2.f32 %v1706_v26  ;;  %v1731_v17 = vadd.f32 1.0, %v6652_v15 }
 0x22e   :  { %v6654_v1 = vpop.eup %6653 }
 0x22f   :  { %v1734_v34 = vadd.f32 1.0, %v6654_v1  ;;  %2767 = vmatpush1.bf16.msra.mxu0 %v6064_v56  ;;  %6671 = vpow2.f32 %v1708_v62 }
 0x230   :  { %2768 = vmatprep.subr.bf16.mxu0 %v6072_v25 }
 0x231   :  { %v6656_v18 = vpop.eup %6655  ;;  %6673 = vrcp.f32 %v1734_v34 }
 0x232   :  { %v6658_v12 = vpop.eup %6657  ;;  %6675 = vrcp.f32 %v1730_v9  ;;  %v1786_v42 = vmul.f32 %v6656_v18, %v7586_v22  ;;  %v6096_v9 = vld [vmem:[#allocation4 + $0xc] ss:$16 sps:$4 sm:$0xff]  }
 0x233   :  { %v6660_v23 = vpop.eup %6659  ;;  %2769 = vmatpush1.bf16.msra.mxu0 %v6070_v19  ;;  %v1506_v11 = vpop.f32.mrf.mxu0  ;;  %6677 = vrcp.f32 %v1731_v17  ;;  %v1787_v52 = vmul.f32 %v6658_v12, %v7590_v13 }
 0x234   :  { %v1735_v38 = vadd.f32 1.0, %v6660_v23  ;;  %v1507_v7 = vadd.f32 %v1506_v11, %v7644_v6  ;;  %2770 = vmatprep.subr.bf16.mxu0 %v6078_v40 }
 0x235   :  { %v6662_v27 = vpop.eup %6661  ;;  %v1508_v28 = vpop.f32.mrf.mxu0 }
 0x236   :  { %v6664_v55 = vpop.eup %6663  ;;  %v1790_v30 = vmul.f32 %v6662_v27, %v7594_v29  ;;  %6679 = vrcp.f32 %v1735_v38  ;;  %v1509_v50 = vadd.f32 %v1508_v28, %v7648_v10  ;;  %v1579_v31 = vpop.f32.mrf.mxu1  ;;  %v6094_v27 = vld [vmem:[#allocation4 + $0x8] ss:$16 sps:$4 sm:$0xff]  }
 0x237   :  { %v6666_v0 = vpop.eup %6665  ;;  %v1791_v5 = vmul.f32 %v6664_v55, %v7596_v16  ;;  %v7655_v54 = vadd.f32 %v1579_v31, %v1507_v7  ;;  %2771 = vmatpush1.bf16.msra.mxu0 %v6076_v41  ;;  %v1510_v2 = vpop.f32.mrf.mxu0  ;;  %v6102_v31 = vld [vmem:[#allocation4 + $0x1ec] ss:$16 sps:$4 sm:$0xff]  }
 0x238   :  { %v6668_v53 = vpop.eup %6667  ;;  %v1738_v45 = vadd.f32 1.0, %v6666_v0  ;;  %v1511_v29 = vadd.f32 %v1510_v2, %v7644_v6  ;;  %v1581_v14 = vpop.f32.mrf.mxu1  ;;  %2772 = vmatprep.subr.bf16.mxu0 %v6084_v48  ;;  %v7664_v59 = vpack.c.bf16 %v1790_v30, %v1786_v42 }
 0x239   :  { %v1739_v63 = vadd.f32 1.0, %v6668_v53  ;;  %v7659_v24 = vpack.c.bf16 %v1791_v5, %v1787_v52  ;;  %v1620_v13 = vsub.f32 0.0, %v7655_v54  ;;  %v7662_v16 = vadd.f32 %v1581_v14, %v1509_v50  ;;  %v1512_v21 = vpop.f32.mrf.mxu0 }
 0x23a   :  { %6681 = vrcp.f32 %v1738_v45  ;;  %v1513_v8 = vadd.f32 %v1512_v21, %v7648_v10  ;;  %v1583_v22 = vpop.f32.mrf.mxu1  ;;  %v6670_v46 = vpop.eup %6669  ;;  %v6100_v21 = vld [vmem:[#allocation4 + $0x1e8] ss:$16 sps:$4 sm:$0xff]  }
 0x23b   :  { %2658 = vmatprep.mubr.bf16.mxu0 %v7659_v24  ;;  %v1654_v26 = vmul.f32 1.442695, %v1620_v13  ;;  %v1621_v57 = vsub.f32 0.0, %v7662_v16  ;;  %2773 = vmatpush1.bf16.msra.mxu0 %v6082_v3  ;;  %v1516_v56 = vpop.f32.mrf.mxu0  ;;  %6683 = vrcp.f32 %v1739_v63  ;;  %v1742_v25 = vadd.f32 1.0, %v6670_v46 }
 0x23c   :  { %2659 = vmatmul.mubr.bf16.gmra.mxu0 %v7664_v59  ;;  %v7670_v15 = vadd.f32 %v1583_v22, %v1511_v29  ;;  %v1517_v62 = vadd.f32 %v1516_v56, %v7644_v6  ;;  %v1585_v1 = vpop.f32.mrf.mxu1  ;;  %2774 = vmatprep.subr.bf16.mxu0 %v6090_v61  ;;  %v6672_v34 = vpop.eup %6671 }
 0x23d   :  { %6685 = vpow2.f32 %v1654_v26  ;;  %v1656_v19 = vmul.f32 1.442695, %v1621_v57  ;;  %v7673_v17 = vadd.f32 %v1585_v1, %v1513_v8  ;;  %v1518_v40 = vpop.f32.mrf.mxu0  ;;  %v1743_v18 = vadd.f32 1.0, %v6672_v34  ;;  %v6108_v57 = vld [vmem:[#allocation4 + $0x1cc] ss:$16 sps:$4 sm:$0xff]  }
 0x23e   :  { %6687 = vrcp.f32 %v1742_v25  ;;  %v1624_v12 = vsub.f32 0.0, %v7670_v15  ;;  %v1519_v23 = vadd.f32 %v1518_v40, %v7648_v10  ;;  %v1589_v11 = vpop.f32.mrf.mxu1  ;;  %v6674_v41 = vpop.eup %6673 }
 0x23f   :  { %6689 = vpow2.f32 %v1656_v19  ;;  %v1625_v38 = vsub.f32 0.0, %v7673_v17  ;;  %v7678_v7 = vadd.f32 %v1589_v11, %v1517_v62  ;;  %2775 = vmatpush1.bf16.msra.mxu0 %v6088_v49  ;;  %v1520_v48 = vpop.f32.mrf.mxu0  ;;  %v6676_v28 = vpop.eup %6675  ;;  %v1798_v53 = vmul.f32 %v6674_v41, %v7610_v51  ;;  %v6114_v41 = vld [vmem:[#allocation4 + $0x1ac] ss:$16 sps:$4 sm:$0xff]  }
 0x240   :  { %6691 = vrcp.f32 %v1743_v18  ;;  %v1662_v55 = vmul.f32 1.442695, %v1624_v12  ;;  %v1521_v30 = vadd.f32 %v1520_v48, %v7644_v6  ;;  %v1591_v50 = vpop.f32.mrf.mxu1  ;;  %2776 = vmatprep.subr.bf16.mxu0 %v6096_v9  ;;  %v6678_v0 = vpop.eup %6677  ;;  %v1794_v8 = vmul.f32 %v6676_v28, %v7602_v4  ;;  %v6106_v12 = vld [vmem:[#allocation4 + $0x1c8] ss:$16 sps:$4 sm:$0xff]  }
 0x241   :  { %v1664_v52 = vmul.f32 1.442695, %v1625_v38  ;;  %v1628_v5 = vsub.f32 0.0, %v7678_v7  ;;  %v7682_v2 = vadd.f32 %v1591_v50, %v1519_v23  ;;  %v1522_v3 = vpop.f32.mrf.mxu0  ;;  %v1795_v22 = vmul.f32 %v6678_v0, %v7606_v47 }
 0x242   :  { %6693 = vpow2.f32 %v1662_v55  ;;  %v1523_v42 = vadd.f32 %v1522_v3, %v7648_v10  ;;  %v1593_v45 = vpop.f32.mrf.mxu1  ;;  %v7698_v9 = vpack.c.bf16 %v1798_v53, %v1794_v8  ;;  %v6120_v8 = vld [vmem:[#allocation4 + $0x18c] ss:$16 sps:$4 sm:$0xff]  }
 0x243   :  { %v6680_v29 = vpop.eup %6679  ;;  %6695 = vpow2.f32 %v1664_v52  ;;  %v1670_v14 = vmul.f32 1.442695, %v1628_v5  ;;  %v1629_v61 = vsub.f32 0.0, %v7682_v2  ;;  %v7687_v63 = vadd.f32 %v1593_v45, %v1521_v30  ;;  %2777 = vmatpush1.bf16.msra.mxu0 %v6094_v27  ;;  %v1526_v13 = vpop.f32.mrf.mxu0  ;;  %v6112_v45 = vld [vmem:[#allocation4 + $0x1a8] ss:$16 sps:$4 sm:$0xff]  }
 0x244   :  { %v1799_v51 = vmul.f32 %v6680_v29, %v7613_v58  ;;  %v1527_v46 = vadd.f32 %v1526_v13, %v7644_v6  ;;  %v1595_v26 = vpop.f32.mrf.mxu1  ;;  %2778 = vmatprep.subr.bf16.mxu0 %v6102_v31 }
 0x245   :  { %6697 = vpow2.f32 %v1670_v14  ;;  %v1672_v56 = vmul.f32 1.442695, %v1629_v61  ;;  %v1632_v49 = vsub.f32 0.0, %v7687_v63  ;;  %v7694_v25 = vadd.f32 %v1595_v26, %v1523_v42  ;;  %v1528_v62 = vpop.f32.mrf.mxu0 }
 0x246   :  { %v7696_v1 = vpack.c.bf16 %v1799_v51, %v1795_v22  ;;  %v1529_v4 = vadd.f32 %v1528_v62, %v7648_v10  ;;  %v1599_v47 = vpop.f32.mrf.mxu1 }
 0x247   :  { %v6682_v58 = vpop.eup %6681  ;;  %6699 = vpow2.f32 %v1672_v56  ;;  %v1678_v34 = vmul.f32 1.442695, %v1632_v49  ;;  %v1633_v19 = vsub.f32 0.0, %v7694_v25  ;;  %v7702_v40 = vadd.f32 %v1599_v47, %v1527_v46  ;;  %2779 = vmatpush2.bf16.msra.mxu0 %v6100_v21  ;;  %v1530_v18 = vpop.f32.mrf.mxu0 }
 0x248   :  { %2668 = vmatprep.mubr.bf16.mxu0 %v7696_v1  ;;  %v1531_v23 = vadd.f32 %v1530_v18, %v7644_v6  ;;  %v1601_v11 = vpop.f32.mrf.mxu1  ;;  %2780 = vmatprep.subr.bf16.mxu0 %v6108_v57  ;;  %v6684_v38 = vpop.eup %6683  ;;  %v1802_v30 = vmul.f32 %v6682_v58, %v7622_v33 }
 0x249   :  { %2669 = vmatmul.mubr.bf16.gmra.mxu0 %v7698_v9  ;;  %6701 = vpow2.f32 %v1678_v34  ;;  %v1680_v48 = vmul.f32 1.442695, %v1633_v19  ;;  %v1636_v27 = vsub.f32 0.0, %v7702_v40  ;;  %v1532_v28 = vpop.f32.mrf.mxu0  ;;  %v7709_v50 = vadd.f32 %v1601_v11, %v1529_v4  ;;  %v6118_v11 = vld [vmem:[#allocation4 + $0x188] ss:$16 sps:$4 sm:$0xff]  }
 0x24a   :  { %v6686_v55 = vpop.eup %6685  ;;  %v1533_v31 = vadd.f32 %v1532_v28, %v7648_v10  ;;  %v1603_v0 = vpop.f32.mrf.mxu1  ;;  %v1803_v14 = vmul.f32 %v6684_v38, %v7630_v44  ;;  %v6126_v28 = vld [vmem:[#allocation4 + $0x16c] ss:$16 sps:$4 sm:$0xff]  }
 0x24b   :  { %v6688_v52 = vpop.eup %6687  ;;  %v1716_v5 = vadd.f32 1.0, %v6686_v55  ;;  %6703 = vpow2.f32 %v1680_v48  ;;  %v1686_v3 = vmul.f32 1.442695, %v1636_v27  ;;  %v7712_v53 = vadd.f32 %v1603_v0, %v1531_v23  ;;  %2781 = vmatpush2.bf16.msra.mxu0 %v6106_v12  ;;  %v1536_v42 = vpop.f32.mrf.mxu0 }
 0x24c   :  { %v6690_v29 = vpop.eup %6689  ;;  %v1806_v61 = vmul.f32 %v6688_v52, %v7636_v32  ;;  %v1637_v33 = vsub.f32 0.0, %v7709_v50  ;;  %v1537_v13 = vadd.f32 %v1536_v42, %v7644_v6  ;;  %v1605_v21 = vpop.f32.mrf.mxu1  ;;  %2782 = vmatprep.subr.bf16.mxu0 %v6114_v41 }
 0x24d   :  { %v6692_v22 = vpop.eup %6691  ;;  %6705 = vrcp.f32 %v1716_v5  ;;  %v1717_v51 = vadd.f32 1.0, %v6690_v29  ;;  %v1640_v46 = vsub.f32 0.0, %v7712_v53  ;;  %v7719_v26 = vadd.f32 %v1605_v21, %v1533_v31  ;;  %v1538_v57 = vpop.f32.mrf.mxu0 }
 0x24e   :  { %v1807_v56 = vmul.f32 %v6692_v22, %v7639_v39  ;;  %v7722_v44 = vpack.c.bf16 %v1806_v61, %v1802_v30  ;;  %6707 = vpow2.f32 %v1686_v3  ;;  %v1688_v32 = vmul.f32 1.442695, %v1637_v33  ;;  %v1609_v49 = vpop.f32.mrf.mxu1 }
 0x24f   :  { %v6694_v62 = vpop.eup %6693  ;;  %6709 = vrcp.f32 %v1717_v51  ;;  %v1694_v4 = vmul.f32 1.442695, %v1640_v46  ;;  %v1641_v47 = vsub.f32 0.0, %v7719_v26  ;;  %v1539_v58 = vadd.f32 %v1538_v57, %v7648_v10  ;;  %2783 = vmatpush2.bf16.msra.mxu0 %v6112_v45  ;;  %v1540_v34 = vpop.f32.mrf.mxu0  ;;  %v6130_v57 = vld [vmem:[#allocation4 + $0x148] ss:$16 sps:$4 sm:$0xff]  }
 0x250   :  { %v6696_v19 = vpop.eup %6695  ;;  %v1720_v18 = vadd.f32 1.0, %v6694_v62  ;;  %v7726_v12 = vpack.c.bf16 %v1807_v56, %v1803_v14  ;;  %6711 = vpow2.f32 %v1688_v32  ;;  %v7728_v39 = vadd.f32 %v1609_v49, %v1537_v13  ;;  %v1611_v23 = vpop.f32.mrf.mxu1  ;;  %2784 = vmatprep.subr.bf16.mxu0 %v6120_v8  ;;  %v6124_v14 = vld [vmem:[#allocation4 + $0x168] ss:$16 sps:$4 sm:$0xff]   ;;  %v6132_v13 = vld [vmem:[#allocation4 + $0x14c] ss:$16 sps:$4 sm:$0xff]  }
 0x251   :  { %v1721_v41 = vadd.f32 1.0, %v6696_v19  ;;  %6713 = vpow2.f32 %v1694_v4  ;;  %v1696_v38 = vmul.f32 1.442695, %v1641_v47  ;;  %v1541_v48 = vadd.f32 %v1540_v34, %v7644_v6  ;;  %v1542_v27 = vpop.f32.mrf.mxu0  ;;  %v6138_v49 = vld [vmem:[#allocation4 + $0x12c] ss:$16 sps:$4 sm:$0xff]  }
 0x252   :  { %v6698_v55 = vpop.eup %6697  ;;  %6715 = vrcp.f32 %v1720_v18  ;;  %2678 = vmatprep.mubr.bf16.mxu0 %v7726_v12  ;;  %v1644_v30 = vsub.f32 0.0, %v7728_v39  ;;  %v7733_v31 = vadd.f32 %v1611_v23, %v1539_v58  ;;  %v1543_v0 = vadd.f32 %v1542_v27, %v7648_v10  ;;  %v1613_v52 = vpop.f32.mrf.mxu1  ;;  %v6136_v58 = vld [vmem:[#allocation4 + $0x128] ss:$16 sps:$4 sm:$0xff]   ;;  %v6144_v19 = vld [vmem:[#allocation4 + $0x10c] ss:$16 sps:$4 sm:$0xff]  }
 0x253   :  { %6717 = vrcp.f32 %v1721_v41  ;;  %v1724_v5 = vadd.f32 1.0, %v6698_v55  ;;  %2679 = vmatmul.mubr.bf16.gmra.mxu0 %v7722_v44  ;;  %v7737_v3 = vadd.f32 %v1613_v52, %v1541_v48 }
 0x254   :  { %v6700_v6 = vpop.eup %6699  ;;  %2794 = vmatprep.mubr.bf16.mxu0 %v7625_v43  ;;  %6719 = vpow2.f32 %v1696_v38  ;;  %v1702_v42 = vmul.f32 1.442695, %v1644_v30  ;;  %v1645_v45 = vsub.f32 0.0, %v7733_v31  ;;  %2785 = vmatpush2.bf16.msra.mxu0 %v6118_v11  ;;  %v1615_v29 = vpop.f32.mrf.mxu1 }
 0x255   :  { %6721 = vrcp.f32 %v1724_v5  ;;  %v1725_v61 = vadd.f32 1.0, %v6700_v6  ;;  %v1648_v10 = vsub.f32 0.0, %v7737_v3  ;;  %v7742_v33 = vadd.f32 %v1615_v29, %v1543_v0  ;;  %2786 = vmatprep.subr.bf16.mxu0 %v6126_v28  ;;  %v6142_v28 = vld [vmem:[#allocation4 + $0x108] ss:$16 sps:$4 sm:$0xff]  }
 0x256   :  { %v6702_v21 = vpop.eup %6701  ;;  %6723 = vpow2.f32 %v1702_v42  ;;  %v1704_v8 = vmul.f32 1.442695, %v1645_v45  ;;  %v6145_v29 = vld [vmem:[#allocation4 + $0x2e8] ss:$16 sps:$4 sm:$0xff]  }
 0x257   :  { %6725 = vrcp.f32 %v1725_v61  ;;  %v1728_v43 = vadd.f32 1.0, %v6702_v21  ;;  %v1710_v22 = vmul.f32 1.442695, %v1648_v10  ;;  %v1649_v51 = vsub.f32 0.0, %v7742_v33  ;;  %v6148_v21 = vld [vmem:[#allocation4 + $0x2c8] ss:$16 sps:$4 sm:$0xff]  }
 0x258   :  { %v6704_v46 = vpop.eup %6703  ;;  %6727 = vpow2.f32 %v1704_v8  ;;  %2787 = vmatpush2.bf16.msra.mxu0 %v6124_v14 }
 0x259   :  { %6729 = vrcp.f32 %v1728_v43  ;;  %v1729_v56 = vadd.f32 1.0, %v6704_v46  ;;  %v1712_v32 = vmul.f32 1.442695, %v1649_v51  ;;  %2788 = vmatprep.subr.bf16.mxu0 %v6132_v13  ;;  %v6153_v51 = vld [vmem:[#allocation4 + $0x2ac] ss:$16 sps:$4 sm:$0xff]  }
 0x25a   :  { %v6706_v62 = vpop.eup %6705  ;;  %6731 = vpow2.f32 %v1710_v22 }
 0x25b   :  { %v6708_v4 = vpop.eup %6707  ;;  %6733 = vrcp.f32 %v1729_v56  ;;  %v1780_v5 = vmul.f32 %v6706_v62, %v7655_v54  ;;  %v6156_v62 = vld [vmem:[#allocation4 + $0x28c] ss:$16 sps:$4 sm:$0xff]  }
 0x25c   :  { %v6710_v47 = vpop.eup %6709  ;;  %6735 = vpow2.f32 %v1712_v32  ;;  %2789 = vmatpush2.bf16.msra.mxu0 %v6130_v57  ;;  %v1732_v41 = vadd.f32 1.0, %v6708_v4 }
 0x25d   :  { %v6712_v34 = vpop.eup %6711  ;;  %2790 = vmatprep.subr.bf16.mxu0 %v6138_v49  ;;  %v1781_v30 = vmul.f32 %v6710_v47, %v7662_v16  ;;  %v6150_v16 = vld [vmem:[#allocation4 + $0x2cc] ss:$16 sps:$4 sm:$0xff]  }
 0x25e   :  { %v6714_v18 = vpop.eup %6713  ;;  %v1733_v23 = vadd.f32 1.0, %v6712_v34  ;;  %v6159_v47 = vld [vmem:[#allocation4 + $0x26c] ss:$16 sps:$4 sm:$0xff]  }
 0x25f   :  { %v6716_v11 = vpop.eup %6715  ;;  %v1736_v38 = vadd.f32 1.0, %v6714_v18 }
 0x260   :  { %v6718_v48 = vpop.eup %6717  ;;  %v1784_v27 = vmul.f32 %v6716_v11, %v7670_v15  ;;  %2791 = vmatpush2.bf16.msra.mxu0 %v6136_v58 }
 0x261   :  { %v6720_v55 = vpop.eup %6719  ;;  %v1785_v0 = vmul.f32 %v6718_v48, %v7673_v17  ;;  %6737 = vrcp.f32 %v1736_v38  ;;  %2792 = vmatprep.subr.bf16.mxu0 %v6144_v19  ;;  %v6162_v38 = vld [vmem:[#allocation4 + $0x24c] ss:$16 sps:$4 sm:$0xff]  }
 0x262   :  { %v6722_v52 = vpop.eup %6721  ;;  %6739 = vrcp.f32 %v1733_v23  ;;  %v1737_v6 = vadd.f32 1.0, %v6720_v55  ;;  %v7751_v14 = vpack.c.bf16 %v1784_v27, %v1780_v5  ;;  %v6165_v27 = vld [vmem:[#allocation4 + $0x22c] ss:$16 sps:$4 sm:$0xff]   ;;  %v6172_v5 = vld [vmem:[#allocation4 + $0x3c8] ss:$16 sps:$4 sm:$0xff]  }
 0x263   :  { %v6724_v42 = vpop.eup %6723  ;;  %6741 = vrcp.f32 %v1732_v41  ;;  %v7749_v45 = vpack.c.bf16 %v1785_v0, %v1781_v30  ;;  %v1788_v32 = vmul.f32 %v6722_v52, %v7678_v7  ;;  %v6154_v7 = vld [vmem:[#allocation4 + $0x288] ss:$16 sps:$4 sm:$0xff]  }
 0x264   :  { %v6726_v15 = vpop.eup %6725  ;;  %6743 = vrcp.f32 %v1737_v6  ;;  %2793 = vmatpush2.bf16.msra.mxu0 %v6142_v28  ;;  %v1740_v13 = vadd.f32 1.0, %v6724_v42  ;;  %v6177_v6 = vld [vmem:[#allocation4 + $0x3ac] ss:$16 sps:$4 sm:$0xff]   ;;  %v6175_v42 = vld [vmem:[#allocation4 + $0x3a8] ss:$16 sps:$4 sm:$0xff]  }
 0x265   :  { %v6728_v61 = vpop.eup %6727  ;;  %2721 = vmatprep.mubr.bf16.mxu1 %v7749_v45  ;;  %v1789_v57 = vmul.f32 %v6726_v15, %v7682_v2  ;;  %v6183_v15 = vld [vmem:[#allocation4 + $0x36c] ss:$16 sps:$4 sm:$0xff]  }
 0x266   :  { %v6730_v17 = vpop.eup %6729  ;;  %v1741_v10 = vadd.f32 1.0, %v6728_v61  ;;  %2722 = vmatmul.mubr.bf16.vlgmr.msra.gmra.mxu1 %v7751_v14  ;;  %v6184_v61 = vld [vmem:[#allocation4 + $0x348] ss:$16 sps:$4 sm:$0xff]  }
 0x267   :  { %v6732_v54 = vpop.eup %6731  ;;  %2795 = vmatmul.mubr.bf16.vlgmr.msra.gmra.mxu0 %v7627_v60  ;;  %2836 = vmatpush1.bf16.msra.mxu1 %v6145_v29  ;;  %v1792_v43 = vmul.f32 %v6730_v17, %v7687_v63  ;;  %v6151_v63 = vld [vmem:[#allocation4 + $0x2a8] ss:$16 sps:$4 sm:$0xff]   ;;  %v6180_v29 = vld [vmem:[#allocation4 + $0x38c] ss:$16 sps:$4 sm:$0xff]  }
 0x268   :  { %v6734_v8 = vpop.eup %6733  ;;  %v1744_v22 = vadd.f32 1.0, %v6732_v54  ;;  %2804 = vmatprep.mubr.bf16.mxu0 %v7659_v24  ;;  %2837 = vmatprep.subr.bf16.mxu1 %v6150_v16  ;;  %6745 = vrcp.f32 %v1741_v10  ;;  %v6186_v16 = vld [vmem:[#allocation4 + $0x34c] ss:$16 sps:$4 sm:$0xff]   ;;  %v6193_v10 = vld [vmem:[#allocation6 + $0xe0] ss:$16 sps:$4 sm:$0xff]  }
 0x269   :  { %v6736_v46 = vpop.eup %6735  ;;  %v1793_v56 = vmul.f32 %v6734_v8, %v7694_v25  ;;  %v7763_v24 = vpack.c.bf16 %v1792_v43, %v1788_v32  ;;  %v6189_v17 = vld [vmem:[#allocation4 + $0x32c] ss:$16 sps:$4 sm:$0xff]   ;;  %v6195_v54 = vld [vmem:[#allocation6 + $0xe4] ss:$16 sps:$4 sm:$0xff]   ;;  %v6196_v43 = vld [vmem:[#allocation6 + $0xc0] ss:$16 sps:$4 sm:$0xff]  }
 0x26a   :  { %6747 = vrcp.f32 %v1744_v22  ;;  %v1745_v60 = vadd.f32 1.0, %v6736_v46  ;;  %3906 = vmatprep.subr.bf16.mxu0 %v6195_v54  ;;  %v6192_v8 = vld [vmem:[#allocation4 + $0x30c] ss:$16 sps:$4 sm:$0xff]   ;;  %v6201_v22 = vld [vmem:[#allocation6 + $0xa4] ss:$16 sps:$4 sm:$0xff]  }
 0x26b   :  { %6749 = vrcp.f32 %v1740_v13  ;;  %2838 = vmatpush1.bf16.msra.mxu1 %v6148_v21  ;;  %v7761_v49 = vpack.c.bf16 %v1793_v56, %v1789_v57  ;;  %v6198_v13 = vld [vmem:[#allocation6 + $0xc4] ss:$16 sps:$4 sm:$0xff]   ;;  %v6187_v21 = vld [vmem:[#allocation4 + $0x328] ss:$16 sps:$4 sm:$0xff]   ;;  %3907 = vmatpush1.bf16.msra.mxu0 %v6193_v10  ;;  %v6199_v46 = vld [vmem:[#allocation6 + $0xa0] ss:$16 sps:$4 sm:$0xff]  }
 0x26c   :  { %6751 = vrcp.f32 %v1745_v60  ;;  %2839 = vmatprep.subr.bf16.mxu1 %v6153_v51  ;;  %3908 = vmatprep.subr.bf16.mxu0 %v6198_v13  ;;  %v6190_v51 = vld [vmem:[#allocation4 + $0x308] ss:$16 sps:$4 sm:$0xff]   ;;  %v6204_v57 = vld [vmem:[#allocation6 + $0x84] ss:$16 sps:$4 sm:$0xff]   ;;  %v6202_v56 = vld [vmem:[#allocation6 + $0x80] ss:$16 sps:$4 sm:$0xff]  }
 0x26d   :  { %2731 = vmatprep.mubr.bf16.mxu1 %v7761_v49  ;;  %v6207_v32 = vld [vmem:[#allocation6 + $0x64] ss:$16 sps:$4 sm:$0xff]   ;;  %v6205_v60 = vld [vmem:[#allocation6 + $0x60] ss:$16 sps:$4 sm:$0xff]  }
 0x26e   :  { %v6738_v2 = vpop.eup %6737  ;;  %2732 = vmatmul.mubr.bf16.gmra.mxu1 %v7763_v24  ;;  %v6301_v10 = vld [vmem:[#allocation6 + $0x3a0] ss:$16 sps:$4 sm:$0xff]   ;;  %v6309_v13 = vld [vmem:[#allocation6 + $0x384] ss:$16 sps:$4 sm:$0xff]  }
 0x26f   :  { %v6740_v25 = vpop.eup %6739  ;;  %2805 = vmatmul.mubr.bf16.gmra.mxu0 %v7664_v59  ;;  %2840 = vmatpush1.bf16.msra.mxu1 %v6151_v63  ;;  %v1800_v34 = vmul.f32 %v6738_v2, %v7712_v53  ;;  %v6157_v59 = vld [vmem:[#allocation4 + $0x268] ss:$16 sps:$4 sm:$0xff]   ;;  %v6210_v63 = vld [vmem:[#allocation6 + $0x44] ss:$16 sps:$4 sm:$0xff]  }
 0x270   :  { %v6742_v4 = vpop.eup %6741  ;;  %2814 = vmatprep.mubr.bf16.mxu0 %v7696_v1  ;;  %2841 = vmatprep.subr.bf16.mxu1 %v6156_v62  ;;  %v1797_v19 = vmul.f32 %v6740_v25, %v7709_v50  ;;  %v6208_v62 = vld [vmem:[#allocation6 + $0x40] ss:$16 sps:$4 sm:$0xff]   ;;  %v6216_v2 = vld [vmem:[#allocation6 + $0x4] ss:$16 sps:$4 sm:$0xff]  }
 0x271   :  { %v6744_v58 = vpop.eup %6743  ;;  %v1796_v23 = vmul.f32 %v6742_v4, %v7702_v40  ;;  %v6160_v40 = vld [vmem:[#allocation4 + $0x248] ss:$16 sps:$4 sm:$0xff]   ;;  %3909 = vmatpush1.bf16.msra.mxu0 %v6196_v43  ;;  %v6214_v25 = vld [vmem:[#allocation6] ss:$16 sps:$4 sm:$0xff]   ;;  %v6222_v4 = vld [vmem:[#allocation6 + $0x1c4] ss:$16 sps:$4 sm:$0xff]  }
 0x272   :  { %v1801_v18 = vmul.f32 %v6744_v58, %v7719_v26  ;;  %3910 = vmatprep.subr.bf16.mxu0 %v6201_v22  ;;  %v6225_v58 = vld [vmem:[#allocation6 + $0x1a4] ss:$16 sps:$4 sm:$0xff]   ;;  %v6313_v22 = vld [vmem:[#allocation6 + $0x360] ss:$16 sps:$4 sm:$0xff]  }
 0x273   :  { %2842 = vmatpush1.bf16.msra.mxu1 %v6154_v7  ;;  %v7775_v41 = vpack.c.bf16 %v1800_v34, %v1796_v23  ;;  %v6217_v7 = vld [vmem:[#allocation6 + $0x1e0] ss:$16 sps:$4 sm:$0xff]   ;;  %v6231_v23 = vld [vmem:[#allocation6 + $0x164] ss:$16 sps:$4 sm:$0xff]  }
 0x274   :  { %v7773_v11 = vpack.c.bf16 %v1801_v18, %v1797_v19  ;;  %2843 = vmatprep.subr.bf16.mxu1 %v6159_v47  ;;  %v6220_v47 = vld [vmem:[#allocation6 + $0x1c0] ss:$16 sps:$4 sm:$0xff]   ;;  %v6228_v19 = vld [vmem:[#allocation6 + $0x184] ss:$16 sps:$4 sm:$0xff]  }
 0x275   :  { %v6746_v1 = vpop.eup %6745  ;;  %3911 = vmatpush1.bf16.msra.mxu0 %v6199_v46  ;;  %v6223_v34 = vld [vmem:[#allocation6 + $0x1a0] ss:$16 sps:$4 sm:$0xff]   ;;  %v6315_v43 = vld [vmem:[#allocation6 + $0x364] ss:$16 sps:$4 sm:$0xff]  }
 0x276   :  { %2741 = vmatprep.mubr.bf16.mxu1 %v7773_v11  ;;  %v1805_v28 = vmul.f32 %v6746_v1, %v7733_v31  ;;  %v6166_v31 = vld [vmem:[#allocation4 + $0x208] ss:$16 sps:$4 sm:$0xff]   ;;  %3912 = vmatprep.subr.bf16.mxu0 %v6204_v57  ;;  %v6226_v18 = vld [vmem:[#allocation6 + $0x180] ss:$16 sps:$4 sm:$0xff]   ;;  %v6321_v46 = vld [vmem:[#allocation6 + $0x344] ss:$16 sps:$4 sm:$0xff]  }
 0x277   :  { %v6748_v48 = vpop.eup %6747  ;;  %2742 = vmatmul.mubr.bf16.gmra.mxu1 %v7775_v41  ;;  %2815 = vmatmul.mubr.bf16.gmra.mxu0 %v7698_v9  ;;  %v6163_v9 = vld [vmem:[#allocation4 + $0x228] ss:$16 sps:$4 sm:$0xff]   ;;  %v6235_v1 = vld [vmem:[#allocation6 + $0x120] ss:$16 sps:$4 sm:$0xff]  }
 0x278   :  { %v6750_v50 = vpop.eup %6749  ;;  %2844 = vmatpush1.bf16.msra.mxu1 %v6157_v59  ;;  %2824 = vmatprep.mubr.bf16.mxu0 %v7726_v12  ;;  %v1808_v26 = vmul.f32 %v6748_v48, %v7737_v3  ;;  %v6168_v12 = vld [vmem:[#allocation4 + $0x20c] ss:$16 sps:$4 sm:$0xff]   ;;  %v6169_v3 = vld [vmem:[#allocation4 + $0x3e8] ss:$16 sps:$4 sm:$0xff]   ;;  %v6234_v59 = vld [vmem:[#allocation6 + $0x144] ss:$16 sps:$4 sm:$0xff]  }
 0x279   :  { %v6752_v53 = vpop.eup %6751  ;;  %2845 = vmatprep.subr.bf16.mxu1 %v6162_v38  ;;  %v1804_v30 = vmul.f32 %v6750_v50, %v7728_v39  ;;  %v6171_v39 = vld [vmem:[#allocation4 + $0x3ec] ss:$16 sps:$4 sm:$0xff]   ;;  %3913 = vmatpush1.bf16.msra.mxu0 %v6202_v56  ;;  %v6237_v38 = vld [vmem:[#allocation6 + $0x124] ss:$16 sps:$4 sm:$0xff]   ;;  %v6238_v50 = vld [vmem:[#allocation6 + $0x100] ss:$16 sps:$4 sm:$0xff]  }
 0x27a   :  { %v1809_v55 = vmul.f32 %v6752_v53, %v7742_v33  ;;  %v6174_v33 = vld [vmem:[#allocation4 + $0x3cc] ss:$16 sps:$4 sm:$0xff]   ;;  %3914 = vmatprep.subr.bf16.mxu0 %v6207_v32  ;;  %v6240_v48 = vld [vmem:[#allocation6 + $0x104] ss:$16 sps:$4 sm:$0xff]   ;;  %v6241_v53 = vld [vmem:[#allocation6 + $0x2e0] ss:$16 sps:$4 sm:$0xff]  }
 0x27b   :  { %v7787_v52 = vpack.c.bf16 %v1808_v26, %v1804_v30  ;;  %v6246_v26 = vld [vmem:[#allocation6 + $0xec] ss:$16 sps:$4 sm:$0xff]   ;;  %v6253_v30 = vld [vmem:[#allocation6 + $0x2a0] ss:$16 sps:$4 sm:$0xff]  }
 0x27c   :  { %2846 = vmatpush1.bf16.msra.mxu1 %v6160_v40  ;;  %v7785_v0 = vpack.c.bf16 %v1809_v55, %v1805_v28  ;;  %v6243_v40 = vld [vmem:[#allocation6 + $0x2e4] ss:$16 sps:$4 sm:$0xff]   ;;  %v6319_v57 = vld [vmem:[#allocation6 + $0x340] ss:$16 sps:$4 sm:$0xff]  }
 0x27d   :  { %2847 = vmatprep.subr.bf16.mxu1 %v6165_v27  ;;  %3915 = vmatpush1.bf16.msra.mxu0 %v6205_v60  ;;  %v6247_v27 = vld [vmem:[#allocation6 + $0x2c0] ss:$16 sps:$4 sm:$0xff]   ;;  %v6249_v28 = vld [vmem:[#allocation6 + $0x2c4] ss:$16 sps:$4 sm:$0xff]  }
 0x27e   :  { %2751 = vmatprep.mubr.bf16.mxu1 %v7785_v0  ;;  %3916 = vmatprep.subr.bf16.mxu0 %v6210_v63  ;;  %v6255_v55 = vld [vmem:[#allocation6 + $0x2a4] ss:$16 sps:$4 sm:$0xff]   ;;  %v7803_v32 = vld [vmem:[%s8455_s6] sm:$0xf] }
 0x27f   :  { %2752 = vmatmul.mubr.bf16.gmra.mxu1 %v7787_v52  ;;  %2825 = vmatmul.mubr.bf16.gmra.mxu0 %v7722_v44  ;;  %v6178_v44 = vld [vmem:[#allocation4 + $0x388] ss:$16 sps:$4 sm:$0xff]   ;;  %v6327_v60 = vld [vmem:[#allocation6 + $0x324] ss:$16 sps:$4 sm:$0xff]   ;;  %v6325_v63 = vld [vmem:[#allocation6 + $0x320] ss:$16 sps:$4 sm:$0xff]  }
 0x280   :  { %2848 = vmatpush1.bf16.msra.mxu1 %v6163_v9  ;;  %2867 = vmatprep.mubr.bf16.mxu1 %v7749_v45  ;;  %v6181_v45 = vld [vmem:[#allocation4 + $0x368] ss:$16 sps:$4 sm:$0xff]   ;;  %v6259_v9 = vld [vmem:[#allocation6 + $0x280] ss:$16 sps:$4 sm:$0xff]  }
 0x281   :  { %2849 = vmatprep.subr.bf16.mxu1 %v6168_v12  ;;  %3917 = vmatpush1.bf16.msra.mxu0 %v6208_v62  ;;  %v6265_v12 = vld [vmem:[#allocation6 + $0x260] ss:$16 sps:$4 sm:$0xff]  }
 0x284   :  { %2850 = vmatpush1.bf16.msra.mxu1 %v6166_v31  ;;  %v6273_v31 = vld [vmem:[#allocation6 + $0x244] ss:$16 sps:$4 sm:$0xff]  }
 0x285   :  { %2851 = vmatprep.subr.bf16.mxu1 %v6171_v39  ;;  %v6271_v39 = vld [vmem:[#allocation6 + $0x240] ss:$16 sps:$4 sm:$0xff]  }
 0x288   :  { %2852 = vmatpush2.bf16.msra.mxu1 %v6169_v3  ;;  %v6279_v3 = vld [vmem:[#allocation6 + $0x224] ss:$16 sps:$4 sm:$0xff]  }
 0x289   :  { %2853 = vmatprep.subr.bf16.mxu1 %v6174_v33  ;;  %v6277_v33 = vld [vmem:[#allocation6 + $0x220] ss:$16 sps:$4 sm:$0xff]  }
 0x28c   :  { %2854 = vmatpush2.bf16.msra.mxu1 %v6172_v5  ;;  %v6285_v5 = vld [vmem:[#allocation6 + $0x204] ss:$16 sps:$4 sm:$0xff]  }
 0x28d   :  { %2855 = vmatprep.subr.bf16.mxu1 %v6177_v6  ;;  %v6283_v6 = vld [vmem:[#allocation6 + $0x200] ss:$16 sps:$4 sm:$0xff]  }
 0x290   :  { %2856 = vmatpush2.bf16.msra.mxu1 %v6175_v42 }
 0x291   :  { %2857 = vmatprep.subr.bf16.mxu1 %v6180_v29  ;;  %v6291_v29 = vld [vmem:[#allocation6 + $0x3e4] ss:$16 sps:$4 sm:$0xff]  }
 0x294   :  { %2858 = vmatpush2.bf16.msra.mxu1 %v6178_v44  ;;  %v6289_v44 = vld [vmem:[#allocation6 + $0x3e0] ss:$16 sps:$4 sm:$0xff]  }
 0x295   :  { %2859 = vmatprep.subr.bf16.mxu1 %v6183_v15 }
 0x298   :  { %2860 = vmatpush2.bf16.msra.mxu1 %v6181_v45  ;;  %v6297_v45 = vld [vmem:[#allocation6 + $0x3c4] ss:$16 sps:$4 sm:$0xff]  }
 0x299   :  { %2861 = vmatprep.subr.bf16.mxu1 %v6186_v16  ;;  %v6295_v16 = vld [vmem:[#allocation6 + $0x3c0] ss:$16 sps:$4 sm:$0xff]  }
 0x29c   :  { %2862 = vmatpush2.bf16.msra.mxu1 %v6184_v61 }
 0x29d   :  { %2863 = vmatprep.subr.bf16.mxu1 %v6189_v17  ;;  %v6303_v17 = vld [vmem:[#allocation6 + $0x3a4] ss:$16 sps:$4 sm:$0xff]  }
 0x2a0   :  { %2864 = vmatpush2.bf16.msra.mxu1 %v6187_v21  ;;  %v6307_v21 = vld [vmem:[#allocation6 + $0x380] ss:$16 sps:$4 sm:$0xff]  }
 0x2a1   :  { %2865 = vmatprep.subr.bf16.mxu1 %v6192_v8 }
 0x2a4   :  { %2866 = vmatpush2.bf16.msra.mxu1 %v6190_v51 }
 0x2a5   :  { %3979 = vmatprep.subr.bf16.mxu1 %v6243_v40 }
 0x2a7   :  { %2868 = vmatmul.mubr.bf16.vlgmr.msra.gmra.mxu1 %v7751_v14  ;;  %v6213_v14 = vld [vmem:[#allocation6 + $0x24] ss:$16 sps:$4 sm:$0xff]  }
 0x2a8   :  { %2877 = vmatprep.mubr.bf16.mxu1 %v7761_v49  ;;  %v6211_v49 = vld [vmem:[#allocation6 + $0x20] ss:$16 sps:$4 sm:$0xff]   ;;  %3918 = vmatprep.subr.bf16.mxu0 %v6213_v14  ;;  %v7807_v14 = vrot.slane %v7803_v32, %v7299_v35 }
 0x2a9   :  { %3919 = vmatpush1.bf16.msra.mxu0 %v6211_v49  ;;  %3980 = vmatpush1.bf16.msra.mxu1 %v6241_v53  ;;  %v6333_v49 = vld [vmem:[#allocation6 + $0x304] ss:$16 sps:$4 sm:$0xff]  }
 0x2aa   :  { %3920 = vmatprep.subr.bf16.mxu0 %v6216_v2  ;;  %3981 = vmatprep.subr.bf16.mxu1 %v6249_v28  ;;  %v7811_v2 = vrot.slane %v7803_v32, %v7302_v36 }
 0x2ad   :  { %3921 = vmatpush1.bf16.msra.mxu0 %v6214_v25  ;;  %3982 = vmatpush1.bf16.msra.mxu1 %v6247_v27  ;;  %v6331_v25 = vld [vmem:[#allocation6 + $0x300] ss:$16 sps:$4 sm:$0xff]  }
 0x2ae   :  { %3983 = vmatprep.subr.bf16.mxu1 %v6255_v55 }
 0x2af   :  { %2878 = vmatmul.mubr.bf16.gmra.mxu1 %v7763_v24  ;;  %v6219_v24 = vld [vmem:[#allocation6 + $0x1e4] ss:$16 sps:$4 sm:$0xff]  }
 0x2b0   :  { %2887 = vmatprep.mubr.bf16.mxu1 %v7773_v11  ;;  %3922 = vmatprep.subr.bf16.mxu0 %v6219_v24  ;;  %v6229_v11 = vld [vmem:[#allocation6 + $0x160] ss:$16 sps:$4 sm:$0xff]  }
 0x2b1   :  { %3923 = vmatpush2.bf16.msra.mxu0 %v6217_v7  ;;  %3984 = vmatpush1.bf16.msra.mxu1 %v6253_v30 }
 0x2b2   :  { %3924 = vmatprep.subr.bf16.mxu0 %v6222_v4 }
 0x2b5   :  { %3925 = vmatpush2.bf16.msra.mxu0 %v6220_v47  ;;  %v6339_v47 = vld [vmem:[#allocation6 + $0x2ec] ss:$16 sps:$4 sm:$0xff]  }
 0x2b6   :  { %3926 = vmatprep.subr.bf16.mxu0 %v6225_v58 }
 0x2b7   :  { %2888 = vmatmul.mubr.bf16.gmra.mxu1 %v7775_v41  ;;  %v6232_v41 = vld [vmem:[#allocation6 + $0x140] ss:$16 sps:$4 sm:$0xff]  }
 0x2b8   :  { %2897 = vmatprep.mubr.bf16.mxu1 %v7785_v0  ;;  %v6261_v0 = vld [vmem:[#allocation6 + $0x284] ss:$16 sps:$4 sm:$0xff]  }
 0x2b9   :  { %3927 = vmatpush2.bf16.msra.mxu0 %v6223_v34  ;;  %3985 = vmatprep.subr.bf16.mxu1 %v6261_v0 }
 0x2ba   :  { %3928 = vmatprep.subr.bf16.mxu0 %v6228_v19  ;;  %3986 = vmatpush1.bf16.msra.mxu1 %v6259_v9 }
 0x2bd   :  { %3929 = vmatpush2.bf16.msra.mxu0 %v6226_v18 }
 0x2be   :  { %3930 = vmatprep.subr.bf16.mxu0 %v6231_v23 }
 0x2bf   :  { %2898 = vmatmul.mubr.bf16.gmra.mxu1 %v7787_v52  ;;  %v6267_v52 = vld [vmem:[#allocation6 + $0x264] ss:$16 sps:$4 sm:$0xff]  }
 0x2c0   :  { %3987 = vmatprep.subr.bf16.mxu1 %v6267_v52 }
 0x2c1   :  { %3931 = vmatpush2.bf16.msra.mxu0 %v6229_v11  ;;  %3988 = vmatpush1.bf16.msra.mxu1 %v6265_v12 }
 0x2c2   :  { %3932 = vmatprep.subr.bf16.mxu0 %v6234_v59  ;;  %3989 = vmatprep.subr.bf16.mxu1 %v6273_v31 }
 0x2c5   :  { %3933 = vmatpush2.bf16.msra.mxu0 %v6232_v41  ;;  %3990 = vmatpush1.bf16.msra.mxu1 %v6271_v39 }
 0x2c6   :  { %3934 = vmatprep.subr.bf16.mxu0 %v6237_v38  ;;  %3991 = vmatprep.subr.bf16.mxu1 %v6279_v3 }
 0x2c9   :  { %3935 = vmatpush2.bf16.msra.mxu0 %v6235_v1  ;;  %3992 = vmatpush1.bf16.msra.mxu1 %v6277_v33 }
 0x2ca   :  { %3936 = vmatprep.subr.bf16.mxu0 %v6240_v48  ;;  %3993 = vmatprep.subr.bf16.mxu1 %v6285_v5 }
 0x2cd   :  { %3937 = vmatpush2.bf16.msra.mxu0 %v6238_v50  ;;  %3994 = vmatpush1.bf16.msra.mxu1 %v6283_v6 }
 0x2ce   :  { %4052 = vmatprep.subr.bf16.mxu0 %v6246_v26  ;;  %3995 = vmatprep.subr.bf16.mxu1 %v6291_v29 }
 0x2d1   :  { %3996 = vmatpush2.bf16.msra.mxu1 %v6289_v44 }
 0x2d2   :  { %3997 = vmatprep.subr.bf16.mxu1 %v6297_v45 }
 0x2d5   :  { %3998 = vmatpush2.bf16.msra.mxu1 %v6295_v16 }
 0x2d6   :  { %3999 = vmatprep.subr.bf16.mxu1 %v6303_v17 }
 0x2d9   :  { %4000 = vmatpush2.bf16.msra.mxu1 %v6301_v10 }
 0x2da   :  { %4001 = vmatprep.subr.bf16.mxu1 %v6309_v13 }
 0x2dd   :  { %4002 = vmatpush2.bf16.msra.mxu1 %v6307_v21 }
 0x2de   :  { %4003 = vmatprep.subr.bf16.mxu1 %v6315_v43 }
 0x2e1   :  { %4004 = vmatpush2.bf16.msra.mxu1 %v6313_v22 }
 0x2e2   :  { %4005 = vmatprep.subr.bf16.mxu1 %v6321_v46 }
 0x2e5   :  { %4006 = vmatpush2.bf16.msra.mxu1 %v6319_v57 }
 0x2e6   :  { %v2650_v42 = vpop.f32.mrf.mxu0  ;;  %4007 = vmatprep.subr.bf16.mxu1 %v6327_v60 }
 0x2e7   :  { %v2651_v7 = vadd.f32 %v2650_v42, %v7807_v14 }
 0x2e8   :  { %v2652_v15 = vpop.f32.mrf.mxu0 }
 0x2e9   :  { %4008 = vmatpush2.bf16.msra.mxu1 %v6325_v63  ;;  %v2653_v58 = vadd.f32 %v2652_v15, %v7811_v2 }
 0x2ea   :  { %v2654_v61 = vpop.f32.mrf.mxu0  ;;  %4009 = vmatprep.subr.bf16.mxu1 %v6333_v49 }
 0x2eb   :  { %v2655_v23 = vadd.f32 %v2654_v61, %v7807_v14 }
 0x2ec   :  { %v2656_v54 = vpop.f32.mrf.mxu0 }
 0x2ed   :  { %4010 = vmatpush2.bf16.msra.mxu1 %v6331_v25  ;;  %v2657_v38 = vadd.f32 %v2656_v54, %v7811_v2 }
 0x2ee   :  { %4125 = vmatprep.subr.bf16.mxu1 %v6339_v47 }
 0x2fc   :  { %v2660_v8 = vpop.f32.mrf.mxu0 }
 0x2fd   :  { %v2661_v40 = vadd.f32 %v2660_v8, %v7807_v14 }
 0x2fe   :  { %v2662_v51 = vpop.f32.mrf.mxu0 }
 0x2ff   :  { %v2663_v30 = vadd.f32 %v2662_v51, %v7811_v2 }
 0x300   :  { %v2664_v56 = vpop.f32.mrf.mxu0 }
 0x301   :  { %v2665_v31 = vadd.f32 %v2664_v56, %v7807_v14 }
 0x302   :  { %v2666_v62 = vpop.f32.mrf.mxu0 }
 0x303   :  { %v2667_v42 = vadd.f32 %v2666_v62, %v7811_v2 }
 0x309   :  { %v2670_v24 = vpop.f32.mrf.mxu0 }
 0x30a   :  { %v2671_v13 = vadd.f32 %v2670_v24, %v7807_v14 }
 0x30b   :  { %v2672_v19 = vpop.f32.mrf.mxu0 }
 0x30c   :  { %v2673_v22 = vadd.f32 %v2672_v19, %v7811_v2 }
 0x30d   :  { %v2674_v53 = vpop.f32.mrf.mxu0 }
 0x30e   :  { %v2675_v63 = vadd.f32 %v2674_v53, %v7807_v14 }
 0x30f   :  { %v2676_v39 = vpop.f32.mrf.mxu0 }
 0x313   :  { %v2680_v16 = vpop.f32.mrf.mxu0 }
 0x315   :  { %v2682_v51 = vpop.f32.mrf.mxu0 }
 0x316   :  { %v2683_v53 = vadd.f32 %v2682_v51, %v7811_v2 }
 0x317   :  { %v2684_v47 = vpop.f32.mrf.mxu0 }
 0x326   :  { %v2723_v4 = vpop.f32.mrf.mxu1 }
 0x327   :  { %v7815_v34 = vadd.f32 %v2723_v4, %v2651_v7  ;;  %v2677_v4 = vadd.f32 %v2676_v39, %v7811_v2 }
 0x328   :  { %v2725_v18 = vpop.f32.mrf.mxu1 }
 0x329   :  { %v2908_v11 = vsub.f32 0.0, %v7815_v34  ;;  %v7819_v59 = vadd.f32 %v2725_v18, %v2653_v58 }
 0x32a   :  { %v2727_v41 = vpop.f32.mrf.mxu1 }
 0x32b   :  { %v2940_v1 = vmul.f32 1.442695, %v2908_v11  ;;  %v2909_v48 = vsub.f32 0.0, %v7819_v59  ;;  %v7823_v50 = vadd.f32 %v2727_v41, %v2655_v23  ;;  %v2681_v23 = vadd.f32 %v2680_v16, %v7807_v14 }
 0x32c   :  { %v2729_v26 = vpop.f32.mrf.mxu1 }
 0x32d   :  { %6753 = vpow2.f32 %v2940_v1  ;;  %v2942_v27 = vmul.f32 1.442695, %v2909_v48  ;;  %v2912_v28 = vsub.f32 0.0, %v7823_v50  ;;  %v7827_v55 = vadd.f32 %v2729_v26, %v2657_v38 }
 0x32e   :  { %v2733_v0 = vpop.f32.mrf.mxu1 }
 0x32f   :  { %6755 = vpow2.f32 %v2942_v27  ;;  %v2948_v9 = vmul.f32 1.442695, %v2912_v28  ;;  %v2913_v52 = vsub.f32 0.0, %v7827_v55  ;;  %v7831_v12 = vadd.f32 %v2733_v0, %v2661_v40 }
 0x330   :  { %v2735_v3 = vpop.f32.mrf.mxu1 }
 0x331   :  { %6757 = vpow2.f32 %v2948_v9  ;;  %v2950_v33 = vmul.f32 1.442695, %v2913_v52  ;;  %v2916_v5 = vsub.f32 0.0, %v7831_v12  ;;  %v7835_v6 = vadd.f32 %v2735_v3, %v2663_v30  ;;  %v2686_v30 = vpop.f32.mrf.mxu0 }
 0x332   :  { %v2737_v29 = vpop.f32.mrf.mxu1 }
 0x333   :  { %6759 = vpow2.f32 %v2950_v33  ;;  %v2956_v44 = vmul.f32 1.442695, %v2916_v5  ;;  %v2917_v15 = vsub.f32 0.0, %v7835_v6  ;;  %v7839_v45 = vadd.f32 %v2737_v29, %v2665_v31 }
 0x334   :  { %v2739_v61 = vpop.f32.mrf.mxu1  ;;  %v2685_v31 = vadd.f32 %v2684_v47, %v7807_v14 }
 0x335   :  { %6761 = vpow2.f32 %v2956_v44  ;;  %v2958_v17 = vmul.f32 1.442695, %v2917_v15  ;;  %v2920_v10 = vsub.f32 0.0, %v7839_v45  ;;  %v7842_v54 = vadd.f32 %v2739_v61, %v2667_v42 }
 0x336   :  { %v2687_v44 = vadd.f32 %v2686_v30, %v7811_v2 }
 0x337   :  { %6763 = vpow2.f32 %v2958_v17  ;;  %v2964_v21 = vmul.f32 1.442695, %v2920_v10  ;;  %v2921_v8 = vsub.f32 0.0, %v7842_v54  ;;  %v2743_v43 = vpop.f32.mrf.mxu1  ;;  %v7870_v17 = vpop.f32.mrf.mxu0 }
 0x338   :  { %v7847_v46 = vadd.f32 %v2743_v43, %v2671_v13 }
 0x339   :  { %6765 = vpow2.f32 %v2964_v21  ;;  %v2966_v57 = vmul.f32 1.442695, %v2921_v8  ;;  %v2745_v56 = vpop.f32.mrf.mxu1 }
 0x33a   :  { %v6754_v60 = vpop.eup %6753  ;;  %v2924_v62 = vsub.f32 0.0, %v7847_v46  ;;  %v7851_v49 = vadd.f32 %v2745_v56, %v2673_v22 }
 0x33b   :  { %v3004_v25 = vadd.f32 1.0, %v6754_v60  ;;  %6767 = vpow2.f32 %v2966_v57  ;;  %v2747_v24 = vpop.f32.mrf.mxu1  ;;  %v7878_v60 = vpop.f32.mrf.mxu0 }
 0x33c   :  { %v6756_v7 = vpop.eup %6755  ;;  %v2972_v58 = vmul.f32 1.442695, %v2924_v62  ;;  %v2925_v19 = vsub.f32 0.0, %v7851_v49  ;;  %v7855_v18 = vadd.f32 %v2747_v24, %v2675_v63 }
 0x33d   :  { %6769 = vrcp.f32 %v3004_v25  ;;  %v3005_v11 = vadd.f32 1.0, %v6756_v7  ;;  %v2749_v41 = vpop.f32.mrf.mxu1 }
 0x33e   :  { %v6758_v38 = vpop.eup %6757  ;;  %6771 = vpow2.f32 %v2972_v58  ;;  %v2974_v1 = vmul.f32 1.442695, %v2925_v19  ;;  %v2928_v48 = vsub.f32 0.0, %v7855_v18  ;;  %v7859_v40 = vadd.f32 %v2749_v41, %v2677_v4  ;;  %v7881_v58 = vpop.f32.mrf.mxu0 }
 0x33f   :  { %6773 = vrcp.f32 %v3005_v11  ;;  %v3008_v26 = vadd.f32 1.0, %v6758_v38  ;;  %v2753_v27 = vpop.f32.mrf.mxu1 }
 0x340   :  { %v6760_v28 = vpop.eup %6759  ;;  %6775 = vpow2.f32 %v2974_v1  ;;  %v2980_v0 = vmul.f32 1.442695, %v2928_v48  ;;  %v2929_v9 = vsub.f32 0.0, %v7859_v40  ;;  %v7863_v52 = vadd.f32 %v2753_v27, %v2681_v23 }
 0x341   :  { %6777 = vrcp.f32 %v3008_v26  ;;  %v3009_v39 = vadd.f32 1.0, %v6760_v28  ;;  %v2755_v3 = vpop.f32.mrf.mxu1 }
 0x342   :  { %v6762_v33 = vpop.eup %6761  ;;  %6779 = vpow2.f32 %v2980_v0  ;;  %v2982_v5 = vmul.f32 1.442695, %v2929_v9  ;;  %v2932_v42 = vsub.f32 0.0, %v7863_v52  ;;  %v7867_v29 = vadd.f32 %v2755_v3, %v2683_v53  ;;  %v7884_v53 = vpop.f32.mrf.mxu0 }
 0x343   :  { %6781 = vrcp.f32 %v3009_v39  ;;  %v3012_v15 = vadd.f32 1.0, %v6762_v33  ;;  %v2757_v16 = vpop.f32.mrf.mxu1  ;;  %v6244_v33 = vld [vmem:[#allocation6 + $0xe8] ss:$16 sps:$4 sm:$0xff]  }
 0x344   :  { %v6764_v61 = vpop.eup %6763  ;;  %6783 = vpow2.f32 %v2982_v5  ;;  %v2988_v14 = vmul.f32 1.442695, %v2932_v42  ;;  %v2933_v10 = vsub.f32 0.0, %v7867_v29  ;;  %v7873_v13 = vadd.f32 %v2757_v16, %v2685_v31  ;;  %v7893_v42 = vpop.f32.mrf.mxu0 }
 0x345   :  { %6785 = vrcp.f32 %v3012_v15  ;;  %v3013_v21 = vadd.f32 1.0, %v6764_v61  ;;  %v2759_v8 = vpop.f32.mrf.mxu1  ;;  %v6250_v61 = vld [vmem:[#allocation6 + $0xc8] ss:$16 sps:$4 sm:$0xff]  }
 0x346   :  { %v6766_v43 = vpop.eup %6765  ;;  %6787 = vpow2.f32 %v2988_v14  ;;  %v2990_v22 = vmul.f32 1.442695, %v2933_v10  ;;  %v2936_v2 = vsub.f32 0.0, %v7873_v13  ;;  %v7876_v51 = vadd.f32 %v2759_v8, %v2687_v44  ;;  %v7897_v10 = vpop.f32.mrf.mxu0 }
 0x347   :  { %6789 = vrcp.f32 %v3013_v21  ;;  %v3016_v57 = vadd.f32 1.0, %v6766_v43  ;;  %v6258_v43 = vld [vmem:[#allocation6 + $0xac] ss:$16 sps:$4 sm:$0xff]  }
 0x348   :  { %v6768_v56 = vpop.eup %6767  ;;  %6791 = vpow2.f32 %v2990_v22  ;;  %v2996_v63 = vmul.f32 1.442695, %v2936_v2  ;;  %v2937_v62 = vsub.f32 0.0, %v7876_v51 }
 0x349   :  { %6793 = vrcp.f32 %v3016_v57  ;;  %v3017_v25 = vadd.f32 1.0, %v6768_v56 }
 0x34a   :  { %v6770_v24 = vpop.eup %6769  ;;  %6795 = vpow2.f32 %v2996_v63  ;;  %v2998_v7 = vmul.f32 1.442695, %v2937_v62 }
 0x34b   :  { %v6772_v4 = vpop.eup %6771  ;;  %6797 = vrcp.f32 %v3017_v25  ;;  %v3068_v9 = vmul.f32 %v6770_v24, %v7815_v34  ;;  %v6256_v25 = vld [vmem:[#allocation6 + $0xa8] ss:$16 sps:$4 sm:$0xff]   ;;  %v7905_v24 = vpop.f32.mrf.mxu0 }
 0x34c   :  { %v6774_v47 = vpop.eup %6773  ;;  %6799 = vpow2.f32 %v2998_v7  ;;  %v3020_v38 = vadd.f32 1.0, %v6772_v4  ;;  %v6264_v7 = vld [vmem:[#allocation6 + $0x8c] ss:$16 sps:$4 sm:$0xff]  }
 0x34d   :  { %v6776_v19 = vpop.eup %6775  ;;  %v3069_v28 = vmul.f32 %v6774_v47, %v7819_v59  ;;  %v6252_v59 = vld [vmem:[#allocation6 + $0xcc] ss:$16 sps:$4 sm:$0xff]   ;;  %v7911_v47 = vpop.f32.mrf.mxu0 }
 0x34e   :  { %v6778_v23 = vpop.eup %6777  ;;  %v3021_v11 = vadd.f32 1.0, %v6776_v19  ;;  %v6270_v19 = vld [vmem:[#allocation6 + $0x6c] ss:$16 sps:$4 sm:$0xff]  }
 0x34f   :  { %v6780_v41 = vpop.eup %6779  ;;  %v3072_v48 = vmul.f32 %v6778_v23, %v7823_v50 }
 0x350   :  { %v6782_v1 = vpop.eup %6781  ;;  %v3024_v26 = vadd.f32 1.0, %v6780_v41  ;;  %6801 = vrcp.f32 %v3021_v11  ;;  %v7916_v41 = vrot.slane %v7803_v32, %v7305_v37 }
 0x351   :  { %v6784_v27 = vpop.eup %6783  ;;  %v3073_v30 = vmul.f32 %v6782_v1, %v7827_v55  ;;  %v7891_v5 = vpack.c.bf16 %v3072_v48, %v3068_v9 }
 0x352   :  { %v6786_v0 = vpop.eup %6785  ;;  %6803 = vrcp.f32 %v3024_v26  ;;  %v3025_v31 = vadd.f32 1.0, %v6784_v27  ;;  %v7923_v26 = vrot.slane %v7803_v32, %v8466_v20  ;;  %v7925_v27 = vpop.f32.mrf.mxu0 }
 0x353   :  { %v6788_v39 = vpop.eup %6787  ;;  %6805 = vrcp.f32 %v3020_v38  ;;  %v7889_v3 = vpack.c.bf16 %v3073_v30, %v3069_v28  ;;  %v3076_v56 = vmul.f32 %v6786_v0, %v7831_v12  ;;  %v6276_v0 = vld [vmem:[#allocation6 + $0x4c] ss:$16 sps:$4 sm:$0xff]  }
 0x354   :  { %v6790_v50 = vpop.eup %6789  ;;  %6807 = vrcp.f32 %v3025_v31  ;;  %v3028_v16 = vadd.f32 1.0, %v6788_v39  ;;  %v2799_v31 = vadd.f32 %v7878_v60, %v7923_v26  ;;  %v7937_v39 = vpop.f32.mrf.mxu0 }
 0x355   :  { %v6792_v44 = vpop.eup %6791  ;;  %3938 = vmatprep.mubr.bf16.mxu0 %v7889_v3  ;;  %v3077_v2 = vmul.f32 %v6790_v50, %v7835_v6  ;;  %v6274_v50 = vld [vmem:[#allocation6 + $0x48] ss:$16 sps:$4 sm:$0xff]  }
 0x356   :  { %v6794_v55 = vpop.eup %6793  ;;  %v3029_v15 = vadd.f32 1.0, %v6792_v44  ;;  %3939 = vmatmul.mubr.bf16.vlgmr.msra.gmra.mxu0 %v7891_v5 }
 0x357   :  { %v6796_v34 = vpop.eup %6795  ;;  %4053 = vmatpush1.bf16.msra.mxu0 %v6244_v33  ;;  %v3080_v21 = vmul.f32 %v6794_v55, %v7839_v45 }
 0x358   :  { %v6798_v14 = vpop.eup %6797  ;;  %v3032_v8 = vadd.f32 1.0, %v6796_v34  ;;  %4054 = vmatprep.subr.bf16.mxu0 %v6252_v59  ;;  %6809 = vrcp.f32 %v3029_v15  ;;  %v6282_v15 = vld [vmem:[#allocation6 + $0x2c] ss:$16 sps:$4 sm:$0xff]  }
 0x359   :  { %v6800_v22 = vpop.eup %6799  ;;  %v3081_v57 = vmul.f32 %v6798_v14, %v7842_v54  ;;  %v7907_v45 = vpack.c.bf16 %v3080_v21, %v3076_v56  ;;  %v6262_v54 = vld [vmem:[#allocation6 + $0x88] ss:$16 sps:$4 sm:$0xff]   ;;  %v2803_v14 = vadd.f32 %v7884_v53, %v7923_v26 }
 0x35a   :  { %6811 = vrcp.f32 %v3032_v8  ;;  %v3033_v63 = vadd.f32 1.0, %v6800_v22 }
 0x35b   :  { %6813 = vrcp.f32 %v3028_v16  ;;  %4055 = vmatpush1.bf16.msra.mxu0 %v6250_v61  ;;  %v7903_v62 = vpack.c.bf16 %v3081_v57, %v3077_v2  ;;  %v2807_v2 = vadd.f32 %v7893_v42, %v7916_v41 }
 0x35c   :  { %6815 = vrcp.f32 %v3033_v63  ;;  %4056 = vmatprep.subr.bf16.mxu0 %v6258_v43 }
 0x35d   :  { %3948 = vmatprep.mubr.bf16.mxu0 %v7903_v62  ;;  %v6802_v6 = vpop.eup %6801 }
 0x35e   :  { %3949 = vmatmul.mubr.bf16.gmra.mxu0 %v7907_v45  ;;  %v3085_v38 = vmul.f32 %v6802_v6, %v7851_v49  ;;  %v2797_v49 = vadd.f32 %v7870_v17, %v7916_v41  ;;  %v2801_v17 = vadd.f32 %v7881_v58, %v7916_v41  ;;  %v7952_v58 = vpop.f32.mrf.mxu0 }
 0x35f   :  { %v6804_v12 = vpop.eup %6803  ;;  %4057 = vmatpush1.bf16.msra.mxu0 %v6256_v25 }
 0x360   :  { %v6806_v4 = vpop.eup %6805  ;;  %4058 = vmatprep.subr.bf16.mxu0 %v6264_v7  ;;  %v3088_v11 = vmul.f32 %v6804_v12, %v7855_v18  ;;  %v6268_v18 = vld [vmem:[#allocation6 + $0x68] ss:$16 sps:$4 sm:$0xff]   ;;  %v2809_v7 = vadd.f32 %v7897_v10, %v7923_v26  ;;  %v2822_v42 = vpop.f32.mrf.mxu0  ;;  %v6294_v10 = vld [vmem:[#allocation6 + $0x1ec] ss:$16 sps:$4 sm:$0xff]  }
 0x361   :  { %v6808_v23 = vpop.eup %6807  ;;  %v3084_v48 = vmul.f32 %v6806_v4, %v7847_v46 }
 0x362   :  { %v3089_v1 = vmul.f32 %v6808_v23, %v7859_v40  ;;  %v2811_v23 = vadd.f32 %v7905_v24, %v7916_v41  ;;  %v6292_v24 = vld [vmem:[#allocation6 + $0x1e8] ss:$16 sps:$4 sm:$0xff]  }
 0x363   :  { %4059 = vmatpush1.bf16.msra.mxu0 %v6262_v54  ;;  %v7929_v30 = vpack.c.bf16 %v3088_v11, %v3084_v48 }
 0x364   :  { %v7927_v28 = vpack.c.bf16 %v3089_v1, %v3085_v38  ;;  %4060 = vmatprep.subr.bf16.mxu0 %v6270_v19  ;;  %v6286_v19 = vld [vmem:[#allocation6 + $0x8] ss:$16 sps:$4 sm:$0xff]  }
 0x365   :  { %v6810_v9 = vpop.eup %6809 }
 0x366   :  { %3958 = vmatprep.mubr.bf16.mxu0 %v7927_v28  ;;  %v3093_v34 = vmul.f32 %v6810_v9, %v7867_v29  ;;  %v2826_v9 = vpop.f32.mrf.mxu0 }
 0x367   :  { %v6812_v46 = vpop.eup %6811  ;;  %v2869_v40 = vpop.f32.mrf.mxu1  ;;  %3959 = vmatmul.mubr.bf16.gmra.mxu0 %v7929_v30 }
 0x368   :  { %v6814_v32 = vpop.eup %6813  ;;  %v7939_v33 = vadd.f32 %v2869_v40, %v2797_v49  ;;  %4061 = vmatpush1.bf16.msra.mxu0 %v6268_v18  ;;  %v3096_v44 = vmul.f32 %v6812_v46, %v7873_v13  ;;  %v2813_v18 = vadd.f32 %v7911_v47, %v7923_v26  ;;  %v2817_v40 = vadd.f32 %v7925_v27, %v7916_v41  ;;  %v6298_v27 = vld [vmem:[#allocation6 + $0x1c8] ss:$16 sps:$4 sm:$0xff]  }
 0x369   :  { %v6816_v59 = vpop.eup %6815  ;;  %v2871_v55 = vpop.f32.mrf.mxu1  ;;  %4062 = vmatprep.subr.bf16.mxu0 %v6276_v0  ;;  %v3092_v21 = vmul.f32 %v6814_v32, %v7863_v52  ;;  %v6288_v52 = vld [vmem:[#allocation6 + $0xc] ss:$16 sps:$4 sm:$0xff]  }
 0x36a   :  { %v3097_v16 = vmul.f32 %v6816_v59, %v7876_v51  ;;  %v2910_v60 = vsub.f32 0.0, %v7939_v33  ;;  %v7947_v61 = vadd.f32 %v2871_v55, %v2799_v31  ;;  %v6280_v51 = vld [vmem:[#allocation6 + $0x28] ss:$16 sps:$4 sm:$0xff]   ;;  %v6300_v31 = vld [vmem:[#allocation6 + $0x1cc] ss:$16 sps:$4 sm:$0xff]   ;;  %v2828_v55 = vpop.f32.mrf.mxu0 }
 0x36b   :  { %v2873_v8 = vpop.f32.mrf.mxu1  ;;  %v7961_v53 = vpack.c.bf16 %v3096_v44, %v3092_v21 }
 0x36c   :  { %v2944_v13 = vmul.f32 1.442695, %v2910_v60  ;;  %v2911_v43 = vsub.f32 0.0, %v7947_v61  ;;  %v7955_v22 = vadd.f32 %v2873_v8, %v2801_v17  ;;  %4063 = vmatpush1.bf16.msra.mxu0 %v6274_v50  ;;  %v7957_v29 = vpack.c.bf16 %v3097_v16, %v3093_v34 }
 0x36d   :  { %v2875_v57 = vpop.f32.mrf.mxu1  ;;  %4064 = vmatprep.subr.bf16.mxu0 %v6282_v15  ;;  %v2819_v17 = vadd.f32 %v7937_v39, %v7923_v26 }
 0x36e   :  { %6817 = vpow2.f32 %v2944_v13  ;;  %v2946_v56 = vmul.f32 1.442695, %v2911_v43  ;;  %v2914_v63 = vsub.f32 0.0, %v7955_v22  ;;  %v7964_v25 = vadd.f32 %v2875_v57, %v2803_v14  ;;  %3968 = vmatprep.mubr.bf16.mxu0 %v7957_v29  ;;  %v6306_v14 = vld [vmem:[#allocation6 + $0x1ac] ss:$16 sps:$4 sm:$0xff]   ;;  %v2830_v57 = vpop.f32.mrf.mxu0 }
 0x36f   :  { %v2879_v6 = vpop.f32.mrf.mxu1  ;;  %3969 = vmatmul.mubr.bf16.gmra.mxu0 %v7961_v53  ;;  %v2821_v43 = vadd.f32 %v7952_v58, %v7916_v41 }
 0x370   :  { %6819 = vpow2.f32 %v2946_v56  ;;  %v2952_v12 = vmul.f32 1.442695, %v2914_v63  ;;  %v2915_v54 = vsub.f32 0.0, %v7964_v25  ;;  %v7971_v4 = vadd.f32 %v2879_v6, %v2807_v2  ;;  %4065 = vmatpush1.bf16.msra.mxu0 %v6280_v51  ;;  %4084 = vmatprep.mubr.bf16.mxu0 %v7889_v3 }
 0x371   :  { %v2881_v11 = vpop.f32.mrf.mxu1  ;;  %4066 = vmatprep.subr.bf16.mxu0 %v6288_v52  ;;  %v2823_v51 = vadd.f32 %v2822_v42, %v7923_v26 }
 0x372   :  { %6821 = vpow2.f32 %v2952_v12  ;;  %v2954_v38 = vmul.f32 1.442695, %v2915_v54  ;;  %v2918_v1 = vsub.f32 0.0, %v7971_v4  ;;  %v7977_v48 = vadd.f32 %v2881_v11, %v2809_v7  ;;  %v6304_v7 = vld [vmem:[#allocation6 + $0x1a8] ss:$16 sps:$4 sm:$0xff]  }
 0x373   :  { %v2883_v0 = vpop.f32.mrf.mxu1  ;;  %v2827_v12 = vadd.f32 %v2826_v9, %v7916_v41 }
 0x374   :  { %6823 = vpow2.f32 %v2954_v38  ;;  %v2960_v3 = vmul.f32 1.442695, %v2918_v1  ;;  %v2919_v49 = vsub.f32 0.0, %v7977_v48  ;;  %v7982_v46 = vadd.f32 %v2883_v0, %v2811_v23  ;;  %4067 = vmatpush1.bf16.msra.mxu0 %v6286_v19  ;;  %v6312_v23 = vld [vmem:[#allocation6 + $0x18c] ss:$16 sps:$4 sm:$0xff]  }
 0x375   :  { %v2885_v32 = vpop.f32.mrf.mxu1  ;;  %4068 = vmatprep.subr.bf16.mxu0 %v6294_v10 }
 0x376   :  { %6825 = vpow2.f32 %v2960_v3  ;;  %v2962_v50 = vmul.f32 1.442695, %v2919_v49  ;;  %v2922_v47 = vsub.f32 0.0, %v7982_v46  ;;  %v7987_v59 = vadd.f32 %v2885_v32, %v2813_v18  ;;  %v2832_v18 = vpop.f32.mrf.mxu0  ;;  %v6310_v49 = vld [vmem:[#allocation6 + $0x188] ss:$16 sps:$4 sm:$0xff]  }
 0x377   :  { %v2889_v44 = vpop.f32.mrf.mxu1  ;;  %v2831_v32 = vadd.f32 %v2830_v57, %v7916_v41 }
 0x378   :  { %6827 = vpow2.f32 %v2962_v50  ;;  %v2968_v15 = vmul.f32 1.442695, %v2922_v47  ;;  %v2923_v34 = vsub.f32 0.0, %v7987_v59  ;;  %v7992_v16 = vadd.f32 %v2889_v44, %v2817_v40  ;;  %4069 = vmatpush2.bf16.msra.mxu0 %v6292_v24  ;;  %v6318_v47 = vld [vmem:[#allocation6 + $0x16c] ss:$16 sps:$4 sm:$0xff]  }
 0x379   :  { %v2891_v60 = vpop.f32.mrf.mxu1  ;;  %4070 = vmatprep.subr.bf16.mxu0 %v6300_v31  ;;  %v2829_v40 = vadd.f32 %v2828_v55, %v7923_v26 }
 0x37a   :  { %6829 = vpow2.f32 %v2968_v15  ;;  %v2970_v21 = vmul.f32 1.442695, %v2923_v34  ;;  %v2926_v8 = vsub.f32 0.0, %v7992_v16  ;;  %v7995_v13 = vadd.f32 %v2891_v60, %v2819_v17 }
 0x37b   :  { %v6818_v39 = vpop.eup %6817  ;;  %v2893_v2 = vpop.f32.mrf.mxu1 }
 0x37c   :  { %v3006_v52 = vadd.f32 1.0, %v6818_v39  ;;  %6831 = vpow2.f32 %v2970_v21  ;;  %v2976_v56 = vmul.f32 1.442695, %v2926_v8  ;;  %v2927_v63 = vsub.f32 0.0, %v7995_v13  ;;  %4071 = vmatpush2.bf16.msra.mxu0 %v6298_v27  ;;  %v6316_v8 = vld [vmem:[#allocation6 + $0x168] ss:$16 sps:$4 sm:$0xff]  }
 0x37d   :  { %v6820_v6 = vpop.eup %6819  ;;  %v8002_v54 = vadd.f32 %v2893_v2, %v2821_v43  ;;  %v2895_v19 = vpop.f32.mrf.mxu1  ;;  %4072 = vmatprep.subr.bf16.mxu0 %v6306_v14  ;;  %v2833_v27 = vadd.f32 %v2832_v18, %v7923_v26  ;;  %v6324_v2 = vld [vmem:[#allocation6 + $0x14c] ss:$16 sps:$4 sm:$0xff]   ;;  %v6328_v18 = vld [vmem:[#allocation6 + $0x128] ss:$16 sps:$4 sm:$0xff]  }
 0x37e   :  { %6833 = vrcp.f32 %v3006_v52  ;;  %v3007_v58 = vadd.f32 1.0, %v6820_v6  ;;  %v2978_v42 = vmul.f32 1.442695, %v2927_v63  ;;  %v8004_v11 = vadd.f32 %v2895_v19, %v2823_v51  ;;  %v6322_v19 = vld [vmem:[#allocation6 + $0x148] ss:$16 sps:$4 sm:$0xff]  }
 0x37f   :  { %v6822_v10 = vpop.eup %6821  ;;  %6835 = vpow2.f32 %v2976_v56  ;;  %v2930_v38 = vsub.f32 0.0, %v8002_v54  ;;  %v2899_v1 = vpop.f32.mrf.mxu1 }
 0x380   :  { %6837 = vrcp.f32 %v3007_v58  ;;  %v3010_v0 = vadd.f32 1.0, %v6822_v10  ;;  %v2931_v9 = vsub.f32 0.0, %v8004_v11  ;;  %v8008_v3 = vadd.f32 %v2899_v1, %v2827_v12  ;;  %4073 = vmatpush2.bf16.msra.mxu0 %v6304_v7  ;;  %v6330_v58 = vld [vmem:[#allocation6 + $0x12c] ss:$16 sps:$4 sm:$0xff]  }
 0x381   :  { %v6824_v24 = vpop.eup %6823  ;;  %6839 = vpow2.f32 %v2978_v42  ;;  %v2984_v31 = vmul.f32 1.442695, %v2930_v38  ;;  %v2901_v50 = vpop.f32.mrf.mxu1  ;;  %4074 = vmatprep.subr.bf16.mxu0 %v6312_v23 }
 0x382   :  { %6841 = vrcp.f32 %v3010_v0  ;;  %v3011_v17 = vadd.f32 1.0, %v6824_v24  ;;  %v2986_v44 = vmul.f32 1.442695, %v2931_v9  ;;  %v2934_v15 = vsub.f32 0.0, %v8008_v3  ;;  %v6336_v9 = vld [vmem:[#allocation6 + $0x10c] ss:$16 sps:$4 sm:$0xff]  }
 0x383   :  { %v6826_v34 = vpop.eup %6825  ;;  %6843 = vpow2.f32 %v2984_v31  ;;  %v8014_v60 = vadd.f32 %v2901_v50, %v2829_v40  ;;  %v2903_v14 = vpop.f32.mrf.mxu1  ;;  %v6334_v50 = vld [vmem:[#allocation6 + $0x108] ss:$16 sps:$4 sm:$0xff]  }
 0x384   :  { %6845 = vrcp.f32 %v3011_v17  ;;  %v3014_v55 = vadd.f32 1.0, %v6826_v34  ;;  %v2992_v41 = vmul.f32 1.442695, %v2934_v15  ;;  %v8016_v21 = vadd.f32 %v2903_v14, %v2831_v32  ;;  %4075 = vmatpush2.bf16.msra.mxu0 %v6310_v49 }
 0x385   :  { %v6828_v39 = vpop.eup %6827  ;;  %6847 = vpow2.f32 %v2986_v44  ;;  %v2935_v43 = vsub.f32 0.0, %v8014_v60  ;;  %v2905_v51 = vpop.f32.mrf.mxu1  ;;  %4076 = vmatprep.subr.bf16.mxu0 %v6318_v47 }
 0x386   :  { %6849 = vrcp.f32 %v3014_v55  ;;  %v3015_v26 = vadd.f32 1.0, %v6828_v39  ;;  %v2938_v57 = vsub.f32 0.0, %v8016_v21  ;;  %v8020_v52 = vadd.f32 %v2905_v51, %v2833_v27 }
 0x387   :  { %v6830_v56 = vpop.eup %6829  ;;  %6851 = vpow2.f32 %v2992_v41  ;;  %v2994_v63 = vmul.f32 1.442695, %v2935_v43  ;;  %v6337_v43 = vld [vmem:[#allocation6 + $0x2e8] ss:$16 sps:$4 sm:$0xff]  }
 0x388   :  { %6853 = vrcp.f32 %v3015_v26  ;;  %v3018_v7 = vadd.f32 1.0, %v6830_v56  ;;  %v3000_v6 = vmul.f32 1.442695, %v2938_v57  ;;  %v2939_v12 = vsub.f32 0.0, %v8020_v52  ;;  %4077 = vmatpush2.bf16.msra.mxu0 %v6316_v8  ;;  %v6340_v56 = vld [vmem:[#allocation6 + $0x2c8] ss:$16 sps:$4 sm:$0xff]  }
 0x389   :  { %v6832_v23 = vpop.eup %6831  ;;  %6855 = vpow2.f32 %v2994_v63  ;;  %4078 = vmatprep.subr.bf16.mxu0 %v6324_v2  ;;  %v6342_v2 = vld [vmem:[#allocation6 + $0x2cc] ss:$16 sps:$4 sm:$0xff]  }
 0x38a   :  { %6857 = vrcp.f32 %v3018_v7  ;;  %v3019_v42 = vadd.f32 1.0, %v6832_v23  ;;  %v3002_v10 = vmul.f32 1.442695, %v2939_v12  ;;  %v6345_v12 = vld [vmem:[#allocation6 + $0x2ac] ss:$16 sps:$4 sm:$0xff]  }
 0x38b   :  { %v6834_v38 = vpop.eup %6833  ;;  %6859 = vpow2.f32 %v3000_v6 }
 0x38c   :  { %v6836_v1 = vpop.eup %6835  ;;  %6861 = vrcp.f32 %v3019_v42  ;;  %4079 = vmatpush2.bf16.msra.mxu0 %v6322_v19  ;;  %v3070_v55 = vmul.f32 %v6834_v38, %v7939_v33  ;;  %v6348_v38 = vld [vmem:[#allocation6 + $0x28c] ss:$16 sps:$4 sm:$0xff]  }
 0x38d   :  { %v6838_v0 = vpop.eup %6837  ;;  %6863 = vpow2.f32 %v3002_v10  ;;  %4080 = vmatprep.subr.bf16.mxu0 %v6330_v58  ;;  %v3022_v31 = vadd.f32 1.0, %v6836_v1  ;;  %v6343_v10 = vld [vmem:[#allocation6 + $0x2a8] ss:$16 sps:$4 sm:$0xff]  }
 0x38e   :  { %v6840_v49 = vpop.eup %6839  ;;  %v3071_v34 = vmul.f32 %v6838_v0, %v7947_v61 }
 0x38f   :  { %v6842_v24 = vpop.eup %6841  ;;  %v3023_v40 = vadd.f32 1.0, %v6840_v49 }
 0x390   :  { %v6844_v32 = vpop.eup %6843  ;;  %4081 = vmatpush2.bf16.msra.mxu0 %v6328_v18  ;;  %v3074_v17 = vmul.f32 %v6842_v24, %v7955_v22  ;;  %v6351_v18 = vld [vmem:[#allocation6 + $0x26c] ss:$16 sps:$4 sm:$0xff]  }
 0x391   :  { %v6846_v47 = vpop.eup %6845  ;;  %v3026_v44 = vadd.f32 1.0, %v6844_v32  ;;  %4082 = vmatprep.subr.bf16.mxu0 %v6336_v9  ;;  %6865 = vrcp.f32 %v3023_v40 }
 0x392   :  { %v6848_v15 = vpop.eup %6847  ;;  %v3075_v27 = vmul.f32 %v6846_v47, %v7964_v25  ;;  %v8029_v51 = vpack.c.bf16 %v3074_v17, %v3070_v55  ;;  %v6357_v17 = vld [vmem:[#allocation6 + $0x22c] ss:$16 sps:$4 sm:$0xff]   ;;  %v6385_v55 = vld [vmem:[#allocation7 + $0x70] ss:$8 sps:$4 sm:$0xff]  }
 0x393   :  { %v6850_v14 = vpop.eup %6849  ;;  %6867 = vrcp.f32 %v3026_v44  ;;  %v3027_v41 = vadd.f32 1.0, %v6848_v15 }
 0x394   :  { %v6852_v8 = vpop.eup %6851  ;;  %6869 = vrcp.f32 %v3022_v31  ;;  %4083 = vmatpush2.bf16.msra.mxu0 %v6334_v50  ;;  %v8027_v39 = vpack.c.bf16 %v3075_v27, %v3071_v34  ;;  %v6355_v27 = vld [vmem:[#allocation6 + $0x228] ss:$16 sps:$4 sm:$0xff]  }
 0x395   :  { %v6854_v22 = vpop.eup %6853  ;;  %6871 = vrcp.f32 %v3027_v41  ;;  %v3030_v57 = vadd.f32 1.0, %v6852_v8  ;;  %v6387_v41 = vld [vmem:[#allocation7 + $0x74] ss:$8 sps:$4 sm:$0xff]   ;;  %v6390_v8 = vld [vmem:[#allocation7 + $0x64] ss:$8 sps:$4 sm:$0xff]  }
 0x396   :  { %v6856_v61 = vpop.eup %6855  ;;  %4011 = vmatprep.mubr.bf16.mxu1 %v8027_v39  ;;  %v3079_v23 = vmul.f32 %v6854_v22, %v7977_v48  ;;  %4802 = vmatprep.subr.bf16.mxu0 %v6387_v41  ;;  %v6369_v22 = vld [vmem:[#allocation6 + $0x3ac] ss:$16 sps:$4 sm:$0xff]  }
 0x397   :  { %v6858_v25 = vpop.eup %6857  ;;  %v3031_v26 = vadd.f32 1.0, %v6856_v61  ;;  %4012 = vmatmul.mubr.bf16.vlgmr.msra.gmra.mxu1 %v8029_v51  ;;  %4085 = vmatmul.mubr.bf16.vlgmr.msra.gmra.mxu0 %v7891_v5  ;;  %v3078_v5 = vmul.f32 %v6850_v14, %v7971_v4  ;;  %v6360_v14 = vld [vmem:[#allocation6 + $0x20c] ss:$16 sps:$4 sm:$0xff]   ;;  %v6391_v61 = vld [vmem:[#allocation7 + $0x50] ss:$8 sps:$4 sm:$0xff]  }
 0x398   :  { %v6860_v33 = vpop.eup %6859  ;;  %4126 = vmatpush1.bf16.msra.mxu1 %v6337_v43  ;;  %4094 = vmatprep.mubr.bf16.mxu0 %v7903_v62  ;;  %v3082_v7 = vmul.f32 %v6858_v25, %v7982_v46  ;;  %v6364_v43 = vld [vmem:[#allocation6 + $0x3c8] ss:$16 sps:$4 sm:$0xff]   ;;  %v6372_v25 = vld [vmem:[#allocation6 + $0x38c] ss:$16 sps:$4 sm:$0xff]  }
 0x399   :  { %v6862_v63 = vpop.eup %6861  ;;  %v3034_v6 = vadd.f32 1.0, %v6860_v33  ;;  %4127 = vmatprep.subr.bf16.mxu1 %v6342_v2  ;;  %6873 = vrcp.f32 %v3031_v26  ;;  %4803 = vmatpush1.bf16.msra.mxu0 %v6385_v55  ;;  %v6393_v2 = vld [vmem:[#allocation7 + $0x54] ss:$8 sps:$4 sm:$0xff]   ;;  %v6396_v26 = vld [vmem:[#allocation7 + $0x44] ss:$8 sps:$4 sm:$0xff]  }
 0x39a   :  { %v6864_v19 = vpop.eup %6863  ;;  %v3083_v58 = vmul.f32 %v6862_v63, %v7987_v59  ;;  %v8041_v46 = vpack.c.bf16 %v3082_v7, %v3078_v5  ;;  %v6346_v59 = vld [vmem:[#allocation6 + $0x288] ss:$16 sps:$4 sm:$0xff]   ;;  %4804 = vmatprep.subr.bf16.mxu0 %v6390_v8  ;;  %v6378_v7 = vld [vmem:[#allocation6 + $0x34c] ss:$16 sps:$4 sm:$0xff]  }
 0x39b   :  { %6875 = vrcp.f32 %v3034_v6  ;;  %v3035_v42 = vadd.f32 1.0, %v6864_v19  ;;  %v6370_v33 = vld [vmem:[#allocation6 + $0x388] ss:$16 sps:$4 sm:$0xff]   ;;  %v6399_v5 = vld [vmem:[#allocation7 + $0x34] ss:$8 sps:$4 sm:$0xff]  }
 0x39c   :  { %6877 = vrcp.f32 %v3030_v57  ;;  %4128 = vmatpush1.bf16.msra.mxu1 %v6340_v56  ;;  %v8039_v62 = vpack.c.bf16 %v3083_v58, %v3079_v23  ;;  %v6394_v57 = vld [vmem:[#allocation7 + $0x40] ss:$8 sps:$4 sm:$0xff]   ;;  %v6375_v56 = vld [vmem:[#allocation6 + $0x36c] ss:$16 sps:$4 sm:$0xff]  }
 0x39d   :  { %6879 = vrcp.f32 %v3035_v42  ;;  %4129 = vmatprep.subr.bf16.mxu1 %v6345_v12  ;;  %v6373_v63 = vld [vmem:[#allocation6 + $0x368] ss:$16 sps:$4 sm:$0xff]   ;;  %v6381_v12 = vld [vmem:[#allocation6 + $0x32c] ss:$16 sps:$4 sm:$0xff]  }
 0x39e   :  { %4021 = vmatprep.mubr.bf16.mxu1 %v8039_v62  ;;  %v6866_v48 = vpop.eup %6865  ;;  %v6376_v6 = vld [vmem:[#allocation6 + $0x348] ss:$16 sps:$4 sm:$0xff]   ;;  %v6384_v23 = vld [vmem:[#allocation6 + $0x30c] ss:$16 sps:$4 sm:$0xff]  }
 0x39f   :  { %4022 = vmatmul.mubr.bf16.gmra.mxu1 %v8041_v46  ;;  %4095 = vmatmul.mubr.bf16.gmra.mxu0 %v7907_v45  ;;  %v3087_v49 = vmul.f32 %v6866_v48, %v7995_v13  ;;  %v6349_v45 = vld [vmem:[#allocation6 + $0x268] ss:$16 sps:$4 sm:$0xff]   ;;  %v6405_v48 = vld [vmem:[#allocation7 + $0x14] ss:$8 sps:$4 sm:$0xff]  }
 0x3a0   :  { %v6868_v4 = vpop.eup %6867  ;;  %4130 = vmatpush1.bf16.msra.mxu1 %v6343_v10  ;;  %4104 = vmatprep.mubr.bf16.mxu0 %v7927_v28  ;;  %v6354_v28 = vld [vmem:[#allocation6 + $0x24c] ss:$16 sps:$4 sm:$0xff]   ;;  %v6379_v19 = vld [vmem:[#allocation6 + $0x328] ss:$16 sps:$4 sm:$0xff]  }
 0x3a1   :  { %v6870_v1 = vpop.eup %6869  ;;  %4131 = vmatprep.subr.bf16.mxu1 %v6348_v38  ;;  %v3090_v9 = vmul.f32 %v6868_v4, %v8002_v54  ;;  %v6382_v58 = vld [vmem:[#allocation6 + $0x308] ss:$16 sps:$4 sm:$0xff]   ;;  %v6402_v10 = vld [vmem:[#allocation7 + $0x24] ss:$8 sps:$4 sm:$0xff]   ;;  %v6411_v4 = vld [vmem:[#allocation7 + $0xf4] ss:$8 sps:$4 sm:$0xff]  }
 0x3a2   :  { %v6872_v0 = vpop.eup %6871  ;;  %v3086_v40 = vmul.f32 %v6870_v1, %v7992_v16  ;;  %v6352_v16 = vld [vmem:[#allocation6 + $0x248] ss:$16 sps:$4 sm:$0xff]   ;;  %v6414_v1 = vld [vmem:[#allocation7 + $0xe4] ss:$8 sps:$4 sm:$0xff]   ;;  %v6459_v8 = vld [vmem:[#allocation7 + $0x1f4] ss:$8 sps:$4 sm:$0xff]  }
 0x3a3   :  { %v3091_v24 = vmul.f32 %v6872_v0, %v8004_v11  ;;  %v6397_v42 = vld [vmem:[#allocation7 + $0x30] ss:$8 sps:$4 sm:$0xff]   ;;  %v6400_v38 = vld [vmem:[#allocation7 + $0x20] ss:$8 sps:$4 sm:$0xff]   ;;  %v6417_v0 = vld [vmem:[#allocation7 + $0xd4] ss:$8 sps:$4 sm:$0xff]  }
 0x3a4   :  { %4132 = vmatpush1.bf16.msra.mxu1 %v6346_v59  ;;  %v8053_v31 = vpack.c.bf16 %v3090_v9, %v3086_v40  ;;  %v6409_v59 = vld [vmem:[#allocation7 + $0xf0] ss:$8 sps:$4 sm:$0xff]   ;;  %v6423_v40 = vld [vmem:[#allocation7 + $0xb4] ss:$8 sps:$4 sm:$0xff]   ;;  %v6454_v55 = vld [vmem:[#allocation7 + $0x100] ss:$8 sps:$4 sm:$0xff]  }
 0x3a5   :  { %v8051_v32 = vpack.c.bf16 %v3091_v24, %v3087_v49  ;;  %4133 = vmatprep.subr.bf16.mxu1 %v6351_v18  ;;  %v6412_v18 = vld [vmem:[#allocation7 + $0xe0] ss:$8 sps:$4 sm:$0xff]   ;;  %v6415_v9 = vld [vmem:[#allocation7 + $0xd0] ss:$8 sps:$4 sm:$0xff]   ;;  %v6420_v49 = vld [vmem:[#allocation7 + $0xc4] ss:$8 sps:$4 sm:$0xff]  }
 0x3a6   :  { %v6874_v50 = vpop.eup %6873  ;;  %v6418_v24 = vld [vmem:[#allocation7 + $0xc0] ss:$8 sps:$4 sm:$0xff]  }
 0x3a7   :  { %4031 = vmatprep.mubr.bf16.mxu1 %v8051_v32  ;;  %4105 = vmatmul.mubr.bf16.gmra.mxu0 %v7929_v30  ;;  %v3095_v44 = vmul.f32 %v6874_v50, %v8014_v60  ;;  %v6358_v60 = vld [vmem:[#allocation6 + $0x208] ss:$16 sps:$4 sm:$0xff]  }
 0x3a8   :  { %v6876_v54 = vpop.eup %6875  ;;  %4032 = vmatmul.mubr.bf16.gmra.mxu1 %v8053_v31  ;;  %4114 = vmatprep.mubr.bf16.mxu0 %v7957_v29  ;;  %v6427_v50 = vld [vmem:[#allocation7 + $0x90] ss:$8 sps:$4 sm:$0xff]  }
 0x3a9   :  { %v6878_v13 = vpop.eup %6877  ;;  %4134 = vmatpush1.bf16.msra.mxu1 %v6349_v45  ;;  %v3098_v47 = vmul.f32 %v6876_v54, %v8016_v21  ;;  %v6361_v21 = vld [vmem:[#allocation6 + $0x3e8] ss:$16 sps:$4 sm:$0xff]   ;;  %v6426_v45 = vld [vmem:[#allocation7 + $0xa4] ss:$8 sps:$4 sm:$0xff]  }
 0x3aa   :  { %v6880_v11 = vpop.eup %6879  ;;  %4135 = vmatprep.subr.bf16.mxu1 %v6354_v28  ;;  %v3094_v34 = vmul.f32 %v6878_v13, %v8008_v3  ;;  %v6363_v3 = vld [vmem:[#allocation6 + $0x3ec] ss:$16 sps:$4 sm:$0xff]   ;;  %v6430_v13 = vld [vmem:[#allocation7 + $0x80] ss:$8 sps:$4 sm:$0xff]  }
 0x3ab   :  { %v3099_v15 = vmul.f32 %v6880_v11, %v8020_v52  ;;  %v6366_v52 = vld [vmem:[#allocation6 + $0x3cc] ss:$16 sps:$4 sm:$0xff]   ;;  %v6433_v11 = vld [vmem:[#allocation7 + $0x170] ss:$8 sps:$4 sm:$0xff]  }
 0x3ac   :  { %v8065_v29 = vpack.c.bf16 %v3098_v47, %v3094_v34  ;;  %v6429_v28 = vld [vmem:[#allocation7 + $0x94] ss:$8 sps:$4 sm:$0xff]   ;;  %v6432_v54 = vld [vmem:[#allocation7 + $0x84] ss:$8 sps:$4 sm:$0xff]  }
 0x3ad   :  { %4136 = vmatpush1.bf16.msra.mxu1 %v6352_v16  ;;  %v8063_v30 = vpack.c.bf16 %v3099_v15, %v3095_v44  ;;  %v6435_v16 = vld [vmem:[#allocation7 + $0x174] ss:$8 sps:$4 sm:$0xff]   ;;  %v6438_v47 = vld [vmem:[#allocation7 + $0x164] ss:$8 sps:$4 sm:$0xff]   ;;  %v6439_v15 = vld [vmem:[#allocation7 + $0x150] ss:$8 sps:$4 sm:$0xff]  }
 0x3ae   :  { %4137 = vmatprep.subr.bf16.mxu1 %v6357_v17  ;;  %v6436_v17 = vld [vmem:[#allocation7 + $0x160] ss:$8 sps:$4 sm:$0xff]   ;;  %v6441_v44 = vld [vmem:[#allocation7 + $0x154] ss:$8 sps:$4 sm:$0xff]   ;;  %v6444_v34 = vld [vmem:[#allocation7 + $0x144] ss:$8 sps:$4 sm:$0xff]  }
 0x3af   :  { %4041 = vmatprep.mubr.bf16.mxu1 %v8063_v30  ;;  %4115 = vmatmul.mubr.bf16.gmra.mxu0 %v7961_v53  ;;  %v6388_v53 = vld [vmem:[#allocation7 + $0x60] ss:$8 sps:$4 sm:$0xff]  }
 0x3b0   :  { %4042 = vmatmul.mubr.bf16.gmra.mxu1 %v8065_v29  ;;  %4805 = vmatpush1.bf16.msra.mxu0 %v6388_v53 }
 0x3b1   :  { %4138 = vmatpush1.bf16.msra.mxu1 %v6355_v27  ;;  %4157 = vmatprep.mubr.bf16.mxu1 %v8027_v39  ;;  %v6367_v39 = vld [vmem:[#allocation6 + $0x3a8] ss:$16 sps:$4 sm:$0xff]   ;;  %v6447_v27 = vld [vmem:[#allocation7 + $0x134] ss:$8 sps:$4 sm:$0xff]  }
 0x3b2   :  { %4139 = vmatprep.subr.bf16.mxu1 %v6360_v14  ;;  %4806 = vmatprep.subr.bf16.mxu0 %v6393_v2  ;;  %v6450_v14 = vld [vmem:[#allocation7 + $0x124] ss:$8 sps:$4 sm:$0xff]   ;;  %v6460_v2 = vld [vmem:[#allocation7 + $0x1e0] ss:$8 sps:$4 sm:$0xff]  }
 0x3b4   :  { %4807 = vmatpush1.bf16.msra.mxu0 %v6391_v61  ;;  %v6465_v61 = vld [vmem:[#allocation7 + $0x1d4] ss:$8 sps:$4 sm:$0xff]  }
 0x3b5   :  { %4140 = vmatpush1.bf16.msra.mxu1 %v6358_v60  ;;  %4808 = vmatprep.subr.bf16.mxu0 %v6396_v26  ;;  %v6448_v60 = vld [vmem:[#allocation7 + $0x120] ss:$8 sps:$4 sm:$0xff]  }
 0x3b6   :  { %4141 = vmatprep.subr.bf16.mxu1 %v6363_v3  ;;  %v6453_v3 = vld [vmem:[#allocation7 + $0x114] ss:$8 sps:$4 sm:$0xff]  }
 0x3b8   :  { %4809 = vmatpush1.bf16.msra.mxu0 %v6394_v57  ;;  %v6466_v57 = vld [vmem:[#allocation7 + $0x1c0] ss:$8 sps:$4 sm:$0xff]  }
 0x3b9   :  { %4142 = vmatpush2.bf16.msra.mxu1 %v6361_v21  ;;  %4810 = vmatprep.subr.bf16.mxu0 %v6399_v5  ;;  %v6451_v21 = vld [vmem:[#allocation7 + $0x110] ss:$8 sps:$4 sm:$0xff]   ;;  %v8081_v5 = vld [vmem:[%s8457_s8] sm:$0xf] }
 0x3ba   :  { %4143 = vmatprep.subr.bf16.mxu1 %v6366_v52  ;;  %v6456_v52 = vld [vmem:[#allocation7 + $0x104] ss:$8 sps:$4 sm:$0xff]  }
 0x3bc   :  { %4811 = vmatpush1.bf16.msra.mxu0 %v6397_v42  ;;  %v6475_v42 = vld [vmem:[#allocation7 + $0x190] ss:$8 sps:$4 sm:$0xff]  }
 0x3bd   :  { %4144 = vmatpush2.bf16.msra.mxu1 %v6364_v43  ;;  %4812 = vmatprep.subr.bf16.mxu0 %v6402_v10  ;;  %v6457_v43 = vld [vmem:[#allocation7 + $0x1f0] ss:$8 sps:$4 sm:$0xff]  }
 0x3be   :  { %4145 = vmatprep.subr.bf16.mxu1 %v6369_v22  ;;  %v6462_v22 = vld [vmem:[#allocation7 + $0x1e4] ss:$8 sps:$4 sm:$0xff]  }
 0x3c0   :  { %4813 = vmatpush1.bf16.msra.mxu0 %v6400_v38  ;;  %v8085_v38 = vrot.slane %v8081_v5, %v7299_v35 }
 0x3c1   :  { %4146 = vmatpush2.bf16.msra.mxu1 %v6367_v39  ;;  %4814 = vmatprep.subr.bf16.mxu0 %v6405_v48  ;;  %v6480_v48 = vld [vmem:[#allocation7 + $0x184] ss:$8 sps:$4 sm:$0xff]  }
 0x3c2   :  { %4147 = vmatprep.subr.bf16.mxu1 %v6372_v25  ;;  %v6463_v25 = vld [vmem:[#allocation7 + $0x1d0] ss:$8 sps:$4 sm:$0xff]  }
 0x3c5   :  { %4148 = vmatpush2.bf16.msra.mxu1 %v6370_v33  ;;  %v6468_v33 = vld [vmem:[#allocation7 + $0x1c4] ss:$8 sps:$4 sm:$0xff]  }
 0x3c6   :  { %4149 = vmatprep.subr.bf16.mxu1 %v6375_v56 }
 0x3c9   :  { %4150 = vmatpush2.bf16.msra.mxu1 %v6373_v63  ;;  %v6471_v63 = vld [vmem:[#allocation7 + $0x1b4] ss:$8 sps:$4 sm:$0xff]  }
 0x3ca   :  { %4151 = vmatprep.subr.bf16.mxu1 %v6378_v7  ;;  %v6469_v7 = vld [vmem:[#allocation7 + $0x1b0] ss:$8 sps:$4 sm:$0xff]  }
 0x3cd   :  { %4152 = vmatpush2.bf16.msra.mxu1 %v6376_v6 }
 0x3ce   :  { %4153 = vmatprep.subr.bf16.mxu1 %v6381_v12  ;;  %v6474_v12 = vld [vmem:[#allocation7 + $0x1a4] ss:$8 sps:$4 sm:$0xff]  }
 0x3d1   :  { %4154 = vmatpush2.bf16.msra.mxu1 %v6379_v19  ;;  %v6472_v19 = vld [vmem:[#allocation7 + $0x1a0] ss:$8 sps:$4 sm:$0xff]  }
 0x3d2   :  { %4155 = vmatprep.subr.bf16.mxu1 %v6384_v23 }
 0x3d5   :  { %4156 = vmatpush2.bf16.msra.mxu1 %v6382_v58  ;;  %v6477_v58 = vld [vmem:[#allocation7 + $0x194] ss:$8 sps:$4 sm:$0xff]  }
 0x3d6   :  { %4875 = vmatprep.subr.bf16.mxu1 %v6435_v16 }
 0x3d8   :  { %4158 = vmatmul.mubr.bf16.vlgmr.msra.gmra.mxu1 %v8029_v51  ;;  %v6403_v51 = vld [vmem:[#allocation7 + $0x10] ss:$8 sps:$4 sm:$0xff]  }
 0x3d9   :  { %4167 = vmatprep.mubr.bf16.mxu1 %v8039_v62  ;;  %4815 = vmatpush1.bf16.msra.mxu0 %v6403_v51  ;;  %v6408_v62 = vld [vmem:[#allocation7 + $0x4] ss:$8 sps:$4 sm:$0xff]   ;;  %v6478_v51 = vld [vmem:[#allocation7 + $0x180] ss:$8 sps:$4 sm:$0xff]  }
 0x3da   :  { %4816 = vmatprep.subr.bf16.mxu0 %v6408_v62  ;;  %4876 = vmatpush1.bf16.msra.mxu1 %v6433_v11  ;;  %v8089_v62 = vrot.slane %v8081_v5, %v7302_v36 }
 0x3db   :  { %4877 = vmatprep.subr.bf16.mxu1 %v6438_v47 }
 0x3de   :  { %4878 = vmatpush1.bf16.msra.mxu1 %v6436_v17 }
 0x3df   :  { %4879 = vmatprep.subr.bf16.mxu1 %v6441_v44 }
 0x3e0   :  { %4168 = vmatmul.mubr.bf16.gmra.mxu1 %v8041_v46  ;;  %v6406_v46 = vld [vmem:[#allocation7] ss:$8 sps:$4 sm:$0xff]  }
 0x3e1   :  { %4177 = vmatprep.mubr.bf16.mxu1 %v8051_v32  ;;  %4817 = vmatpush1.bf16.msra.mxu0 %v6406_v46  ;;  %v6421_v32 = vld [vmem:[#allocation7 + $0xb0] ss:$8 sps:$4 sm:$0xff]  }
 0x3e2   :  { %4818 = vmatprep.subr.bf16.mxu0 %v6411_v4  ;;  %4880 = vmatpush1.bf16.msra.mxu1 %v6439_v15 }
 0x3e3   :  { %4881 = vmatprep.subr.bf16.mxu1 %v6444_v34 }
 0x3e5   :  { %4819 = vmatpush2.bf16.msra.mxu0 %v6409_v59 }
 0x3e6   :  { %4820 = vmatprep.subr.bf16.mxu0 %v6414_v1 }
 0x3e8   :  { %4178 = vmatmul.mubr.bf16.gmra.mxu1 %v8053_v31  ;;  %v6424_v31 = vld [vmem:[#allocation7 + $0xa0] ss:$8 sps:$4 sm:$0xff]  }
 0x3e9   :  { %4187 = vmatprep.mubr.bf16.mxu1 %v8063_v30  ;;  %4821 = vmatpush2.bf16.msra.mxu0 %v6412_v18  ;;  %v6442_v30 = vld [vmem:[#allocation7 + $0x140] ss:$8 sps:$4 sm:$0xff]  }
 0x3ea   :  { %4822 = vmatprep.subr.bf16.mxu0 %v6417_v0  ;;  %4882 = vmatpush1.bf16.msra.mxu1 %v6442_v30 }
 0x3eb   :  { %4883 = vmatprep.subr.bf16.mxu1 %v6447_v27 }
 0x3ed   :  { %4823 = vmatpush2.bf16.msra.mxu0 %v6415_v9 }
 0x3ee   :  { %4824 = vmatprep.subr.bf16.mxu0 %v6420_v49 }
 0x3f0   :  { %4188 = vmatmul.mubr.bf16.gmra.mxu1 %v8065_v29  ;;  %v6445_v29 = vld [vmem:[#allocation7 + $0x130] ss:$8 sps:$4 sm:$0xff]  }
 0x3f1   :  { %4825 = vmatpush2.bf16.msra.mxu0 %v6418_v24  ;;  %4884 = vmatpush1.bf16.msra.mxu1 %v6445_v29 }
 0x3f2   :  { %4826 = vmatprep.subr.bf16.mxu0 %v6423_v40  ;;  %4885 = vmatprep.subr.bf16.mxu1 %v6450_v14 }
 0x3f5   :  { %4827 = vmatpush2.bf16.msra.mxu0 %v6421_v32  ;;  %4886 = vmatpush1.bf16.msra.mxu1 %v6448_v60 }
 0x3f6   :  { %4828 = vmatprep.subr.bf16.mxu0 %v6426_v45  ;;  %4887 = vmatprep.subr.bf16.mxu1 %v6453_v3 }
 0x3f9   :  { %4829 = vmatpush2.bf16.msra.mxu0 %v6424_v31  ;;  %4888 = vmatpush1.bf16.msra.mxu1 %v6451_v21 }
 0x3fa   :  { %4830 = vmatprep.subr.bf16.mxu0 %v6429_v28  ;;  %4889 = vmatprep.subr.bf16.mxu1 %v6456_v52 }
 0x3fd   :  { %4831 = vmatpush2.bf16.msra.mxu0 %v6427_v50  ;;  %4890 = vmatpush1.bf16.msra.mxu1 %v6454_v55 }
 0x3fe   :  { %4832 = vmatprep.subr.bf16.mxu0 %v6432_v54  ;;  %4891 = vmatprep.subr.bf16.mxu1 %v6459_v8 }
 0x401   :  { %4833 = vmatpush2.bf16.msra.mxu0 %v6430_v13  ;;  %4892 = vmatpush2.bf16.msra.mxu1 %v6457_v43 }
 0x402   :  { %4893 = vmatprep.subr.bf16.mxu1 %v6462_v22 }
 0x405   :  { %4894 = vmatpush2.bf16.msra.mxu1 %v6460_v2 }
 0x406   :  { %4895 = vmatprep.subr.bf16.mxu1 %v6465_v61 }
 0x409   :  { %4896 = vmatpush2.bf16.msra.mxu1 %v6463_v25 }
 0x40a   :  { %4897 = vmatprep.subr.bf16.mxu1 %v6468_v33 }
 0x40d   :  { %4898 = vmatpush2.bf16.msra.mxu1 %v6466_v57 }
 0x40e   :  { %4899 = vmatprep.subr.bf16.mxu1 %v6471_v63 }
 0x411   :  { %4900 = vmatpush2.bf16.msra.mxu1 %v6469_v7 }
 0x412   :  { %4901 = vmatprep.subr.bf16.mxu1 %v6474_v12 }
 0x415   :  { %4902 = vmatpush2.bf16.msra.mxu1 %v6472_v19 }
 0x416   :  { %v3940_v41 = vpop.f32.mrf.mxu0  ;;  %4903 = vmatprep.subr.bf16.mxu1 %v6477_v58 }
 0x417   :  { %v3941_v4 = vadd.f32 %v3940_v41, %v8085_v38 }
 0x418   :  { %v3942_v53 = vpop.f32.mrf.mxu0 }
 0x419   :  { %4904 = vmatpush2.bf16.msra.mxu1 %v6475_v42  ;;  %v3943_v1 = vadd.f32 %v3942_v53, %v8089_v62 }
 0x41a   :  { %v3944_v39 = vpop.f32.mrf.mxu0  ;;  %4905 = vmatprep.subr.bf16.mxu1 %v6480_v48 }
 0x41b   :  { %v3945_v49 = vadd.f32 %v3944_v39, %v8085_v38 }
 0x41c   :  { %v3946_v26 = vpop.f32.mrf.mxu0 }
 0x41d   :  { %4906 = vmatpush2.bf16.msra.mxu1 %v6478_v51  ;;  %v3947_v45 = vadd.f32 %v3946_v26, %v8089_v62 }
 0x41e   :  { %v3950_v56 = vpop.f32.mrf.mxu0 }
 0x41f   :  { %v3951_v54 = vadd.f32 %v3950_v56, %v8085_v38 }
 0x420   :  { %v3952_v6 = vpop.f32.mrf.mxu0 }
 0x421   :  { %v3953_v44 = vadd.f32 %v3952_v6, %v8089_v62 }
 0x422   :  { %v3954_v23 = vpop.f32.mrf.mxu0 }
 0x423   :  { %v3955_v29 = vadd.f32 %v3954_v23, %v8085_v38 }
 0x424   :  { %v3956_v10 = vpop.f32.mrf.mxu0 }
 0x425   :  { %v3957_v55 = vadd.f32 %v3956_v10, %v8089_v62 }
 0x427   :  { %v3960_v46 = vpop.f32.mrf.mxu0 }
 0x428   :  { %v3961_v26 = vadd.f32 %v3960_v46, %v8085_v38 }
 0x429   :  { %v3962_v0 = vpop.f32.mrf.mxu0 }
 0x42a   :  { %v3963_v63 = vadd.f32 %v3962_v0, %v8089_v62 }
 0x42b   :  { %v3964_v13 = vpop.f32.mrf.mxu0 }
 0x42c   :  { %v3965_v58 = vadd.f32 %v3964_v13, %v8085_v38 }
 0x42d   :  { %v3966_v14 = vpop.f32.mrf.mxu0 }
 0x42f   :  { %v3970_v22 = vpop.f32.mrf.mxu0 }
 0x431   :  { %v3972_v7 = vpop.f32.mrf.mxu0 }
 0x432   :  { %v3973_v13 = vadd.f32 %v3972_v7, %v8089_v62 }
 0x457   :  { %v4013_v59 = vpop.f32.mrf.mxu1 }
 0x458   :  { %v8093_v18 = vadd.f32 %v4013_v59, %v3941_v4  ;;  %v3967_v4 = vadd.f32 %v3966_v14, %v8089_v62  ;;  %v3974_v59 = vpop.f32.mrf.mxu0 }
 0x459   :  { %v4015_v9 = vpop.f32.mrf.mxu1 }
 0x45a   :  { %v4198_v24 = vsub.f32 0.0, %v8093_v18  ;;  %v8097_v40 = vadd.f32 %v4015_v9, %v3943_v1 }
 0x45b   :  { %v4017_v32 = vpop.f32.mrf.mxu1 }
 0x45c   :  { %v4230_v31 = vmul.f32 1.442695, %v4198_v24  ;;  %v4199_v28 = vsub.f32 0.0, %v8097_v40  ;;  %v8101_v50 = vadd.f32 %v4017_v32, %v3945_v49  ;;  %v3971_v49 = vadd.f32 %v3970_v22, %v8085_v38 }
 0x45d   :  { %v4019_v16 = vpop.f32.mrf.mxu1 }
 0x45e   :  { %6881 = vpow2.f32 %v4230_v31  ;;  %v4232_v11 = vmul.f32 1.442695, %v4199_v28  ;;  %v4202_v47 = vsub.f32 0.0, %v8101_v50  ;;  %v8105_v17 = vadd.f32 %v4019_v16, %v3947_v45 }
 0x45f   :  { %v4023_v15 = vpop.f32.mrf.mxu1 }
 0x460   :  { %6883 = vpow2.f32 %v4232_v11  ;;  %v4238_v34 = vmul.f32 1.442695, %v4202_v47  ;;  %v4203_v30 = vsub.f32 0.0, %v8105_v17  ;;  %v8109_v27 = vadd.f32 %v4023_v15, %v3951_v54 }
 0x461   :  { %v4025_v60 = vpop.f32.mrf.mxu1 }
 0x462   :  { %6885 = vpow2.f32 %v4238_v34  ;;  %v4240_v3 = vmul.f32 1.442695, %v4203_v30  ;;  %v4206_v21 = vsub.f32 0.0, %v8109_v27  ;;  %v8113_v52 = vadd.f32 %v4025_v60, %v3953_v44  ;;  %v3976_v44 = vpop.f32.mrf.mxu0 }
 0x463   :  { %v4027_v41 = vpop.f32.mrf.mxu1 }
 0x464   :  { %6887 = vpow2.f32 %v4240_v3  ;;  %v4246_v8 = vmul.f32 1.442695, %v4206_v21  ;;  %v4207_v43 = vsub.f32 0.0, %v8113_v52  ;;  %v8117_v53 = vadd.f32 %v4027_v41, %v3955_v29 }
 0x465   :  { %v4029_v2 = vpop.f32.mrf.mxu1  ;;  %v3975_v29 = vadd.f32 %v3974_v59, %v8085_v38 }
 0x466   :  { %6889 = vpow2.f32 %v4246_v8  ;;  %v4248_v39 = vmul.f32 1.442695, %v4207_v43  ;;  %v4210_v61 = vsub.f32 0.0, %v8117_v53  ;;  %v8120_v25 = vadd.f32 %v4029_v2, %v3957_v55 }
 0x467   :  { %v3977_v8 = vadd.f32 %v3976_v44, %v8089_v62 }
 0x468   :  { %6891 = vpow2.f32 %v4248_v39  ;;  %v4254_v33 = vmul.f32 1.442695, %v4210_v61  ;;  %v4211_v57 = vsub.f32 0.0, %v8120_v25  ;;  %v4033_v56 = vpop.f32.mrf.mxu1  ;;  %v8148_v39 = vpop.f32.mrf.mxu0 }
 0x469   :  { %v8125_v6 = vadd.f32 %v4033_v56, %v3961_v26 }
 0x46a   :  { %6893 = vpow2.f32 %v4254_v33  ;;  %v4256_v12 = vmul.f32 1.442695, %v4211_v57  ;;  %v4035_v19 = vpop.f32.mrf.mxu1 }
 0x46b   :  { %v6882_v23 = vpop.eup %6881  ;;  %v4214_v42 = vsub.f32 0.0, %v8125_v6  ;;  %v8129_v10 = vadd.f32 %v4035_v19, %v3963_v63 }
 0x46c   :  { %v4294_v48 = vadd.f32 1.0, %v6882_v23  ;;  %6895 = vpow2.f32 %v4256_v12  ;;  %v4037_v51 = vpop.f32.mrf.mxu1  ;;  %v8156_v23 = vpop.f32.mrf.mxu0 }
 0x46d   :  { %v6884_v46 = vpop.eup %6883  ;;  %v4262_v1 = vmul.f32 1.442695, %v4214_v42  ;;  %v4215_v0 = vsub.f32 0.0, %v8129_v10  ;;  %v8133_v9 = vadd.f32 %v4037_v51, %v3965_v58 }
 0x46e   :  { %6897 = vrcp.f32 %v4294_v48  ;;  %v4295_v24 = vadd.f32 1.0, %v6884_v46  ;;  %v4039_v32 = vpop.f32.mrf.mxu1 }
 0x46f   :  { %v6886_v45 = vpop.eup %6885  ;;  %6899 = vpow2.f32 %v4262_v1  ;;  %v4264_v31 = vmul.f32 1.442695, %v4215_v0  ;;  %v4218_v28 = vsub.f32 0.0, %v8133_v9  ;;  %v8137_v54 = vadd.f32 %v4039_v32, %v3967_v4  ;;  %v8159_v1 = vpop.f32.mrf.mxu0 }
 0x470   :  { %6901 = vrcp.f32 %v4295_v24  ;;  %v4298_v16 = vadd.f32 1.0, %v6886_v45  ;;  %v4043_v11 = vpop.f32.mrf.mxu1 }
 0x471   :  { %v6888_v47 = vpop.eup %6887  ;;  %6903 = vpow2.f32 %v4264_v31  ;;  %v4270_v15 = vmul.f32 1.442695, %v4218_v28  ;;  %v4219_v34 = vsub.f32 0.0, %v8137_v54  ;;  %v8141_v30 = vadd.f32 %v4043_v11, %v3971_v49 }
 0x472   :  { %6905 = vrcp.f32 %v4298_v16  ;;  %v4299_v14 = vadd.f32 1.0, %v6888_v47  ;;  %v4045_v60 = vpop.f32.mrf.mxu1 }
 0x473   :  { %v6890_v3 = vpop.eup %6889  ;;  %6907 = vpow2.f32 %v4270_v15  ;;  %v4272_v21 = vmul.f32 1.442695, %v4219_v34  ;;  %v4222_v55 = vsub.f32 0.0, %v8141_v30  ;;  %v8145_v41 = vadd.f32 %v4045_v60, %v3973_v13  ;;  %v8162_v13 = vpop.f32.mrf.mxu0 }
 0x474   :  { %6909 = vrcp.f32 %v4299_v14  ;;  %v4302_v43 = vadd.f32 1.0, %v6890_v3  ;;  %v4047_v22 = vpop.f32.mrf.mxu1 }
 0x475   :  { %v6892_v2 = vpop.eup %6891  ;;  %6911 = vpow2.f32 %v4272_v21  ;;  %v4278_v38 = vmul.f32 1.442695, %v4222_v55  ;;  %v4223_v61 = vsub.f32 0.0, %v8145_v41  ;;  %v8151_v26 = vadd.f32 %v4047_v22, %v3975_v29 }
 0x476   :  { %6913 = vrcp.f32 %v4302_v43  ;;  %v4303_v33 = vadd.f32 1.0, %v6892_v2  ;;  %v4049_v57 = vpop.f32.mrf.mxu1 }
 0x477   :  { %v6894_v56 = vpop.eup %6893  ;;  %6915 = vpow2.f32 %v4278_v38  ;;  %v4280_v63 = vmul.f32 1.442695, %v4223_v61  ;;  %v4226_v62 = vsub.f32 0.0, %v8151_v26  ;;  %v8154_v7 = vadd.f32 %v4049_v57, %v3977_v8 }
 0x478   :  { %6917 = vrcp.f32 %v4303_v33  ;;  %v4306_v12 = vadd.f32 1.0, %v6894_v56 }
 0x479   :  { %v6896_v19 = vpop.eup %6895  ;;  %6919 = vpow2.f32 %v4280_v63  ;;  %v4286_v58 = vmul.f32 1.442695, %v4226_v62  ;;  %v4227_v42 = vsub.f32 0.0, %v8154_v7 }
 0x47a   :  { %6921 = vrcp.f32 %v4306_v12  ;;  %v4307_v48 = vadd.f32 1.0, %v6896_v19 }
 0x47b   :  { %v6898_v51 = vpop.eup %6897  ;;  %6923 = vpow2.f32 %v4286_v58  ;;  %v4288_v46 = vmul.f32 1.442695, %v4227_v42 }
 0x47c   :  { %v6900_v4 = vpop.eup %6899  ;;  %6925 = vrcp.f32 %v4307_v48  ;;  %v4358_v34 = vmul.f32 %v6898_v51, %v8093_v18 }
 0x47d   :  { %v6902_v59 = vpop.eup %6901  ;;  %6927 = vpow2.f32 %v4288_v46  ;;  %v4310_v45 = vadd.f32 1.0, %v6900_v4 }
 0x47e   :  { %v6904_v0 = vpop.eup %6903  ;;  %v4359_v47 = vmul.f32 %v6902_v59, %v8097_v40  ;;  %v8185_v59 = vrot.slane %v8081_v5, %v8466_v20 }
 0x47f   :  { %v6906_v49 = vpop.eup %6905  ;;  %v4311_v24 = vadd.f32 1.0, %v6904_v0 }
 0x480   :  { %v6908_v32 = vpop.eup %6907  ;;  %v4362_v28 = vmul.f32 %v6906_v49, %v8101_v50  ;;  %v8167_v50 = vpop.f32.mrf.mxu0 }
 0x481   :  { %v6910_v31 = vpop.eup %6909  ;;  %v4314_v16 = vadd.f32 1.0, %v6908_v32  ;;  %6929 = vrcp.f32 %v4311_v24 }
 0x482   :  { %v6912_v11 = vpop.eup %6911  ;;  %v4363_v44 = vmul.f32 %v6910_v31, %v8105_v17  ;;  %v4454_v21 = vpack.c.bf16 %v4362_v28, %v4358_v34  ;;  %v8169_v2 = vpop.f32.mrf.mxu0 }
 0x483   :  { %v6914_v15 = vpop.eup %6913  ;;  %6931 = vrcp.f32 %v4314_v16  ;;  %v4315_v29 = vadd.f32 1.0, %v6912_v11 }
 0x484   :  { %v6916_v14 = vpop.eup %6915  ;;  %6933 = vrcp.f32 %v4310_v45  ;;  %v4455_v60 = vpack.c.bf16 %v4363_v44, %v4359_v47  ;;  %v4366_v56 = vmul.f32 %v6914_v15, %v8109_v27  ;;  %v4100_v19 = vpop.f32.mrf.mxu0 }
 0x485   :  { %v6918_v3 = vpop.eup %6917  ;;  %6935 = vrcp.f32 %v4315_v29  ;;  %v4318_v43 = vadd.f32 1.0, %v6916_v14 }
 0x486   :  { %v6920_v55 = vpop.eup %6919  ;;  %4834 = vmatprep.mubr.bf16.mxu0 %v4455_v60  ;;  %v4367_v33 = vmul.f32 %v6918_v3, %v8113_v52  ;;  %v4102_v48 = vpop.f32.mrf.mxu0 }
 0x487   :  { %v6922_v8 = vpop.eup %6921  ;;  %v4319_v40 = vadd.f32 1.0, %v6920_v55  ;;  %4835 = vmatmul.mubr.bf16.vlgmr.msra.gmra.mxu0 %v4454_v21 }
 0x488   :  { %v6924_v17 = vpop.eup %6923  ;;  %v4370_v18 = vmul.f32 %v6922_v8, %v8117_v53  ;;  %v4106_v0 = vpop.f32.mrf.mxu0 }
 0x489   :  { %v6926_v22 = vpop.eup %6925  ;;  %v4322_v38 = vadd.f32 1.0, %v6924_v17  ;;  %6937 = vrcp.f32 %v4319_v40 }
 0x48a   :  { %v6928_v61 = vpop.eup %6927  ;;  %v4371_v57 = vmul.f32 %v6926_v22, %v8120_v25  ;;  %v4458_v12 = vpack.c.bf16 %v4370_v18, %v4366_v56  ;;  %v8178_v25 = vrot.slane %v8081_v5, %v7305_v37 }
 0x48b   :  { %6939 = vrcp.f32 %v4322_v38  ;;  %v4323_v63 = vadd.f32 1.0, %v6928_v61 }
 0x48c   :  { %6941 = vrcp.f32 %v4318_v43  ;;  %v4459_v62 = vpack.c.bf16 %v4371_v57, %v4367_v33  ;;  %v4091_v5 = vadd.f32 %v8159_v1, %v8178_v25  ;;  %v4101_v22 = vadd.f32 %v4100_v19, %v8178_v25 }
 0x48d   :  { %6943 = vrcp.f32 %v4323_v63 }
 0x48e   :  { %4844 = vmatprep.mubr.bf16.mxu0 %v4459_v62  ;;  %v6930_v58 = vpop.eup %6929 }
 0x48f   :  { %4845 = vmatmul.mubr.bf16.gmra.mxu0 %v4458_v12  ;;  %v4375_v27 = vmul.f32 %v6930_v58, %v8129_v10  ;;  %v4107_v58 = vadd.f32 %v4106_v0, %v8178_v25 }
 0x490   :  { %v6932_v53 = vpop.eup %6931 }
 0x491   :  { %v6934_v42 = vpop.eup %6933  ;;  %v4378_v52 = vmul.f32 %v6932_v53, %v8133_v9  ;;  %v4087_v9 = vadd.f32 %v8148_v39, %v8178_v25 }
 0x492   :  { %v6936_v51 = vpop.eup %6935  ;;  %v4374_v4 = vmul.f32 %v6934_v42, %v8125_v6  ;;  %v4108_v6 = vpop.f32.mrf.mxu0 }
 0x493   :  { %v4379_v46 = vmul.f32 %v6936_v51, %v8137_v54  ;;  %v4089_v54 = vadd.f32 %v8156_v23, %v8185_v59  ;;  %v4093_v23 = vadd.f32 %v8162_v13, %v8185_v59 }
 0x494   :  { %v4462_v24 = vpack.c.bf16 %v4378_v52, %v4374_v4  ;;  %v4110_v29 = vpop.f32.mrf.mxu0  ;;  %v4109_v52 = vadd.f32 %v4108_v6, %v8185_v59 }
 0x495   :  { %v4463_v49 = vpack.c.bf16 %v4379_v46, %v4375_v27 }
 0x496   :  { %v6938_v32 = vpop.eup %6937  ;;  %v4112_v40 = vpop.f32.mrf.mxu0 }
 0x497   :  { %4854 = vmatprep.mubr.bf16.mxu0 %v4463_v49  ;;  %v4383_v39 = vmul.f32 %v6938_v32, %v8145_v41  ;;  %v4097_v41 = vadd.f32 %v8167_v50, %v8178_v25 }
 0x498   :  { %v6940_v37 = vpop.eup %6939  ;;  %v4159_v45 = vpop.f32.mrf.mxu1  ;;  %4855 = vmatmul.mubr.bf16.gmra.mxu0 %v4462_v24 }
 0x499   :  { %v6942_v10 = vpop.eup %6941  ;;  %v8191_v31 = vadd.f32 %v4159_v45, %v4087_v9  ;;  %v4386_v28 = vmul.f32 %v6940_v37, %v8151_v26  ;;  %v4116_v56 = vpop.f32.mrf.mxu0  ;;  %v4111_v45 = vadd.f32 %v4110_v29, %v8178_v25 }
 0x49a   :  { %v6944_v20 = vpop.eup %6943  ;;  %v4161_v16 = vpop.f32.mrf.mxu1  ;;  %v4382_v15 = vmul.f32 %v6942_v10, %v8141_v30  ;;  %v4099_v30 = vadd.f32 %v8169_v2, %v8185_v59  ;;  %v4103_v2 = vadd.f32 %v4102_v48, %v8185_v59  ;;  %v4113_v10 = vadd.f32 %v4112_v40, %v8185_v59 }
 0x49b   :  { %v4387_v11 = vmul.f32 %v6944_v20, %v8154_v7  ;;  %v4200_v47 = vsub.f32 0.0, %v8191_v31  ;;  %v8199_v44 = vadd.f32 %v4161_v16, %v4089_v54  ;;  %v4118_v27 = vpop.f32.mrf.mxu0 }
 0x49c   :  { %v4163_v34 = vpop.f32.mrf.mxu1  ;;  %v4466_v7 = vpack.c.bf16 %v4386_v28, %v4382_v15 }
 0x49d   :  { %v4234_v14 = vmul.f32 1.442695, %v4200_v47  ;;  %v4201_v1 = vsub.f32 0.0, %v8199_v44  ;;  %v8205_v26 = vadd.f32 %v4163_v34, %v4091_v5  ;;  %v4467_v60 = vpack.c.bf16 %v4387_v11, %v4383_v39  ;;  %v4120_v6 = vpop.f32.mrf.mxu0 }
 0x49e   :  { %v4165_v3 = vpop.f32.mrf.mxu1  ;;  %v4117_v39 = vadd.f32 %v4116_v56, %v8178_v25 }
 0x49f   :  { %6945 = vpow2.f32 %v4234_v14  ;;  %v4236_v21 = vmul.f32 1.442695, %v4201_v1  ;;  %v4204_v55 = vsub.f32 0.0, %v8205_v26  ;;  %v8210_v13 = vadd.f32 %v4165_v3, %v4093_v23  ;;  %4864 = vmatprep.mubr.bf16.mxu0 %v4467_v60  ;;  %v4122_v60 = vpop.f32.mrf.mxu0 }
 0x4a0   :  { %v4169_v8 = vpop.f32.mrf.mxu1  ;;  %4865 = vmatmul.mubr.bf16.gmra.mxu0 %v4466_v7 }
 0x4a1   :  { %6947 = vpow2.f32 %v4236_v21  ;;  %v4242_v17 = vmul.f32 1.442695, %v4204_v55  ;;  %v4205_v43 = vsub.f32 0.0, %v8210_v13  ;;  %v8215_v50 = vadd.f32 %v4169_v8, %v4097_v41 }
 0x4a2   :  { %v4171_v18 = vpop.f32.mrf.mxu1  ;;  %v4119_v55 = vadd.f32 %v4118_v27, %v8185_v59 }
 0x4a3   :  { %6949 = vpow2.f32 %v4242_v17  ;;  %v4244_v38 = vmul.f32 1.442695, %v4205_v43  ;;  %v4208_v61 = vsub.f32 0.0, %v8215_v50  ;;  %v8219_v33 = vadd.f32 %v4171_v18, %v4099_v30 }
 0x4a4   :  { %v4173_v57 = vpop.f32.mrf.mxu1  ;;  %v4121_v30 = vadd.f32 %v4120_v6, %v8178_v25 }
 0x4a5   :  { %6951 = vpow2.f32 %v4244_v38  ;;  %v4250_v63 = vmul.f32 1.442695, %v4208_v61  ;;  %v4209_v62 = vsub.f32 0.0, %v8219_v33  ;;  %v8223_v12 = vadd.f32 %v4173_v57, %v4101_v22 }
 0x4a6   :  { %v4175_v19 = vpop.f32.mrf.mxu1  ;;  %v4123_v38 = vadd.f32 %v4122_v60, %v8185_v59 }
 0x4a7   :  { %6953 = vpow2.f32 %v4250_v63  ;;  %v4252_v53 = vmul.f32 1.442695, %v4209_v62  ;;  %v4212_v42 = vsub.f32 0.0, %v8223_v12  ;;  %v8227_v51 = vadd.f32 %v4175_v19, %v4103_v2 }
 0x4a8   :  { %v4179_v48 = vpop.f32.mrf.mxu1 }
 0x4a9   :  { %6955 = vpow2.f32 %v4252_v53  ;;  %v4258_v46 = vmul.f32 1.442695, %v4212_v42  ;;  %v4213_v4 = vsub.f32 0.0, %v8227_v51  ;;  %v8231_v49 = vadd.f32 %v4179_v48, %v4107_v58 }
 0x4aa   :  { %v4181_v24 = vpop.f32.mrf.mxu1 }
 0x4ab   :  { %6957 = vpow2.f32 %v4258_v46  ;;  %v4260_v0 = vmul.f32 1.442695, %v4213_v4  ;;  %v4216_v32 = vsub.f32 0.0, %v8231_v49  ;;  %v8234_v9 = vadd.f32 %v4181_v24, %v4109_v52 }
 0x4ac   :  { %v6946_v37 = vpop.eup %6945  ;;  %v4183_v54 = vpop.f32.mrf.mxu1 }
 0x4ad   :  { %v4296_v20 = vadd.f32 1.0, %v6946_v37  ;;  %6959 = vpow2.f32 %v4260_v0  ;;  %v4266_v5 = vmul.f32 1.442695, %v4216_v32  ;;  %v4217_v28 = vsub.f32 0.0, %v8234_v9 }
 0x4ae   :  { %v6948_v16 = vpop.eup %6947  ;;  %v8240_v11 = vadd.f32 %v4183_v54, %v4111_v45  ;;  %v4185_v47 = vpop.f32.mrf.mxu1 }
 0x4af   :  { %6961 = vrcp.f32 %v4296_v20  ;;  %v4297_v23 = vadd.f32 1.0, %v6948_v16  ;;  %v4268_v15 = vmul.f32 1.442695, %v4217_v28  ;;  %v8242_v34 = vadd.f32 %v4185_v47, %v4113_v10 }
 0x4b0   :  { %v6950_v29 = vpop.eup %6949  ;;  %6963 = vpow2.f32 %v4266_v5  ;;  %v4220_v14 = vsub.f32 0.0, %v8240_v11  ;;  %v4189_v1 = vpop.f32.mrf.mxu1 }
 0x4b1   :  { %6965 = vrcp.f32 %v4297_v23  ;;  %v4300_v41 = vadd.f32 1.0, %v6950_v29  ;;  %v4221_v7 = vsub.f32 0.0, %v8242_v34  ;;  %v8246_v3 = vadd.f32 %v4189_v1, %v4117_v39 }
 0x4b2   :  { %v6952_v21 = vpop.eup %6951  ;;  %6967 = vpow2.f32 %v4268_v15  ;;  %v4274_v8 = vmul.f32 1.442695, %v4220_v14  ;;  %v4191_v40 = vpop.f32.mrf.mxu1 }
 0x4b3   :  { %6969 = vrcp.f32 %v4300_v41  ;;  %v4301_v17 = vadd.f32 1.0, %v6952_v21  ;;  %v4276_v43 = vmul.f32 1.442695, %v4221_v7  ;;  %v4224_v22 = vsub.f32 0.0, %v8246_v3 }
 0x4b4   :  { %v6954_v18 = vpop.eup %6953  ;;  %6971 = vpow2.f32 %v4274_v8  ;;  %v8252_v61 = vadd.f32 %v4191_v40, %v4119_v55  ;;  %v4193_v2 = vpop.f32.mrf.mxu1 }
 0x4b5   :  { %6973 = vrcp.f32 %v4301_v17  ;;  %v4304_v57 = vadd.f32 1.0, %v6954_v18  ;;  %v4282_v56 = vmul.f32 1.442695, %v4224_v22  ;;  %v8254_v63 = vadd.f32 %v4193_v2, %v4121_v30 }
 0x4b6   :  { %v6956_v25 = vpop.eup %6955  ;;  %6975 = vpow2.f32 %v4276_v43  ;;  %v4225_v62 = vsub.f32 0.0, %v8252_v61  ;;  %v4195_v58 = vpop.f32.mrf.mxu1 }
 0x4b7   :  { %6977 = vrcp.f32 %v4304_v57  ;;  %v4305_v19 = vadd.f32 1.0, %v6956_v25  ;;  %v4228_v53 = vsub.f32 0.0, %v8254_v63  ;;  %v8258_v42 = vadd.f32 %v4195_v58, %v4123_v38 }
 0x4b8   :  { %v6958_v59 = vpop.eup %6957  ;;  %6979 = vpow2.f32 %v4282_v56  ;;  %v4284_v52 = vmul.f32 1.442695, %v4225_v62 }
 0x4b9   :  { %6981 = vrcp.f32 %v4305_v19  ;;  %v4308_v48 = vadd.f32 1.0, %v6958_v59  ;;  %v4290_v27 = vmul.f32 1.442695, %v4228_v53  ;;  %v4229_v46 = vsub.f32 0.0, %v8258_v42 }
 0x4ba   :  { %v6960_v4 = vpop.eup %6959  ;;  %6983 = vpow2.f32 %v4284_v52 }
 0x4bb   :  { %6985 = vrcp.f32 %v4308_v48  ;;  %v4309_v24 = vadd.f32 1.0, %v6960_v4  ;;  %v4292_v0 = vmul.f32 1.442695, %v4229_v46 }
 0x4bc   :  { %v6962_v32 = vpop.eup %6961  ;;  %6987 = vpow2.f32 %v4290_v27 }
 0x4bd   :  { %v6964_v37 = vpop.eup %6963  ;;  %6989 = vrcp.f32 %v4309_v24  ;;  %v4360_v14 = vmul.f32 %v6962_v32, %v8191_v31  ;;  %v6487_v32 = vld [vmem:[%s8460_s11 + $0x60] sm:$0xff]  }
 0x4be   :  { %v6966_v45 = vpop.eup %6965  ;;  %6991 = vpow2.f32 %v4292_v0  ;;  %v4312_v5 = vadd.f32 1.0, %v6964_v37  ;;  %v6482_v0 = vld [vmem:[%s8460_s11 + $0x38] sm:$0xff]   ;;  %v6488_v37 = vld [vmem:[%s8460_s11 + $0x20] sm:$0xff]  }
 0x4bf   :  { %v6968_v10 = vpop.eup %6967  ;;  %v4361_v23 = vmul.f32 %v6966_v45, %v8199_v44  ;;  %v6489_v45 = vld [vmem:[%s8460_s11 + $0x58] sm:$0xff]  }
 0x4c0   :  { %v6970_v54 = vpop.eup %6969  ;;  %v4313_v6 = vadd.f32 1.0, %v6968_v10  ;;  %v6490_v10 = vld [vmem:[%s8460_s11 + $0x18] sm:$0xff]  }
 0x4c1   :  { %v6972_v20 = vpop.eup %6971  ;;  %v4364_v16 = vmul.f32 %v6970_v54, %v8205_v26  ;;  %v6491_v54 = vld [vmem:[%s8460_s11 + $0x50] sm:$0xff]  }
 0x4c2   :  { %v6974_v28 = vpop.eup %6973  ;;  %v4316_v39 = vadd.f32 1.0, %v6972_v20  ;;  %6993 = vrcp.f32 %v4313_v6  ;;  %v6492_v6 = vld [vmem:[%s8460_s11 + $0x10] sm:$0xff]   ;;  %v6493_v20 = vld [vmem:[%s8460_s11 + $0x48] sm:$0xff]  }
 0x4c3   :  { %v6976_v47 = vpop.eup %6975  ;;  %v4365_v15 = vmul.f32 %v6974_v28, %v8210_v13  ;;  %v4456_v21 = vpack.c.bf16 %v4364_v16, %v4360_v14  ;;  %v6495_v28 = vld [vmem:[%s8460_s11 + $0x40] sm:$0xff]  }
 0x4c4   :  { %v6978_v29 = vpop.eup %6977  ;;  %6995 = vrcp.f32 %v4316_v39  ;;  %v4317_v1 = vadd.f32 1.0, %v6976_v47  ;;  %v6496_v16 = vld [vmem:[%s8460_s11] sm:$0xff]  }
 0x4c5   :  { %v6980_v60 = vpop.eup %6979  ;;  %6997 = vrcp.f32 %v4312_v5  ;;  %v4457_v41 = vpack.c.bf16 %v4365_v15, %v4361_v23  ;;  %v4368_v18 = vmul.f32 %v6978_v29, %v8215_v50  ;;  %v6494_v5 = vld [vmem:[%s8460_s11 + $0x8] sm:$0xff]  }
 0x4c6   :  { %v6982_v7 = vpop.eup %6981  ;;  %6999 = vrcp.f32 %v4317_v1  ;;  %v4320_v8 = vadd.f32 1.0, %v6980_v60  ;;  %v4470_v60 = vld [vmem:[%s8459_s10] sm:$0x3] }
 0x4c7   :  { %v6984_v55 = vpop.eup %6983  ;;  %4907 = vmatprep.mubr.bf16.mxu1 %v4457_v41  ;;  %v4369_v43 = vmul.f32 %v6982_v7, %v8219_v33  ;;  %v8329_v7 = vrot.slane %v4470_v60, %v7299_v35 }
 0x4c8   :  { %v6986_v26 = vpop.eup %6985  ;;  %v4321_v30 = vadd.f32 1.0, %v6984_v55  ;;  %4908 = vmatmul.mubr.bf16.vlgmr.msra.gmra.mxu1 %v4456_v21  ;;  %v8332_v21 = vrot.slane %v4470_v60, %v7302_v36 }
 0x4c9   :  { %v6988_v44 = vpop.eup %6987  ;;  %v4372_v40 = vmul.f32 %v6986_v26, %v8223_v12 }
 0x4ca   :  { %v6990_v13 = vpop.eup %6989  ;;  %v4324_v17 = vadd.f32 1.0, %v6988_v44  ;;  %7001 = vrcp.f32 %v4321_v30 }
 0x4cb   :  { %v6992_v31 = vpop.eup %6991  ;;  %v4373_v22 = vmul.f32 %v6990_v13, %v8227_v51  ;;  %v4460_v57 = vpack.c.bf16 %v4372_v40, %v4368_v18 }
 0x4cc   :  { %7003 = vrcp.f32 %v4324_v17  ;;  %v4325_v38 = vadd.f32 1.0, %v6992_v31 }
 0x4cd   :  { %7005 = vrcp.f32 %v4320_v8  ;;  %v4461_v2 = vpack.c.bf16 %v4373_v22, %v4369_v43 }
 0x4ce   :  { %7007 = vrcp.f32 %v4325_v38 }
 0x4cf   :  { %4917 = vmatprep.mubr.bf16.mxu1 %v4461_v2  ;;  %v6994_v56 = vpop.eup %6993 }
 0x4d0   :  { %4918 = vmatmul.mubr.bf16.gmra.mxu1 %v4460_v57  ;;  %v4377_v33 = vmul.f32 %v6994_v56, %v8234_v9 }
 0x4d1   :  { %v6996_v25 = vpop.eup %6995 }
 0x4d2   :  { %v6998_v12 = vpop.eup %6997  ;;  %v4380_v58 = vmul.f32 %v6996_v25, %v8240_v11 }
 0x4d3   :  { %v7000_v62 = vpop.eup %6999  ;;  %v4376_v50 = vmul.f32 %v6998_v12, %v8231_v49  ;;  %v6481_v49 = vld [vmem:[%s8460_s11 + $0x78] sm:$0xff]  }
 0x4d4   :  { %v4381_v51 = vmul.f32 %v7000_v62, %v8242_v34  ;;  %5741 = vmatprep.subr.bf16.mxu0 %v6481_v49  ;;  %5781 = vmatprep.subr.bf16.mxu1 %v6481_v49 }
 0x4d5   :  { %v4464_v53 = vpack.c.bf16 %v4380_v58, %v4376_v50  ;;  %5742 = vmatpush3.bf16.msra.mxu0 %v6482_v0  ;;  %5789 = vmatpush3.bf16.msra.mxu1 %v6482_v0 }
 0x4d6   :  { %v4465_v19 = vpack.c.bf16 %v4381_v51, %v4377_v33 }
 0x4d7   :  { %v7002_v59 = vpop.eup %7001 }
 0x4d8   :  { %4927 = vmatprep.mubr.bf16.mxu1 %v4465_v19  ;;  %v4385_v4 = vmul.f32 %v7002_v59, %v8252_v61  ;;  %v6484_v61 = vld [vmem:[%s8460_s11 + $0x30] sm:$0xff]  }
 0x4d9   :  { %v7004_v52 = vpop.eup %7003  ;;  %4928 = vmatmul.mubr.bf16.gmra.mxu1 %v4464_v53 }
 0x4da   :  { %v7006_v48 = vpop.eup %7005  ;;  %v4388_v46 = vmul.f32 %v7004_v52, %v8254_v63  ;;  %v6485_v63 = vld [vmem:[%s8460_s11 + $0x68] sm:$0xff]  }
 0x4db   :  { %v7008_v27 = vpop.eup %7007  ;;  %v4384_v9 = vmul.f32 %v7006_v48, %v8246_v3  ;;  %v6483_v3 = vld [vmem:[%s8460_s11 + $0x70] sm:$0xff]  }
 0x4dc   :  { %v4389_v11 = vmul.f32 %v7008_v27, %v8258_v42  ;;  %5743 = vmatprep.subr.bf16.mxu0 %v6483_v3  ;;  %5782 = vmatprep.subr.bf16.mxu1 %v6483_v3  ;;  %v6486_v42 = vld [vmem:[%s8460_s11 + $0x28] sm:$0xff]  }
 0x4dd   :  { %v4468_v34 = vpack.c.bf16 %v4388_v46, %v4384_v9  ;;  %5744 = vmatpush3.bf16.msra.mxu0 %v6484_v61  ;;  %5790 = vmatpush3.bf16.msra.mxu1 %v6484_v61 }
 0x4de   :  { %v4469_v24 = vpack.c.bf16 %v4389_v11, %v4385_v4  ;;  %5745 = vmatprep.subr.bf16.mxu0 %v6485_v63  ;;  %5783 = vmatprep.subr.bf16.mxu1 %v6485_v63 }
 0x4e0   :  { %4937 = vmatprep.mubr.bf16.mxu1 %v4469_v24 }
 0x4e1   :  { %4938 = vmatmul.mubr.bf16.gmra.mxu1 %v4468_v34  ;;  %5746 = vmatpush3.bf16.msra.mxu0 %v6486_v42 }
 0x4e2   :  { %5791 = vmatpush3.bf16.msra.mxu1 %v6486_v42  ;;  %5747 = vmatprep.subr.bf16.mxu0 %v6487_v32 }
 0x4e3   :  { %5784 = vmatprep.subr.bf16.mxu1 %v6487_v32 }
 0x4e5   :  { %5748 = vmatpush3.bf16.msra.mxu0 %v6488_v37 }
 0x4e6   :  { %5792 = vmatpush3.bf16.msra.mxu1 %v6488_v37  ;;  %5749 = vmatprep.subr.bf16.mxu0 %v6489_v45 }
 0x4e7   :  { %5785 = vmatprep.subr.bf16.mxu1 %v6489_v45 }
 0x4e9   :  { %5750 = vmatpush3.bf16.msra.mxu0 %v6490_v10 }
 0x4ea   :  { %5793 = vmatpush3.bf16.msra.mxu1 %v6490_v10  ;;  %5751 = vmatprep.subr.bf16.mxu0 %v6491_v54 }
 0x4eb   :  { %5786 = vmatprep.subr.bf16.mxu1 %v6491_v54 }
 0x4ed   :  { %5752 = vmatpush3.bf16.msra.mxu0 %v6492_v6 }
 0x4ee   :  { %5794 = vmatpush3.bf16.msra.mxu1 %v6492_v6  ;;  %5753 = vmatprep.subr.bf16.mxu0 %v6493_v20 }
 0x4ef   :  { %5787 = vmatprep.subr.bf16.mxu1 %v6493_v20 }
 0x4f1   :  { %5754 = vmatpush3.bf16.msra.mxu0 %v6494_v5 }
 0x4f2   :  { %5795 = vmatpush3.bf16.msra.mxu1 %v6494_v5  ;;  %5755 = vmatprep.subr.bf16.mxu0 %v6495_v28 }
 0x4f3   :  { %5788 = vmatprep.subr.bf16.mxu1 %v6495_v28 }
 0x4f5   :  { %5756 = vmatpush3.bf16.msra.mxu0 %v6496_v16 }
 0x4f6   :  { %5796 = vmatpush3.bf16.msra.mxu1 %v6496_v16 }
 0x547   :  { %v4836_v39 = vpop.f32.mrf.mxu0 }
 0x548   :  { %v4837_v26 = vadd.f32 %v4836_v39, %v8329_v7 }
 0x549   :  { %v4838_v47 = vpop.f32.mrf.mxu0 }
 0x54a   :  { %v4839_v44 = vadd.f32 %v4838_v47, %v8332_v21 }
 0x54b   :  { %v4840_v23 = vpop.f32.mrf.mxu0 }
 0x54c   :  { %v4841_v17 = vadd.f32 %v4840_v23, %v8329_v7 }
 0x54d   :  { %v4842_v15 = vpop.f32.mrf.mxu0 }
 0x54e   :  { %v4843_v36 = vadd.f32 %v4842_v15, %v8332_v21 }
 0x54f   :  { %v4846_v29 = vpop.f32.mrf.mxu0 }
 0x550   :  { %v4847_v2 = vadd.f32 %v4846_v29, %v8329_v7 }
 0x551   :  { %v4848_v14 = vpop.f32.mrf.mxu0 }
 0x552   :  { %v4849_v58 = vadd.f32 %v4848_v14, %v8332_v21 }
 0x553   :  { %v4850_v1 = vpop.f32.mrf.mxu0 }
 0x554   :  { %v4851_v53 = vadd.f32 %v4850_v1, %v8329_v7 }
 0x555   :  { %v4852_v41 = vpop.f32.mrf.mxu0 }
 0x556   :  { %v4853_v4 = vadd.f32 %v4852_v41, %v8332_v21 }
 0x558   :  { %v4856_v55 = vpop.f32.mrf.mxu0 }
 0x559   :  { %v4857_v42 = vadd.f32 %v4856_v55, %v8329_v7 }
 0x55a   :  { %v4858_v13 = vpop.f32.mrf.mxu0 }
 0x55b   :  { %v4859_v10 = vadd.f32 %v4858_v13, %v8332_v21 }
 0x55c   :  { %v4860_v57 = vpop.f32.mrf.mxu0 }
 0x55d   :  { %v4861_v16 = vadd.f32 %v4860_v57, %v8329_v7 }
 0x55e   :  { %v4862_v59 = vpop.f32.mrf.mxu0 }
 0x55f   :  { %v4863_v14 = vadd.f32 %v4862_v59, %v8332_v21 }
 0x560   :  { %v4866_v49 = vpop.f32.mrf.mxu0 }
 0x562   :  { %v4868_v54 = vpop.f32.mrf.mxu0 }
 0x564   :  { %v4870_v1 = vpop.f32.mrf.mxu0 }
 0x588   :  { %v4909_v30 = vpop.f32.mrf.mxu1 }
 0x589   :  { %v8336_v8 = vadd.f32 %v4909_v30, %v4837_v26  ;;  %v4867_v26 = vadd.f32 %v4866_v49, %v8329_v7 }
 0x58a   :  { %v4911_v40 = vpop.f32.mrf.mxu1 }
 0x58b   :  { %v4948_v31 = vsub.f32 0.0, %v8336_v8  ;;  %v8340_v43 = vadd.f32 %v4911_v40, %v4839_v44 }
 0x58c   :  { %v4913_v35 = vpop.f32.mrf.mxu1 }
 0x58d   :  { %v4964_v22 = vmul.f32 1.442695, %v4948_v31  ;;  %v4949_v18 = vsub.f32 0.0, %v8340_v43  ;;  %v8344_v38 = vadd.f32 %v4913_v35, %v4841_v17  ;;  %v4869_v35 = vadd.f32 %v4868_v54, %v8332_v21 }
 0x58e   :  { %v4915_v56 = vpop.f32.mrf.mxu1 }
 0x58f   :  { %7009 = vpow2.f32 %v4964_v22  ;;  %v4966_v25 = vmul.f32 1.442695, %v4949_v18  ;;  %v4950_v12 = vsub.f32 0.0, %v8344_v38  ;;  %v8348_v62 = vadd.f32 %v4915_v56, %v4843_v36 }
 0x590   :  { %v4919_v33 = vpop.f32.mrf.mxu1 }
 0x591   :  { %7011 = vpow2.f32 %v4966_v25  ;;  %v4968_v51 = vmul.f32 1.442695, %v4950_v12  ;;  %v4951_v50 = vsub.f32 0.0, %v8348_v62  ;;  %v8352_v19 = vadd.f32 %v4919_v33, %v4847_v2  ;;  %v4872_v2 = vpop.f32.mrf.mxu0 }
 0x592   :  { %v4921_v52 = vpop.f32.mrf.mxu1  ;;  %v4871_v12 = vadd.f32 %v4870_v1, %v8329_v7 }
 0x593   :  { %7013 = vpow2.f32 %v4968_v51  ;;  %v4970_v48 = vmul.f32 1.442695, %v4951_v50  ;;  %v4952_v27 = vsub.f32 0.0, %v8352_v19  ;;  %v8356_v46 = vadd.f32 %v4921_v52, %v4849_v58 }
 0x594   :  { %v4923_v11 = vpop.f32.mrf.mxu1  ;;  %v4873_v52 = vadd.f32 %v4872_v2, %v8332_v21 }
 0x595   :  { %7015 = vpow2.f32 %v4970_v48  ;;  %v4972_v9 = vmul.f32 1.442695, %v4952_v27  ;;  %v4953_v24 = vsub.f32 0.0, %v8356_v46  ;;  %v8360_v34 = vadd.f32 %v4923_v11, %v4851_v53 }
 0x596   :  { %v4925_v0 = vpop.f32.mrf.mxu1 }
 0x597   :  { %7017 = vpow2.f32 %v4972_v9  ;;  %v4974_v3 = vmul.f32 1.442695, %v4953_v24  ;;  %v4954_v61 = vsub.f32 0.0, %v8360_v34  ;;  %v8363_v63 = vadd.f32 %v4925_v0, %v4853_v4 }
 0x599   :  { %7019 = vpow2.f32 %v4974_v3  ;;  %v4976_v32 = vmul.f32 1.442695, %v4954_v61  ;;  %v4955_v37 = vsub.f32 0.0, %v8363_v63  ;;  %v4929_v45 = vpop.f32.mrf.mxu1 }
 0x59a   :  { %v8368_v6 = vadd.f32 %v4929_v45, %v4857_v42 }
 0x59b   :  { %7021 = vpow2.f32 %v4976_v32  ;;  %v4978_v20 = vmul.f32 1.442695, %v4955_v37  ;;  %v4931_v5 = vpop.f32.mrf.mxu1 }
 0x59c   :  { %v7010_v28 = vpop.eup %7009  ;;  %v4956_v39 = vsub.f32 0.0, %v8368_v6  ;;  %v8372_v47 = vadd.f32 %v4931_v5, %v4859_v10 }
 0x59d   :  { %v4996_v23 = vadd.f32 1.0, %v7010_v28  ;;  %7023 = vpow2.f32 %v4978_v20  ;;  %v4933_v15 = vpop.f32.mrf.mxu1 }
 0x59e   :  { %v7012_v29 = vpop.eup %7011  ;;  %v4980_v60 = vmul.f32 1.442695, %v4956_v39  ;;  %v4957_v41 = vsub.f32 0.0, %v8372_v47  ;;  %v8376_v55 = vadd.f32 %v4933_v15, %v4861_v16 }
 0x59f   :  { %7025 = vrcp.f32 %v4996_v23  ;;  %v4997_v30 = vadd.f32 1.0, %v7012_v29  ;;  %v4935_v44 = vpop.f32.mrf.mxu1 }
 0x5a0   :  { %v7014_v13 = vpop.eup %7013  ;;  %7027 = vpow2.f32 %v4980_v60  ;;  %v4982_v40 = vmul.f32 1.442695, %v4957_v41  ;;  %v4958_v17 = vsub.f32 0.0, %v8376_v55  ;;  %v8380_v31 = vadd.f32 %v4935_v44, %v4863_v14 }
 0x5a1   :  { %7029 = vrcp.f32 %v4997_v30  ;;  %v4998_v36 = vadd.f32 1.0, %v7014_v13  ;;  %v4939_v22 = vpop.f32.mrf.mxu1 }
 0x5a2   :  { %v7016_v18 = vpop.eup %7015  ;;  %7031 = vpow2.f32 %v4982_v40  ;;  %v4984_v57 = vmul.f32 1.442695, %v4958_v17  ;;  %v4959_v56 = vsub.f32 0.0, %v8380_v31  ;;  %v8384_v25 = vadd.f32 %v4939_v22, %v4867_v26 }
 0x5a3   :  { %7033 = vrcp.f32 %v4998_v36  ;;  %v4999_v58 = vadd.f32 1.0, %v7016_v18  ;;  %v4941_v33 = vpop.f32.mrf.mxu1 }
 0x5a4   :  { %v7018_v51 = vpop.eup %7017  ;;  %7035 = vpow2.f32 %v4984_v57  ;;  %v4986_v50 = vmul.f32 1.442695, %v4959_v56  ;;  %v4960_v53 = vsub.f32 0.0, %v8384_v25  ;;  %v8388_v59 = vadd.f32 %v4941_v33, %v4869_v35 }
 0x5a5   :  { %7037 = vrcp.f32 %v4999_v58  ;;  %v5000_v48 = vadd.f32 1.0, %v7018_v51  ;;  %v4943_v27 = vpop.f32.mrf.mxu1 }
 0x5a6   :  { %v7020_v4 = vpop.eup %7019  ;;  %7039 = vpow2.f32 %v4986_v50  ;;  %v4988_v11 = vmul.f32 1.442695, %v4960_v53  ;;  %v4961_v7 = vsub.f32 0.0, %v8388_v59  ;;  %v8392_v9 = vadd.f32 %v4943_v27, %v4871_v12 }
 0x5a7   :  { %7041 = vrcp.f32 %v5000_v48  ;;  %v5001_v24 = vadd.f32 1.0, %v7020_v4  ;;  %v4945_v49 = vpop.f32.mrf.mxu1 }
 0x5a8   :  { %v7022_v0 = vpop.eup %7021  ;;  %7043 = vpow2.f32 %v4988_v11  ;;  %v4990_v3 = vmul.f32 1.442695, %v4961_v7  ;;  %v4962_v61 = vsub.f32 0.0, %v8392_v9  ;;  %v8395_v42 = vadd.f32 %v4945_v49, %v4873_v52 }
 0x5a9   :  { %7045 = vrcp.f32 %v5001_v24  ;;  %v5002_v21 = vadd.f32 1.0, %v7022_v0 }
 0x5aa   :  { %v7024_v32 = vpop.eup %7023  ;;  %7047 = vpow2.f32 %v4990_v3  ;;  %v4992_v37 = vmul.f32 1.442695, %v4962_v61  ;;  %v4963_v45 = vsub.f32 0.0, %v8395_v42 }
 0x5ab   :  { %7049 = vrcp.f32 %v5002_v21  ;;  %v5003_v10 = vadd.f32 1.0, %v7024_v32 }
 0x5ac   :  { %v7026_v54 = vpop.eup %7025  ;;  %7051 = vpow2.f32 %v4992_v37  ;;  %v4994_v20 = vmul.f32 1.442695, %v4963_v45  ;;  %v5724_v45 = vld [vmem:[%s8461_s12] ss:$0 sm:$0xff] }
 0x5ad   :  { %v7028_v5 = vpop.eup %7027  ;;  %7053 = vrcp.f32 %v5003_v10  ;;  %v5028_v13 = vmul.f32 %v7026_v54, %v8336_v8 }
 0x5ae   :  { %v7030_v28 = vpop.eup %7029  ;;  %7055 = vpow2.f32 %v4994_v20  ;;  %v5004_v29 = vadd.f32 1.0, %v7028_v5 }
 0x5af   :  { %v7032_v16 = vpop.eup %7031  ;;  %v5029_v26 = vmul.f32 %v7030_v28, %v8340_v43 }
 0x5b0   :  { %v7034_v39 = vpop.eup %7033  ;;  %v5005_v23 = vadd.f32 1.0, %v7032_v16 }
 0x5b1   :  { %v7036_v15 = vpop.eup %7035  ;;  %v5030_v1 = vmul.f32 %v7034_v39, %v8344_v38 }
 0x5b2   :  { %v7038_v14 = vpop.eup %7037  ;;  %v5006_v60 = vadd.f32 1.0, %v7036_v15  ;;  %7057 = vrcp.f32 %v5005_v23 }
 0x5b3   :  { %v7040_v41 = vpop.eup %7039  ;;  %v5031_v30 = vmul.f32 %v7038_v14, %v8348_v62  ;;  %v5076_v22 = vpack.c.bf16 %v5030_v1, %v5028_v13 }
 0x5b4   :  { %v7042_v44 = vpop.eup %7041  ;;  %7059 = vrcp.f32 %v5006_v60  ;;  %v5007_v40 = vadd.f32 1.0, %v7040_v41 }
 0x5b5   :  { %v7044_v17 = vpop.eup %7043  ;;  %7061 = vrcp.f32 %v5004_v29  ;;  %v5077_v35 = vpack.c.bf16 %v5031_v30, %v5029_v26  ;;  %v5032_v51 = vmul.f32 %v7042_v44, %v8352_v19 }
 0x5b6   :  { %v7046_v36 = vpop.eup %7045  ;;  %7063 = vrcp.f32 %v5007_v40  ;;  %v5008_v57 = vadd.f32 1.0, %v7044_v17 }
 0x5b7   :  { %v7048_v18 = vpop.eup %7047  ;;  %5219 = vmatprep.mubr.bf16.mxu0 %v5077_v35  ;;  %v5033_v58 = vmul.f32 %v7046_v36, %v8356_v46 }
 0x5b8   :  { %v7050_v38 = vpop.eup %7049  ;;  %v5009_v2 = vadd.f32 1.0, %v7048_v18  ;;  %5220 = vmatmul.mubr.bf16.vlgmr.msra.gmra.mxu0 %v5076_v22 }
 0x5b9   :  { %v7052_v43 = vpop.eup %7051  ;;  %v5034_v56 = vmul.f32 %v7050_v38, %v8360_v34 }
 0x5ba   :  { %v7054_v62 = vpop.eup %7053  ;;  %v5010_v12 = vadd.f32 1.0, %v7052_v43  ;;  %7065 = vrcp.f32 %v5009_v2 }
 0x5bb   :  { %v7056_v8 = vpop.eup %7055  ;;  %v5035_v33 = vmul.f32 %v7054_v62, %v8363_v63  ;;  %v5078_v52 = vpack.c.bf16 %v5034_v56, %v5032_v51 }
 0x5bc   :  { %7067 = vrcp.f32 %v5010_v12  ;;  %v5011_v50 = vadd.f32 1.0, %v7056_v8 }
 0x5bd   :  { %7069 = vrcp.f32 %v5008_v57  ;;  %v5079_v53 = vpack.c.bf16 %v5035_v33, %v5033_v58 }
 0x5be   :  { %7071 = vrcp.f32 %v5011_v50 }
 0x5bf   :  { %5227 = vmatprep.mubr.bf16.mxu0 %v5079_v53  ;;  %v7058_v48 = vpop.eup %7057 }
 0x5c0   :  { %5228 = vmatmul.mubr.bf16.gmra.mxu0 %v5078_v52  ;;  %v5037_v46 = vmul.f32 %v7058_v48, %v8372_v47 }
 0x5c1   :  { %v7060_v27 = vpop.eup %7059 }
 0x5c2   :  { %v7062_v34 = vpop.eup %7061  ;;  %v5038_v11 = vmul.f32 %v7060_v27, %v8376_v55 }
 0x5c3   :  { %v7064_v4 = vpop.eup %7063  ;;  %v5036_v19 = vmul.f32 %v7062_v34, %v8368_v6 }
 0x5c4   :  { %v5039_v63 = vmul.f32 %v7064_v4, %v8380_v31 }
 0x5c5   :  { %v5080_v24 = vpack.c.bf16 %v5038_v11, %v5036_v19 }
 0x5c6   :  { %v5081_v7 = vpack.c.bf16 %v5039_v63, %v5037_v46 }
 0x5c7   :  { %v7066_v49 = vpop.eup %7065 }
 0x5c8   :  { %5235 = vmatprep.mubr.bf16.mxu1 %v5081_v7  ;;  %v5041_v32 = vmul.f32 %v7066_v49, %v8388_v59 }
 0x5c9   :  { %v7068_v0 = vpop.eup %7067  ;;  %5236 = vmatmul.mubr.bf16.vlgmr.msra.gmra.mxu1 %v5080_v24 }
 0x5ca   :  { %v7070_v3 = vpop.eup %7069  ;;  %v5042_v21 = vmul.f32 %v7068_v0, %v8392_v9 }
 0x5cb   :  { %v7072_v61 = vpop.eup %7071  ;;  %v5040_v47 = vmul.f32 %v7070_v3, %v8384_v25 }
 0x5cc   :  { %v5043_v55 = vmul.f32 %v7072_v61, %v8395_v42 }
 0x5cd   :  { %v5082_v31 = vpack.c.bf16 %v5042_v21, %v5040_v47 }
 0x5ce   :  { %v5083_v37 = vpack.c.bf16 %v5043_v55, %v5041_v32 }
 0x5d0   :  { %5243 = vmatprep.mubr.bf16.mxu1 %v5083_v37 }
 0x5d1   :  { %5244 = vmatmul.mubr.bf16.gmra.mxu1 %v5082_v31 }
 0x678   :  { %v5757_v6 = vpop.f32.mrf.mxu0 }
 0x67a   :  { %v5758_v10 = vpop.f32.mrf.mxu0 }
 0x67b   :  { %v5759_v54 = vadd.f32 %v5758_v10, %v5757_v6 }
 0x67c   :  { %v5760_v20 = vpop.f32.mrf.mxu0 }
 0x67d   :  { %v5222_v9 = vadd.f32 %v5759_v54, %v5724_v45 }
 0x67e   :  { %v5761_v5 = vpop.f32.mrf.mxu0 }
 0x67f   :  { %5253 = vst.msk [vmem:[%s8462_s13] sm:$0xff] %vm5252_vm3, %v5222_v9  ;;  %v5762_v25 = vadd.f32 %v5761_v5, %v5760_v20 }
 0x680   :  { %v5763_v59 = vpop.f32.mrf.mxu0 }
 0x681   :  { %v5225_v42 = vadd.f32 %v5762_v25, %v5724_v45 }
 0x682   :  { %v5764_v28 = vpop.f32.mrf.mxu0 }
 0x683   :  { %5254 = vst.msk [vmem:[%s8462_s13 + $0x8] sm:$0xff] %vm5252_vm3, %v5225_v42  ;;  %v5765_v16 = vadd.f32 %v5764_v28, %v5763_v59 }
 0x684   :  { %v5766_v39 = vpop.f32.mrf.mxu0 }
 0x685   :  { %v5230_v23 = vadd.f32 %v5765_v16, %v5724_v45 }
 0x686   :  { %v5767_v15 = vpop.f32.mrf.mxu0 }
 0x687   :  { %5255 = vst.msk [vmem:[%s8462_s13 + $0x10] sm:$0xff] %vm5252_vm3, %v5230_v23  ;;  %v5768_v29 = vadd.f32 %v5767_v15, %v5766_v39 }
 0x689   :  { %v5233_v14 = vadd.f32 %v5768_v29, %v5724_v45  ;;  %v5769_v1 = vpop.f32.mrf.mxu1 }
 0x68b   :  { %5256 = vst.msk [vmem:[%s8462_s13 + $0x18] sm:$0xff] %vm5252_vm3, %v5233_v14  ;;  %v5770_v60 = vpop.f32.mrf.mxu1 }
 0x68c   :  { %v5771_v41 = vadd.f32 %v5770_v60, %v5769_v1 }
 0x68d   :  { %v5772_v26 = vpop.f32.mrf.mxu1 }
 0x68e   :  { %v5238_v30 = vadd.f32 %v5771_v41, %v5724_v45 }
 0x68f   :  { %v5773_v44 = vpop.f32.mrf.mxu1 }
 0x690   :  { %5257 = vst.msk [vmem:[%s8462_s13 + $0x20] sm:$0xff] %vm5252_vm3, %v5238_v30  ;;  %v5774_v13 = vadd.f32 %v5773_v44, %v5772_v26 }
 0x691   :  { %v5775_v40 = vpop.f32.mrf.mxu1 }
 0x692   :  { %v5241_v17 = vadd.f32 %v5774_v13, %v5724_v45 }
 0x693   :  { %v5776_v35 = vpop.f32.mrf.mxu1 }
 0x694   :  { %5258 = vst.msk [vmem:[%s8462_s13 + $0x28] sm:$0xff] %vm5252_vm3, %v5241_v17  ;;  %v5777_v36 = vadd.f32 %v5776_v35, %v5775_v40 }
 0x695   :  { %v5778_v22 = vpop.f32.mrf.mxu1 }
 0x696   :  { %v5246_v18 = vadd.f32 %v5777_v36, %v5724_v45 }
 0x697   :  { %v5779_v38 = vpop.f32.mrf.mxu1 }
 0x698   :  { %5259 = vst.msk [vmem:[%s8462_s13 + $0x30] sm:$0xff] %vm5252_vm3, %v5246_v18  ;;  %v5780_v2 = vadd.f32 %v5779_v38, %v5778_v22 }
 0x69a   :  { %v5249_v43 = vadd.f32 %v5780_v2, %v5724_v45 }
 0x69c   :  { %5260 = vst.msk [vmem:[%s8462_s13 + $0x38] sm:$0xff] %vm5252_vm3, %v5249_v43 }
 0x69d   :  { %5265 = vsyncpa [#allocation3], 1 }
 0x69e   :  { %5266 = vsyncpa [#allocation5], 1 }
 0x69f   :  { %5267 = vsyncpa [#allocation8], 1 }

</bundles_post_ra>
